<compile_context>
chip_gen: v7x
topology: tpu7x:2x2x1
jax: 0.10.0
libtpu: 0.0.40
codegen_flags: <defaults>
</compile_context>

<pallas_src>
import numpy as np
import jax
import jax.numpy as jnp
from jax import lax
from jax.experimental import pallas as pl
from jax.experimental.pallas import tpu as pltpu

# Review #4: switch to None (single-pass bf16 MXU) when H*W grows past the point where an
# exact-f32 / 2e-3 acceptance gate applies.  Kept exact here so the in-script validation
# against the f32 reference holds.
_PREC = lax.Precision.HIGHEST


# ----------------------------------------------------------------------------- glue --
def _bilinear_matrix(out_size, in_size):
    """Row weights of F.interpolate(mode='bilinear', align_corners=False)."""
    m = np.zeros((out_size, in_size), np.float32)
    scale = in_size / out_size
    for o in range(out_size):
        src = max((o + 0.5) * scale - 0.5, 0.0)
        i0 = min(int(np.floor(src)), in_size - 1)
        i1 = min(i0 + 1, in_size - 1)
        frac = src - i0
        m[o, i0] += 1.0 - frac
        m[o, i1] += frac
    return m


_TABLE_CACHE = {}


def _get_tables(H, W, F, Ph, Pw, L, w2, w3, b3):
    """Host-built constant tables, cached across calls (review #9: no per-call Python
    table rebuild and no repeated host->device upload)."""
    w2_np = np.asarray(w2, np.float32)
    w3_np = np.asarray(w3, np.float32)
    b3_np = np.asarray(b3, np.float32).reshape(F)
    key = (H, W, F, Ph, Pw, L, w2_np.tobytes(), w3_np.tobytes(), b3_np.tobytes())
    hit = _TABLE_CACHE.get(key)
    if hit is not None:
        return hit

    NP = Ph * Pw
    HW = H * W

    # 7x7/stride-3 max-pool windows of the stride-2-subsampled conv2 map as 0/1 masks
    # over the stride-1 flattened spatial axis; ONE row per pool window (un-tiled).
    M9 = np.zeros((NP, L), np.float32)
    for pi in range(Ph):
        for pj in range(Pw):
            p = pi * Pw + pj
            for r in range(7):
                for c in range(7):
                    q = (2 * (3 * pi + r)) * W + 2 * (3 * pj + c)
                    M9[p, q] = 1.0

    # conv2 weights reshaped for the fused single matmul: rows = F_out, cols ordered
    # [tap t = kh*3+kw, f_in] to match the (9F, L) tap scratch layout.
    W2flat = np.transpose(w2_np, (2, 0, 1, 3)).reshape(F, 9 * F)

    # conv3 (3x3, padding 1) on the (Ph, Pw) pooled grid as ONE dense matrix acting on
    # the channel-major flattened pooled vector.
    W3C = np.zeros((F * NP, F * NP), np.float32)
    for f_out in range(F):
        for pi2 in range(Ph):
            for pj2 in range(Pw):
                row = f_out * NP + pi2 * Pw + pj2
                for f_in in range(F):
                    for pi in range(Ph):
                        for pj in range(Pw):
                            kh, kw = pi - pi2 + 1, pj - pj2 + 1
                            if 0 <= kh < 3 and 0 <= kw < 3:
                                W3C[row, f_in * NP + pi * Pw + pj] = \
                                    w3_np[kh, kw, f_out, f_in]
    b3c = np.repeat(b3_np, NP).reshape(F * NP, 1)

    # Bilinear upsample (Ph, Pw) -> (H, W), align_corners=False.  De-tiled: one
    # lane-dense (HW) row per pooled cell, (NP, HW) — F-fold smaller than before.
    Ah = _bilinear_matrix(H, Ph)
    Aw = _bilinear_matrix(W, Pw)
    K = np.einsum("hp,wq->pqhw", Ah, Aw).reshape(NP, HW).astype(np.float32)

    hit = tuple(jnp.asarray(a) for a in (M9, W2flat, W3C, b3c, K))
    _TABLE_CACHE[key] = hit
    return hit


# --------------------------------------------------------------------------- kernel --
def _make_esa_kernel(W, F, NP, L):
    FNP = F * NP

    def kernel(x_ref, k_ref, m9_ref,
               w1_ref, b1_ref, w2f_ref, b2_ref, wf_ref, bf_ref,
               w3c_ref, b3c_ref, w4_ref, b4_ref,
               o_ref, c1_buf, tap_buf):
        x2d = x_ref[0]                                                     # (C, HW)

        # conv1 (1x1): write straight into the VMEM scratch (review #11) so the full
        # (F, HW) slab never has to sit live in vregs and then be copied.
        c1_buf[...] = (jnp.dot(w1_ref[...], x2d, precision=_PREC,
                               preferred_element_type=jnp.float32) + b1_ref[...])

        # conv_f (1x1), read from the scratch.
        cf = (jnp.dot(wf_ref[...], c1_buf[...], precision=_PREC,
                      preferred_element_type=jnp.float32) + bf_ref[...])   # (F, HW)

        # conv2 (3x3, stride 2, no padding) at stride-1 resolution, fused into ONE
        # matmul (review #3): the 9 taps are static lane-offset slices of c1 stacked on
        # the sublane axis of a (9F, L) scratch, multiplied once by w2 as (F, 9F).
        for t in range(9):
            kh, kw = divmod(t, 3)
            d = kh * W + kw
            tap_buf[t * F:(t + 1) * F, :] = c1_buf[:, pl.ds(d, L)]
        c2 = (jnp.dot(w2f_ref[...], tap_buf[...], precision=_PREC,
                      preferred_element_type=jnp.float32) + b2_ref[...])   # (F, L)

        # stride-2 subsample + 7x7/stride-3 max-pool folded into a masked lane-max,
        # done per channel against the un-tiled (NP, L) window mask (review #2: no Rep
        # matmul, no F-tiled mask, no (F*NP, L) replicated intermediate).
        sel = m9_ref[...] > 0.5                                            # (NP, L)
        cols = []
        for f in range(F):                                                 # tiny unroll
            masked = jnp.where(sel, c2[f:f + 1, :], -1e30)                 # (NP, L)
            cols.append(jnp.max(masked, axis=-1, keepdims=True))           # (NP, 1)
        vm_flat = jnp.concatenate(cols, axis=0)                            # (F*NP, 1)

        # conv3 (3x3, padding 1) on the pooled grid: one dense matmul on the flat vector.
        c3 = (jnp.dot(w3c_ref[...], vm_flat, precision=_PREC,
                      preferred_element_type=jnp.float32) + b3c_ref[...])  # (F*NP, 1)

        # (F*NP, 1) -> (F, NP) without relying on tiny reshape/transpose lowering:
        # diagonal-select + sublane-sum turns the column into a row, then the F channel
        # chunks are static lane slices stacked back on sublanes (all 36-element ops).
        eye = (lax.broadcasted_iota(jnp.int32, (FNP, FNP), 0) ==
               lax.broadcasted_iota(jnp.int32, (FNP, FNP), 1)).astype(jnp.float32)
        c3_row = jnp.sum(c3 * eye, axis=0, keepdims=True)                  # (1, F*NP)
        c3_mat = jnp.concatenate(
            [c3_row[:, f * NP:(f + 1) * NP] for f in range(F)], axis=0)    # (F, NP)

        # Bilinear upsample to (H, W): ONE matmul against the de-tiled (NP, HW) table
        # (review #1: Kbig, Rsel and the (F*NP, HW) elementwise multiply are gone).
        c3_up = jnp.dot(c3_mat, k_ref[...], precision=_PREC,
                        preferred_element_type=jnp.float32)                # (F, HW)

        # conv4 (1x1) + sigmoid gate applied to the input; lane-dense unmasked store.
        c4 = (jnp.dot(w4_ref[...], c3_up + cf, precision=_PREC,
                      preferred_element_type=jnp.float32) + b4_ref[...])   # (C, HW)
        gate = jax.nn.sigmoid(c4)                                          # review #8
        o_ref[0] = (x2d * gate).astype(o_ref.dtype)

    return kernel


def esa_pallas(x_nchw, p):
    N, C, H, W = x_nchw.shape
    F = p["w1"].shape[0]
    HW = H * W
    Ho, Wo = (H - 3) // 2 + 1, (W - 3) // 2 + 1
    assert Ho >= 7 and Wo >= 7, "spatial size too small for the 7x7/stride-3 max-pool"
    Ph, Pw = (Ho - 7) // 3 + 1, (Wo - 7) // 3 + 1
    NP = Ph * Pw
    FNP = F * NP

    # Static guards: largest stride-1 position any pool window reads and the largest
    # conv2 tap offset must stay inside the image / the conv2 slice.
    h_max = 2 * (3 * (Ph - 1) + 6)
    w_max = 2 * (3 * (Pw - 1) + 6)
    q_max = h_max * W + w_max
    d_max = 2 * W + 2
    assert h_max + 2 <= H - 1 and w_max + 2 <= W - 1, "conv2 taps would leave the image"
    L = min(-(-(q_max + 1) // 128) * 128, HW - d_max)        # lane-aligned when possible
    assert q_max < L <= HW - d_max, "pool windows would read outside the conv2 slice"
    # If L falls back to HW - d_max (non-multiple of 128) the kernel is still correct,
    # only the conv2/pool slices stop being lane-aligned.

    m9, w2f, w3c, b3c, kup = _get_tables(H, W, F, Ph, Pw, L, p["w2"], p["w3"], p["b3"])

    x3 = x_nchw.reshape(N, C, HW)                            # NCHW kept: no transpose

    def cspec(shape):
        # Constant across the grid: block == full array, index pinned to 0 (fetched
        # once).  At larger H*W also pass pipeline_mode=pl.Buffered(1) here so the
        # constants are single-buffered (review #6); <100 KB of VMEM at this size.
        return pl.BlockSpec(shape, lambda n: (0,) * len(shape))

    out3 = pl.pallas_call(
        _make_esa_kernel(W, F, NP, L),
        out_shape=jax.ShapeDtypeStruct((N, C, HW), jnp.float32),
        grid=(N,),
        in_specs=[
            pl.BlockSpec((1, C, HW), lambda n: (n, 0, 0)),   # x, one image per step
            cspec((NP, HW)),                                 # bilinear table (de-tiled)
            cspec((NP, L)),                                  # pool-window mask (de-tiled)
            cspec((F, C)), cspec((F, 1)),                    # conv1
            cspec((F, 9 * F)), cspec((F, 1)),                # conv2 (fused 9-tap)
            cspec((F, F)), cspec((F, 1)),                    # conv_f
            cspec((FNP, FNP)), cspec((FNP, 1)),              # conv3 (flattened dense)
            cspec((C, F)), cspec((C, 1)),                    # conv4
        ],
        out_specs=pl.BlockSpec((1, C, HW), lambda n: (n, 0, 0)),
        scratch_shapes=[pltpu.VMEM((F, HW), jnp.float32),        # c1 slab
                        pltpu.VMEM((9 * F, L), jnp.float32)],    # stacked conv2 taps
        compiler_params=pltpu.CompilerParams(
            dimension_semantics=("parallel",)),              # batches independent (v7x)
    )(x3, kup, m9,
      p["w1"], p["b1"], w2f, p["b2"], p["wf"], p["bf"],
      w3c, b3c, p["w4"], p["b4"])

    return out3.reshape(N, C, H, W)


# ---------------------------------------------------------------- pure-JAX reference --
def esa_reference(x, p):
    N, C, H, W = x.shape
    dn = ("NCHW", "OIHW", "NCHW")

    def conv(inp, w, b, stride=1, padding="VALID"):
        y = lax.conv_general_dilated(inp, w, (stride, stride), padding,
                                     dimension_numbers=dn,
                                     precision=lax.Precision.HIGHEST)
        return y + b.reshape(1, -1, 1, 1)

    c1_ = conv(x, p["w1"][:, :, None, None], p["b1"])
    c1 = conv(c1_, jnp.transpose(p["w2"], (2, 3, 0, 1)), p["b2"], stride=2)
    vmax = lax.reduce_window(c1, -jnp.inf, lax.max, (1, 1, 7, 7), (1, 1, 3, 3), "VALID")
    c3 = conv(vmax, jnp.transpose(p["w3"], (2, 3, 0, 1)), p["b3"],
              padding=[(1, 1), (1, 1)])
    Ph, Pw = c3.shape[2], c3.shape[3]
    Ah = jnp.asarray(_bilinear_matrix(H, Ph))
    Aw = jnp.asarray(_bilinear_matrix(W, Pw))
    c3_up = jnp.einsum("hp,wq,ncpq->nchw", Ah, Aw, c3,
                       precision=lax.Precision.HIGHEST)
    cf = conv(c1_, p["wf"][:, :, None, None], p["bf"])
    c4 = conv(c3_up + cf, p["w4"][:, :, None, None], p["b4"])
    return x * jax.nn.sigmoid(c4)


# ------------------------------------------------------------------------------ main --
if __name__ == "__main__":
    N, n_feats, esa_channels, H, W = 2, 8, 4, 32, 32
    C, F = n_feats, esa_channels

    ks = jax.random.split(jax.random.PRNGKey(0), 11)
    p = dict(
        w1=0.3 * jax.random.normal(ks[0], (F, C), jnp.float32),
        b1=0.1 * jax.random.normal(ks[1], (F, 1), jnp.float32),
        w2=0.3 * jax.random.normal(ks[2], (3, 3, F, F), jnp.float32),
        b2=0.1 * jax.random.normal(ks[3], (F, 1), jnp.float32),
        wf=0.3 * jax.random.normal(ks[4], (F, F), jnp.float32),
        bf=0.1 * jax.random.normal(ks[5], (F, 1), jnp.float32),
        w3=0.3 * jax.random.normal(ks[6], (3, 3, F, F), jnp.float32),
        b3=0.1 * jax.random.normal(ks[7], (F, 1), jnp.float32),
        w4=0.3 * jax.random.normal(ks[8], (C, F), jnp.float32),
        b4=0.1 * jax.random.normal(ks[9], (C, 1), jnp.float32),
    )
    x = jax.random.normal(ks[10], (N, C, H, W), jnp.float32)

    out = jax.block_until_ready(esa_pallas(x, p))
    ref = np.asarray(esa_reference(x, p))

    assert out.shape == x.shape
    if not np.allclose(np.asarray(out), ref, rtol=2e-3, atol=2e-3):
        diff = float(np.max(np.abs(np.asarray(out) - ref)))
        raise AssertionError(f"Pallas ESA mismatch vs reference, max|diff|={diff}")
    print("KERNEL_OK")
</pallas_src>

<mosaic_0001>
module attributes {stable_mosaic.version = 11 : i64} {
  func.func @kernel(%arg0: i32, %arg1: memref<1x8x1024xf32, #tpu.memory_space<vmem>>, %arg2: memref<9x1024xf32, #tpu.memory_space<vmem>>, %arg3: memref<9x896xf32, #tpu.memory_space<vmem>>, %arg4: memref<4x8xf32, #tpu.memory_space<vmem>>, %arg5: memref<4x1xf32, #tpu.memory_space<vmem>>, %arg6: memref<4x36xf32, #tpu.memory_space<vmem>>, %arg7: memref<4x1xf32, #tpu.memory_space<vmem>>, %arg8: memref<4x4xf32, #tpu.memory_space<vmem>>, %arg9: memref<4x1xf32, #tpu.memory_space<vmem>>, %arg10: memref<36x36xf32, #tpu.memory_space<vmem>>, %arg11: memref<36x1xf32, #tpu.memory_space<vmem>>, %arg12: memref<8x4xf32, #tpu.memory_space<vmem>>, %arg13: memref<8x1xf32, #tpu.memory_space<vmem>>, %arg14: memref<1x8x1024xf32, #tpu.memory_space<vmem>>, %arg15: memref<4x1024xf32, #tpu.memory_space<vmem>>, %arg16: memref<36x896xf32, #tpu.memory_space<vmem>>) attributes {dimension_semantics = [#tpu.dimension_semantics<parallel>], iteration_bounds = array<i64: 2>, scalar_prefetch = 0 : i64, scratch_operands = 2 : i64, tpu.core_type = #tpu.core_type<tc>, window_params = [{transform_indices = @transform_0, window_bounds = array<i64: 1, 8, 1024>}, {pipeline_mode = #tpu.pipeline_mode<synchronous>, transform_indices = @transform_1, window_bounds = array<i64: 9, 1024>}, {pipeline_mode = #tpu.pipeline_mode<synchronous>, transform_indices = @transform_2, window_bounds = array<i64: 9, 896>}, {pipeline_mode = #tpu.pipeline_mode<synchronous>, transform_indices = @transform_3, window_bounds = array<i64: 4, 8>}, {pipeline_mode = #tpu.pipeline_mode<synchronous>, transform_indices = @transform_4, window_bounds = array<i64: 4, 1>}, {pipeline_mode = #tpu.pipeline_mode<synchronous>, transform_indices = @transform_5, window_bounds = array<i64: 4, 36>}, {pipeline_mode = #tpu.pipeline_mode<synchronous>, transform_indices = @transform_6, window_bounds = array<i64: 4, 1>}, {pipeline_mode = #tpu.pipeline_mode<synchronous>, transform_indices = @transform_7, window_bounds = array<i64: 4, 4>}, {pipeline_mode = #tpu.pipeline_mode<synchronous>, transform_indices = @transform_8, window_bounds = array<i64: 4, 1>}, {pipeline_mode = #tpu.pipeline_mode<synchronous>, transform_indices = @transform_9, window_bounds = array<i64: 36, 36>}, {pipeline_mode = #tpu.pipeline_mode<synchronous>, transform_indices = @transform_10, window_bounds = array<i64: 36, 1>}, {pipeline_mode = #tpu.pipeline_mode<synchronous>, transform_indices = @transform_11, window_bounds = array<i64: 8, 4>}, {pipeline_mode = #tpu.pipeline_mode<synchronous>, transform_indices = @transform_12, window_bounds = array<i64: 8, 1>}, {transform_indices = @transform_13, window_bounds = array<i64: 1, 8, 1024>}]} {
    %c0 = arith.constant 0 : index
    %c0_0 = arith.constant 0 : index
    %c0_1 = arith.constant 0 : index
    %0 = vector.load %arg1[%c0, %c0_0, %c0_1] : memref<1x8x1024xf32, #tpu.memory_space<vmem>>, vector<1x8x1024xf32>
    %1 = vector.shape_cast %0 : vector<1x8x1024xf32> to vector<8x1024xf32>
    %c0_2 = arith.constant 0 : index
    %c0_3 = arith.constant 0 : index
    %2 = vector.load %arg4[%c0_2, %c0_3] : memref<4x8xf32, #tpu.memory_space<vmem>>, vector<4x8xf32>
    %cst = arith.constant dense<0.000000e+00> : vector<4x1024xf32>
    %3 = tpu.matmul %2, %1, %cst {dimension_numbers = #tpu.dot_dimension_numbers<[1], [0], [0], [1], [0, 0, 1, 1], [], []>, precision = #tpu.contract_precision<fp32>} : vector<4x8xf32>, vector<8x1024xf32>, vector<4x1024xf32> -> vector<4x1024xf32>
    %c0_4 = arith.constant 0 : index
    %c0_5 = arith.constant 0 : index
    %4 = vector.load %arg5[%c0_4, %c0_5] : memref<4x1xf32, #tpu.memory_space<vmem>>, vector<4x1xf32>
    %5 = vector.broadcast %4 : vector<4x1xf32> to vector<4x1024xf32>
    %6 = arith.addf %3, %5 : vector<4x1024xf32>
    %c0_6 = arith.constant 0 : index
    %c0_7 = arith.constant 0 : index
    %7 = vector.load %arg15[%c0_6, %c0_7] : memref<4x1024xf32, #tpu.memory_space<vmem>>, vector<4x1024xf32>
    tpu.vector_store %arg15[%c0_6, %c0_7], %6 {strides = array<i32>} : memref<4x1024xf32, #tpu.memory_space<vmem>>, vector<4x1024xf32>,
    %c0_8 = arith.constant 0 : index
    %c0_9 = arith.constant 0 : index
    %8 = vector.load %arg8[%c0_8, %c0_9] : memref<4x4xf32, #tpu.memory_space<vmem>>, vector<4x4xf32>
    %c0_10 = arith.constant 0 : index
    %c0_11 = arith.constant 0 : index
    %9 = vector.load %arg15[%c0_10, %c0_11] : memref<4x1024xf32, #tpu.memory_space<vmem>>, vector<4x1024xf32>
    %cst_12 = arith.constant dense<0.000000e+00> : vector<4x1024xf32>
    %10 = tpu.matmul %8, %9, %cst_12 {dimension_numbers = #tpu.dot_dimension_numbers<[1], [0], [0], [1], [0, 0, 1, 1], [], []>, precision = #tpu.contract_precision<fp32>} : vector<4x4xf32>, vector<4x1024xf32>, vector<4x1024xf32> -> vector<4x1024xf32>
    %c0_13 = arith.constant 0 : index
    %c0_14 = arith.constant 0 : index
    %11 = vector.load %arg9[%c0_13, %c0_14] : memref<4x1xf32, #tpu.memory_space<vmem>>, vector<4x1xf32>
    %12 = vector.broadcast %11 : vector<4x1xf32> to vector<4x1024xf32>
    %13 = arith.addf %10, %12 : vector<4x1024xf32>
    %c0_15 = arith.constant 0 : index
    %c0_16 = arith.constant 0 : index
    %14 = vector.load %arg15[%c0_15, %c0_16] : memref<4x1024xf32, #tpu.memory_space<vmem>>, vector<4x896xf32>
    %c0_17 = arith.constant 0 : index
    %c0_18 = arith.constant 0 : index
    %15 = vector.load %arg16[%c0_17, %c0_18] : memref<36x896xf32, #tpu.memory_space<vmem>>, vector<4x896xf32>
    tpu.vector_store %arg16[%c0_17, %c0_18], %14 {strides = array<i32>} : memref<36x896xf32, #tpu.memory_space<vmem>>, vector<4x896xf32>,
    %c0_19 = arith.constant 0 : index
    %c1 = arith.constant 1 : index
    %16 = vector.load %arg15[%c0_19, %c1] : memref<4x1024xf32, #tpu.memory_space<vmem>>, vector<4x896xf32>
    %c4 = arith.constant 4 : index
    %c0_20 = arith.constant 0 : index
    %17 = vector.load %arg16[%c4, %c0_20] : memref<36x896xf32, #tpu.memory_space<vmem>>, vector<4x896xf32>
    tpu.vector_store %arg16[%c4, %c0_20], %16 {strides = array<i32>} : memref<36x896xf32, #tpu.memory_space<vmem>>, vector<4x896xf32>,
    %c0_21 = arith.constant 0 : index
    %c2 = arith.constant 2 : index
    %18 = vector.load %arg15[%c0_21, %c2] : memref<4x1024xf32, #tpu.memory_space<vmem>>, vector<4x896xf32>
    %c8 = arith.constant 8 : index
    %c0_22 = arith.constant 0 : index
    %19 = vector.load %arg16[%c8, %c0_22] : memref<36x896xf32, #tpu.memory_space<vmem>>, vector<4x896xf32>
    tpu.vector_store %arg16[%c8, %c0_22], %18 {strides = array<i32>} : memref<36x896xf32, #tpu.memory_space<vmem>>, vector<4x896xf32>,
    %c0_23 = arith.constant 0 : index
    %c32 = arith.constant 32 : index
    %20 = vector.load %arg15[%c0_23, %c32] : memref<4x1024xf32, #tpu.memory_space<vmem>>, vector<4x896xf32>
    %c12 = arith.constant 12 : index
    %c0_24 = arith.constant 0 : index
    %21 = vector.load %arg16[%c12, %c0_24] : memref<36x896xf32, #tpu.memory_space<vmem>>, vector<4x896xf32>
    tpu.vector_store %arg16[%c12, %c0_24], %20 {strides = array<i32>} : memref<36x896xf32, #tpu.memory_space<vmem>>, vector<4x896xf32>,
    %c0_25 = arith.constant 0 : index
    %c33 = arith.constant 33 : index
    %22 = vector.load %arg15[%c0_25, %c33] : memref<4x1024xf32, #tpu.memory_space<vmem>>, vector<4x896xf32>
    %c16 = arith.constant 16 : index
    %c0_26 = arith.constant 0 : index
    %23 = vector.load %arg16[%c16, %c0_26] : memref<36x896xf32, #tpu.memory_space<vmem>>, vector<4x896xf32>
    tpu.vector_store %arg16[%c16, %c0_26], %22 {strides = array<i32>} : memref<36x896xf32, #tpu.memory_space<vmem>>, vector<4x896xf32>,
    %c0_27 = arith.constant 0 : index
    %c34 = arith.constant 34 : index
    %24 = vector.load %arg15[%c0_27, %c34] : memref<4x1024xf32, #tpu.memory_space<vmem>>, vector<4x896xf32>
    %c20 = arith.constant 20 : index
    %c0_28 = arith.constant 0 : index
    %25 = vector.load %arg16[%c20, %c0_28] : memref<36x896xf32, #tpu.memory_space<vmem>>, vector<4x896xf32>
    tpu.vector_store %arg16[%c20, %c0_28], %24 {strides = array<i32>} : memref<36x896xf32, #tpu.memory_space<vmem>>, vector<4x896xf32>,
    %c0_29 = arith.constant 0 : index
    %c64 = arith.constant 64 : index
    %26 = vector.load %arg15[%c0_29, %c64] : memref<4x1024xf32, #tpu.memory_space<vmem>>, vector<4x896xf32>
    %c24 = arith.constant 24 : index
    %c0_30 = arith.constant 0 : index
    %27 = vector.load %arg16[%c24, %c0_30] : memref<36x896xf32, #tpu.memory_space<vmem>>, vector<4x896xf32>
    tpu.vector_store %arg16[%c24, %c0_30], %26 {strides = array<i32>} : memref<36x896xf32, #tpu.memory_space<vmem>>, vector<4x896xf32>,
    %c0_31 = arith.constant 0 : index
    %c65 = arith.constant 65 : index
    %28 = vector.load %arg15[%c0_31, %c65] : memref<4x1024xf32, #tpu.memory_space<vmem>>, vector<4x896xf32>
    %c28 = arith.constant 28 : index
    %c0_32 = arith.constant 0 : index
    %29 = vector.load %arg16[%c28, %c0_32] : memref<36x896xf32, #tpu.memory_space<vmem>>, vector<4x896xf32>
    tpu.vector_store %arg16[%c28, %c0_32], %28 {strides = array<i32>} : memref<36x896xf32, #tpu.memory_space<vmem>>, vector<4x896xf32>,
    %c0_33 = arith.constant 0 : index
    %c66 = arith.constant 66 : index
    %30 = vector.load %arg15[%c0_33, %c66] : memref<4x1024xf32, #tpu.memory_space<vmem>>, vector<4x896xf32>
    %c32_34 = arith.constant 32 : index
    %c0_35 = arith.constant 0 : index
    %31 = vector.load %arg16[%c32_34, %c0_35] : memref<36x896xf32, #tpu.memory_space<vmem>>, vector<4x896xf32>
    tpu.vector_store %arg16[%c32_34, %c0_35], %30 {strides = array<i32>} : memref<36x896xf32, #tpu.memory_space<vmem>>, vector<4x896xf32>,
    %c0_36 = arith.constant 0 : index
    %c0_37 = arith.constant 0 : index
    %32 = vector.load %arg6[%c0_36, %c0_37] : memref<4x36xf32, #tpu.memory_space<vmem>>, vector<4x36xf32>
    %c0_38 = arith.constant 0 : index
    %c0_39 = arith.constant 0 : index
    %33 = vector.load %arg16[%c0_38, %c0_39] : memref<36x896xf32, #tpu.memory_space<vmem>>, vector<36x896xf32>
    %cst_40 = arith.constant dense<0.000000e+00> : vector<4x896xf32>
    %34 = tpu.matmul %32, %33, %cst_40 {dimension_numbers = #tpu.dot_dimension_numbers<[1], [0], [0], [1], [0, 0, 1, 1], [], []>, precision = #tpu.contract_precision<fp32>} : vector<4x36xf32>, vector<36x896xf32>, vector<4x896xf32> -> vector<4x896xf32>
    %c0_41 = arith.constant 0 : index
    %c0_42 = arith.constant 0 : index
    %35 = vector.load %arg7[%c0_41, %c0_42] : memref<4x1xf32, #tpu.memory_space<vmem>>, vector<4x1xf32>
    %36 = vector.broadcast %35 : vector<4x1xf32> to vector<4x896xf32>
    %37 = arith.addf %34, %36 : vector<4x896xf32>
    %c0_43 = arith.constant 0 : index
    %c0_44 = arith.constant 0 : index
    %38 = vector.load %arg3[%c0_43, %c0_44] : memref<9x896xf32, #tpu.memory_space<vmem>>, vector<9x896xf32>
    %cst_45 = arith.constant 5.000000e-01 : f32
    %39 = vector.broadcast %cst_45 : f32 to vector<9x896xf32>
    %40 = arith.cmpf ogt, %38, %39 : vector<9x896xf32>
    %41 = vector.extract_strided_slice %37 {offsets = [0, 0], sizes = [1, 896], strides = [1, 1]} : vector<4x896xf32> to vector<1x896xf32>
    %cst_46 = arith.constant -1.000000e+30 : f32
    %42 = vector.shape_cast %41 : vector<1x896xf32> to vector<1x896xf32>
    %43 = vector.broadcast %42 : vector<1x896xf32> to vector<9x896xf32>
    %44 = vector.broadcast %cst_46 : f32 to vector<9x896xf32>
    %45 = arith.select %40, %43, %44 : vector<9x896xi1>, vector<9x896xf32>
    %cst_47 = arith.constant dense<0xFF800000> : vector<9xf32>
    %46 = vector.multi_reduction <maximumf>, %45, %cst_47 [1] : vector<9x896xf32> to vector<9xf32>
    %47 = vector.shape_cast %46 : vector<9xf32> to vector<9x1xf32>
    %48 = vector.extract_strided_slice %37 {offsets = [1, 0], sizes = [1, 896], strides = [1, 1]} : vector<4x896xf32> to vector<1x896xf32>
    %cst_48 = arith.constant -1.000000e+30 : f32
    %49 = vector.shape_cast %48 : vector<1x896xf32> to vector<1x896xf32>
    %50 = vector.broadcast %49 : vector<1x896xf32> to vector<9x896xf32>
    %51 = vector.broadcast %cst_48 : f32 to vector<9x896xf32>
    %52 = arith.select %40, %50, %51 : vector<9x896xi1>, vector<9x896xf32>
    %cst_49 = arith.constant dense<0xFF800000> : vector<9xf32>
    %53 = vector.multi_reduction <maximumf>, %52, %cst_49 [1] : vector<9x896xf32> to vector<9xf32>
    %54 = vector.shape_cast %53 : vector<9xf32> to vector<9x1xf32>
    %55 = vector.extract_strided_slice %37 {offsets = [2, 0], sizes = [1, 896], strides = [1, 1]} : vector<4x896xf32> to vector<1x896xf32>
    %cst_50 = arith.constant -1.000000e+30 : f32
    %56 = vector.shape_cast %55 : vector<1x896xf32> to vector<1x896xf32>
    %57 = vector.broadcast %56 : vector<1x896xf32> to vector<9x896xf32>
    %58 = vector.broadcast %cst_50 : f32 to vector<9x896xf32>
    %59 = arith.select %40, %57, %58 : vector<9x896xi1>, vector<9x896xf32>
    %cst_51 = arith.constant dense<0xFF800000> : vector<9xf32>
    %60 = vector.multi_reduction <maximumf>, %59, %cst_51 [1] : vector<9x896xf32> to vector<9xf32>
    %61 = vector.shape_cast %60 : vector<9xf32> to vector<9x1xf32>
    %62 = vector.extract_strided_slice %37 {offsets = [3, 0], sizes = [1, 896], strides = [1, 1]} : vector<4x896xf32> to vector<1x896xf32>
    %cst_52 = arith.constant -1.000000e+30 : f32
    %63 = vector.shape_cast %62 : vector<1x896xf32> to vector<1x896xf32>
    %64 = vector.broadcast %63 : vector<1x896xf32> to vector<9x896xf32>
    %65 = vector.broadcast %cst_52 : f32 to vector<9x896xf32>
    %66 = arith.select %40, %64, %65 : vector<9x896xi1>, vector<9x896xf32>
    %cst_53 = arith.constant dense<0xFF800000> : vector<9xf32>
    %67 = vector.multi_reduction <maximumf>, %66, %cst_53 [1] : vector<9x896xf32> to vector<9xf32>
    %68 = vector.shape_cast %67 : vector<9xf32> to vector<9x1xf32>
    %69 = tpu.concatenate %47, %54, %61, %68 in 0 : vector<9x1xf32>, vector<9x1xf32>, vector<9x1xf32>, vector<9x1xf32> -> vector<36x1xf32>
    %c0_54 = arith.constant 0 : index
    %c0_55 = arith.constant 0 : index
    %70 = vector.load %arg10[%c0_54, %c0_55] : memref<36x36xf32, #tpu.memory_space<vmem>>, vector<36x36xf32>
    %cst_56 = arith.constant dense<0.000000e+00> : vector<36x1xf32>
    %71 = tpu.matmul %70, %69, %cst_56 {dimension_numbers = #tpu.dot_dimension_numbers<[1], [0], [0], [1], [0, 0, 1, 1], [], []>, precision = #tpu.contract_precision<fp32>} : vector<36x36xf32>, vector<36x1xf32>, vector<36x1xf32> -> vector<36x1xf32>
    %c0_57 = arith.constant 0 : index
    %c0_58 = arith.constant 0 : index
    %72 = vector.load %arg11[%c0_57, %c0_58] : memref<36x1xf32, #tpu.memory_space<vmem>>, vector<36x1xf32>
    %73 = arith.addf %71, %72 : vector<36x1xf32>
    %74 = tpu.iota {dimensions = array<i32: 0>} : vector<36x36xi32>
    %75 = tpu.iota {dimensions = array<i32: 1>} : vector<36x36xi32>
    %76 = arith.cmpi eq, %74, %75 : vector<36x36xi32>
    %77 = arith.extui %76 : vector<36x36xi1> to vector<36x36xi32>
    %78 = arith.sitofp %77 : vector<36x36xi32> to vector<36x36xf32>
    %79 = vector.broadcast %73 : vector<36x1xf32> to vector<36x36xf32>
    %80 = arith.mulf %79, %78 : vector<36x36xf32>
    %cst_59 = arith.constant dense<0.000000e+00> : vector<36xf32>
    %81 = vector.multi_reduction <add>, %80, %cst_59 [0] : vector<36x36xf32> to vector<36xf32>
    %82 = vector.shape_cast %81 : vector<36xf32> to vector<1x36xf32>
    %83 = vector.extract_strided_slice %82 {offsets = [0, 0], sizes = [1, 9], strides = [1, 1]} : vector<1x36xf32> to vector<1x9xf32>
    %84 = vector.extract_strided_slice %82 {offsets = [0, 9], sizes = [1, 9], strides = [1, 1]} : vector<1x36xf32> to vector<1x9xf32>
    %85 = vector.extract_strided_slice %82 {offsets = [0, 18], sizes = [1, 9], strides = [1, 1]} : vector<1x36xf32> to vector<1x9xf32>
    %86 = vector.extract_strided_slice %82 {offsets = [0, 27], sizes = [1, 9], strides = [1, 1]} : vector<1x36xf32> to vector<1x9xf32>
    %87 = tpu.concatenate %83, %84, %85, %86 in 0 : vector<1x9xf32>, vector<1x9xf32>, vector<1x9xf32>, vector<1x9xf32> -> vector<4x9xf32>
    %c0_60 = arith.constant 0 : index
    %c0_61 = arith.constant 0 : index
    %88 = vector.load %arg2[%c0_60, %c0_61] : memref<9x1024xf32, #tpu.memory_space<vmem>>, vector<9x1024xf32>
    %cst_62 = arith.constant dense<0.000000e+00> : vector<4x1024xf32>
    %89 = tpu.matmul %87, %88, %cst_62 {dimension_numbers = #tpu.dot_dimension_numbers<[1], [0], [0], [1], [0, 0, 1, 1], [], []>, precision = #tpu.contract_precision<fp32>} : vector<4x9xf32>, vector<9x1024xf32>, vector<4x1024xf32> -> vector<4x1024xf32>
    %c0_63 = arith.constant 0 : index
    %c0_64 = arith.constant 0 : index
    %90 = vector.load %arg12[%c0_63, %c0_64] : memref<8x4xf32, #tpu.memory_space<vmem>>, vector<8x4xf32>
    %91 = arith.addf %89, %13 : vector<4x1024xf32>
    %cst_65 = arith.constant dense<0.000000e+00> : vector<8x1024xf32>
    %92 = tpu.matmul %90, %91, %cst_65 {dimension_numbers = #tpu.dot_dimension_numbers<[1], [0], [0], [1], [0, 0, 1, 1], [], []>, precision = #tpu.contract_precision<fp32>} : vector<8x4xf32>, vector<4x1024xf32>, vector<8x1024xf32> -> vector<8x1024xf32>
    %c0_66 = arith.constant 0 : index
    %c0_67 = arith.constant 0 : index
    %93 = vector.load %arg13[%c0_66, %c0_67] : memref<8x1xf32, #tpu.memory_space<vmem>>, vector<8x1xf32>
    %94 = vector.broadcast %93 : vector<8x1xf32> to vector<8x1024xf32>
    %95 = arith.addf %92, %94 : vector<8x1024xf32>
    %96 = arith.negf %95 : vector<8x1024xf32>
    %97 = math.exp %96 : vector<8x1024xf32>
    %cst_68 = arith.constant 1.000000e+00 : f32
    %98 = vector.broadcast %cst_68 : f32 to vector<8x1024xf32>
    %99 = arith.addf %98, %97 : vector<8x1024xf32>
    %100 = arith.divf %98, %99 : vector<8x1024xf32>
    %101 = arith.mulf %1, %100 : vector<8x1024xf32>
    %c0_69 = arith.constant 0 : index
    %c0_70 = arith.constant 0 : index
    %c0_71 = arith.constant 0 : index
    %102 = vector.load %arg14[%c0_69, %c0_70, %c0_71] : memref<1x8x1024xf32, #tpu.memory_space<vmem>>, vector<1x8x1024xf32>
    %103 = vector.shape_cast %102 : vector<1x8x1024xf32> to vector<8x1024xf32>
    %104 = vector.shape_cast %101 : vector<8x1024xf32> to vector<1x8x1024xf32>
    tpu.vector_store %arg14[%c0_69, %c0_70, %c0_71], %104 {strides = array<i32>} : memref<1x8x1024xf32, #tpu.memory_space<vmem>>, vector<1x8x1024xf32>,
    return
  }
  func.func @transform_0(%arg0: i32) -> (i32, i32, i32) {
    %c0_i32 = arith.constant 0 : i32
    %c0_i32_0 = arith.constant 0 : i32
    %c0_i32_1 = arith.constant 0 : i32
    return %arg0, %c0_i32, %c0_i32_0 : i32, i32, i32
  }
  func.func @transform_1(%arg0: i32) -> (i32, i32) {
    %c0_i32 = arith.constant 0 : i32
    %c0_i32_0 = arith.constant 0 : i32
    %c0_i32_1 = arith.constant 0 : i32
    return %c0_i32, %c0_i32_0 : i32, i32
  }
  func.func @transform_2(%arg0: i32) -> (i32, i32) {
    %c0_i32 = arith.constant 0 : i32
    %c0_i32_0 = arith.constant 0 : i32
    %c0_i32_1 = arith.constant 0 : i32
    return %c0_i32, %c0_i32_0 : i32, i32
  }
  func.func @transform_3(%arg0: i32) -> (i32, i32) {
    %c0_i32 = arith.constant 0 : i32
    %c0_i32_0 = arith.constant 0 : i32
    %c0_i32_1 = arith.constant 0 : i32
    return %c0_i32, %c0_i32_0 : i32, i32
  }
  func.func @transform_4(%arg0: i32) -> (i32, i32) {
    %c0_i32 = arith.constant 0 : i32
    %c0_i32_0 = arith.constant 0 : i32
    %c0_i32_1 = arith.constant 0 : i32
    return %c0_i32, %c0_i32_0 : i32, i32
  }
  func.func @transform_5(%arg0: i32) -> (i32, i32) {
    %c0_i32 = arith.constant 0 : i32
    %c0_i32_0 = arith.constant 0 : i32
    %c0_i32_1 = arith.constant 0 : i32
    return %c0_i32, %c0_i32_0 : i32, i32
  }
  func.func @transform_6(%arg0: i32) -> (i32, i32) {
    %c0_i32 = arith.constant 0 : i32
    %c0_i32_0 = arith.constant 0 : i32
    %c0_i32_1 = arith.constant 0 : i32
    return %c0_i32, %c0_i32_0 : i32, i32
  }
  func.func @transform_7(%arg0: i32) -> (i32, i32) {
    %c0_i32 = arith.constant 0 : i32
    %c0_i32_0 = arith.constant 0 : i32
    %c0_i32_1 = arith.constant 0 : i32
    return %c0_i32, %c0_i32_0 : i32, i32
  }
  func.func @transform_8(%arg0: i32) -> (i32, i32) {
    %c0_i32 = arith.constant 0 : i32
    %c0_i32_0 = arith.constant 0 : i32
    %c0_i32_1 = arith.constant 0 : i32
    return %c0_i32, %c0_i32_0 : i32, i32
  }
  func.func @transform_9(%arg0: i32) -> (i32, i32) {
    %c0_i32 = arith.constant 0 : i32
    %c0_i32_0 = arith.constant 0 : i32
    %c0_i32_1 = arith.constant 0 : i32
    return %c0_i32, %c0_i32_0 : i32, i32
  }
  func.func @transform_10(%arg0: i32) -> (i32, i32) {
    %c0_i32 = arith.constant 0 : i32
    %c0_i32_0 = arith.constant 0 : i32
    %c0_i32_1 = arith.constant 0 : i32
    return %c0_i32, %c0_i32_0 : i32, i32
  }
  func.func @transform_11(%arg0: i32) -> (i32, i32) {
    %c0_i32 = arith.constant 0 : i32
    %c0_i32_0 = arith.constant 0 : i32
    %c0_i32_1 = arith.constant 0 : i32
    return %c0_i32, %c0_i32_0 : i32, i32
  }
  func.func @transform_12(%arg0: i32) -> (i32, i32) {
    %c0_i32 = arith.constant 0 : i32
    %c0_i32_0 = arith.constant 0 : i32
    %c0_i32_1 = arith.constant 0 : i32
    return %c0_i32, %c0_i32_0 : i32, i32
  }
  func.func @transform_13(%arg0: i32) -> (i32, i32, i32) {
    %c0_i32 = arith.constant 0 : i32
    %c0_i32_0 = arith.constant 0 : i32
    %c0_i32_1 = arith.constant 0 : i32
    return %arg0, %c0_i32, %c0_i32_0 : i32, i32, i32
  }
}

</mosaic_0001>

<bundles_post_ra>
// kernel: tpu_custom_call.1
= control target key start
LH: loop header
LB: loop body
LE: loop exit
PB: predicated region body
PF: predicated region fallthrough
CT: control target
= control target key end

     0   :  { %s15863_s0 = inlined_call_operand.hbm [shape: f32[2,8,1024], index: 0, kind: input, shape index: {}]   ;;  %s15864_s1 = inlined_call_operand.hbm [shape: f32[9,1024], index: 1, kind: input, shape index: {}]   ;;  %s15865_s2 = inlined_call_operand.hbm [shape: f32[9,896], index: 2, kind: input, shape index: {}]   ;;  %s15866_s3 = inlined_call_operand.vmem [shape: f32[4,8], index: 3, kind: input, shape index: {}]   ;;  %s15867_s4 = inlined_call_operand.vmem [shape: f32[4,1], index: 4, kind: input, shape index: {}]   ;;  %s15868_s5 = inlined_call_operand.vmem [shape: f32[4,36], index: 5, kind: input, shape index: {}]   ;;  %s15869_s6 = inlined_call_operand.vmem [shape: f32[4,1], index: 6, kind: input, shape index: {}]   ;;  %s15870_s7 = inlined_call_operand.vmem [shape: f32[4,4], index: 7, kind: input, shape index: {}]   ;;  %s15871_s8 = inlined_call_operand.vmem [shape: f32[4,1], index: 8, kind: input, shape index: {}]   ;;  %s15872_s9 = inlined_call_operand.vmem [shape: f32[36,36], index: 9, kind: input, shape index: {}]   ;;  %s15873_s10 = inlined_call_operand.vmem [shape: f32[36,1], index: 10, kind: input, shape index: {}]   ;;  %s15874_s11 = inlined_call_operand.vmem [shape: f32[8,4], index: 11, kind: input, shape index: {}]   ;;  %s15875_s12 = inlined_call_operand.vmem [shape: f32[8,1], index: 12, kind: input, shape index: {}]   ;;  %s15876_s13 = inlined_call_operand.hbm [shape: f32[2,8,1024], index: 13, kind: output, shape index: {}]  }
   0x1   :  { %15916 = sst [smem:[#allocation21_spill]] %s15874_s11 }
   0x2   :  { %15917 = sst [smem:[#allocation22_spill]] %s15875_s12 }
   0x3   :  { %15918 = sst [smem:[#allocation23_spill]] %s15876_s13 }
   0x4   :  { %18 = vsyncpa [#allocation5], 0 }
   0x5   :  { %20 = vsyncpa [#allocation5 + $0x1], 0 }
   0x6   :  { %21 = vsyncpa [#allocation8], 0 }
   0x7   :  { %22 = vsyncpa [#allocation6], 0 }
   0x8   :  { %24 = vsyncpa [#allocation6 + $0x1], 0  ;;  %s13493_s25 = smov 0   ;;  %s13495_s26 = smov 0  }
   0x9   :  { %s13497_s27 = smov 0   ;;  %s13499_s28 = smov 0  }
   0xa LB: > { %15919 = sst [smem:[#allocation14_spill]] %s13386_s25  ;;  %s13514_s29 = sadd.s32 4294967295, %s13398_s28   ;;  %s13398_s28 = sphi %s13499_s28, %s15996_s28   ;;  %s13394_s27 = sphi %s13497_s27, %s15995_s27   ;;  %s13390_s26 = sphi %s13495_s26, %s15994_s26   ;;  %s13386_s25 = sphi %s13493_s25, %s15993_s25  }
   0xb   : > { %s12140_s30 = sadd.s32 4294967294, %s13398_s28   ;;  %p50_p0 = scmp.ne.s32.totalorder %s13390_s26, %s13386_s25 }
   0xc   : > { %p15879_p1 = scmp.eq.s32.totalorder %s13514_s29, 0  ;;  %p332_p3 = scmp.eq.s32.totalorder %s12140_s30, 1 }
   0xd   : > { %p12141_p5 = scmp.ge.s32.totalorder %s13398_s28, 1  ;;  %p339_p7 = scmp.lt.s32.totalorder %s13398_s28, 3 }
   0xe   : > { %p13523_p4 = por %p15879_p1, %p50_p0  ;;  %p13528_p6 = por %p332_p3, %p50_p0 }
   0xf   : > { %p13533_p8 = pnand %p12141_p5, %p339_p7  ;;  %s13400_s17 = smov [#allocation7]  }
  0x10   : > { %s15920_s14 = scalar_select %p13523_p4, 1, 0 }
  0x11   : > { %s15921_s15 = scalar_select %p13528_p6, 1, 0 }
  0x12   : > { %s351_s18 = sshll.u32 %s13400_s17, 4  ;;  %p13118_p9 = pneg %p13533_p8  ;;  %s13537_s18 = int_to_ptr.vmem [resolvable:$true] %s351_s18 }
  0x13   : > { %15922 = sst [smem:[#allocation15_spill]] %s15921_s15  ;;  %s13401_s20 = smov [#allocation9]  }
  0x14   : > { %p13544_p11 = pnand %p13118_p9, %p15879_p1  ;;  %s364_s21 = sshll.u32 %s13401_s20, 4  ;;  %s13548_s21 = int_to_ptr.vmem [resolvable:$true] %s364_s21 }
  0x15   : > { %s13242_s24 = scalar_lea.hbm %s15864_s1, 2048 }
  0x16   : > { %p13243_p12 = scmp.ne.s32.totalorder %s15864_s1, %s13242_s24  ;;  %p13244_p13 = pneg %p13544_p11 }
  0x17   : > { %p13249_p5 = scmp.lt.u32.totalorder %s13242_s24, %s15864_s1 }
  0x18   : > { %p13245_p0 = pnand %p13244_p13, %p13243_p12 }
  0x1a   : > { %p13246_p3 = pneg %p13245_p0 }
  0x1c   : > { %p13251_p7 = pnand %p13249_p5, %p13246_p3 }
  0x1e   : > { %13254 = shalt.err (!%p13251_p7)
}
  0x1f   : > { %s13255_s20 = scalar_lea.vmem %s13537_s18, 2048  ;;  %p13263_p2 = scmp.lt.s32.totalorder %s13537_s18, %s13537_s18 }
  0x20   : > { %p13256_p9 = scmp.ne.s32.totalorder %s13537_s18, %s13255_s20  ;;  %p13264_p12 = scmp.lt.s32.totalorder %s13255_s20, %s13255_s20 }
  0x22   : > { %p13258_p10 = pnand %p13256_p9, %p13244_p13  ;;  %p13265_p0 = por %p13264_p12, %p13263_p2 }
  0x24   : > { %p13259_p1 = pneg %p13258_p10 }
  0x26   : > { %p13266_p6 = pnand %p13265_p0, %p13259_p1 }
  0x28   : > { %13269 = shalt.err (!%p13266_p6)
}
  0x29   : > { %s13402_s25 = smov 1024   ;;  %s13403_s15 = smov 64  }
  0x2a   : > { %13121 = dma.hbm_to_vmem [thread:$0]  (!%p13544_p11), %s15864_s1, 2048, %s13537_s18, [#allocation8], %s13402_s25, %s13402_s25, %s13403_s15  }
  0x2b   : > { %s13270_s17 = scalar_lea.hbm %s15865_s2, 1792 }
  0x2c   : > { %p13271_p2 = scmp.ne.s32.totalorder %s15865_s2, %s13270_s17  ;;  %p13277_p10 = scmp.lt.u32.totalorder %s13270_s17, %s15865_s2 }
  0x2e   : > { %p13273_p1 = pnand %p13271_p2, %p13244_p13 }
  0x30   : > { %p13274_p6 = pneg %p13273_p1 }
  0x32   : > { %p13279_p3 = pnand %p13277_p10, %p13274_p6 }
  0x34   : > { %13282 = shalt.err (!%p13279_p3)
}
  0x35   : > { %s13283_s18 = scalar_lea.vmem %s13548_s21, 1792  ;;  %p13291_p12 = scmp.lt.s32.totalorder %s13548_s21, %s13548_s21 }
  0x36   : > { %p13284_p5 = scmp.ne.s32.totalorder %s13548_s21, %s13283_s18  ;;  %p13292_p0 = scmp.lt.s32.totalorder %s13283_s18, %s13283_s18 }
  0x38   : > { %p13286_p7 = pnand %p13284_p5, %p13244_p13  ;;  %p13293_p2 = por %p13292_p0, %p13291_p12 }
  0x3a   : > { %p13287_p9 = pneg %p13286_p7 }
  0x3c   : > { %p13294_p1 = pnand %p13293_p2, %p13287_p9 }
  0x3e   : > { %13297 = shalt.err (!%p13294_p1)
}
  0x3f   : > { %s13404_s11 = smov 896   ;;  %s13405_s12 = smov 56  }
  0x40   : > { %13124 = dma.hbm_to_vmem [thread:$0]  (!%p13544_p11), %s15865_s2, 1792, %s13548_s21, [#allocation8], %s13404_s11, %s13404_s11, %s13405_s12  }
  0x41   : > { %s13603_s15 = sadd.s32 1, %s13398_s28   ;;  %s37_s23 = sadd.s32 1, %s13394_s27 }
  0x42   : > { %s34_s22 = ssub.s32 %s13398_s28, %s13603_s15  ;;  %p44_p6 = scmp.ne.s32.totalorder %s13394_s27, %s13390_s26 }
  0x43   : > { %p35_p13 = scmp.eq.s32.totalorder %s34_s22, 0  ;;  %p45_p10 = scmp.eq.s32.totalorder %s13398_s28, 0 }
  0x44   : > { %p15925_p5 = scmp.eq.s32.totalorder %s13514_s29, 1  ;;  %p13135_p9 = scmp.lt.s32.totalorder %s13398_s28, 2 }
  0x45   : > { %s13612_s24 = scalar_select %p35_p13, %s13394_s27, %s37_s23  }
  0x46   : > { %p46_p3 = por %p45_p10, %p44_p6  ;;  %p13616_p7 = por %p15925_p5, %p44_p6 }
  0x47   : > { %s408_s19 = sand.u32 1, %s13394_s27   ;;  %s12171_s21 = sshll.u32 %s13398_s28, 10 }
  0x48   : > { %s15926_s30 = scalar_select %p13616_p7, 1, 0 }
  0x49   : > { %s12145_s17 = sshll.u32 %s408_s19, 6  ;;  %s13626_s11 = scalar_lea.hbm %s15863_s0, %s12171_s21 }
  0x4a   : > { %s412_s12 = scalar_lea.vmem [#allocation4], %s12145_s17  ;;  %p13630_p11 = pnand %p13135_p9, %p46_p3 }
  0x4b   : > { %s420_s13 = sshll.u32 %s412_s12, 4  ;;  %s409_s22 = scalar_lea.sflag [#allocation5], %s408_s19  ;;  %s13628_s13 = int_to_ptr.vmem [resolvable:$true] %s420_s13 }
  0x4c   : > { %s13298_s23 = scalar_lea.hbm %s13626_s11, 1024  ;;  %p13300_p0 = pneg %p13630_p11 }
  0x4d   : > { %p13299_p12 = scmp.ne.s32.totalorder %s13626_s11, %s13298_s23  ;;  %s13303_s20 = scalar_lea.hbm %s15863_s0, 2048 }
  0x4e   : > { %p13304_p13 = scmp.lt.u32.totalorder %s13626_s11, %s15863_s0  ;;  %p13305_p6 = scmp.lt.u32.totalorder %s13303_s20, %s13298_s23 }
  0x4f   : > { %p13301_p2 = pnand %p13300_p0, %p13299_p12  ;;  %p13307_p3 = scmp.lt.u32.totalorder %s13298_s23, %s13626_s11 }
  0x50   : > { %p13306_p10 = por %p13305_p6, %p13304_p13 }
  0x51   : > { %p13302_p1 = pneg %p13301_p2 }
  0x52   : > { %p13308_p5 = por %p13307_p3, %p13306_p10 }
  0x54   : > { %p13309_p9 = pnand %p13308_p5, %p13302_p1 }
  0x56   : > { %13312 = shalt.err (!%p13309_p9)
}
  0x57   : > { %s13313_s19 = scalar_lea.vmem %s13628_s13, 1024  ;;  %s13406_s21 = smov [#allocation4]  }
  0x58   : > { %p13314_p12 = scmp.ne.s32.totalorder %s13628_s13, %s13313_s19  ;;  %s13318_s17 = sshll.u32 %s13406_s21, 4  ;;  %s13319_s17 = int_to_ptr.vmem [resolvable:$false] %s13318_s17 }
  0x59   : > { %s13320_s18 = scalar_lea.vmem %s13319_s17, 2048  ;;  %p13321_p4 = scmp.lt.s32.totalorder %s13628_s13, %s13319_s17 }
  0x5a   : > { %p13316_p2 = pnand %p13314_p12, %p13300_p0  ;;  %p13322_p13 = scmp.lt.s32.totalorder %s13320_s18, %s13313_s19 }
  0x5c   : > { %p13317_p7 = pneg %p13316_p2  ;;  %p13323_p6 = por %p13322_p13, %p13321_p4 }
  0x5e   : > { %p13324_p10 = pnand %p13323_p6, %p13317_p7 }
  0x60   : > { %13327 = shalt.err (!%p13324_p10)
}
  0x61   : > { %13128 = dma.hbm_to_vmem [thread:$0]  (!%p13630_p11), %s13626_s11, 1024, %s13628_s13, %s409_s22  }
  0x62   : > { %429 = sbr.rel (%p13533_p8) target bundleno = 2383 (0x94f), region = 72 }
  0x69   : > { %s13662_s23 = sand.u32 1, %s13390_s26   ;;  %p15928_p4 = scmp.ne.s32.totalorder %s15920_s14, 0 }
  0x6a   : > { %s12149_s20 = sshll.u32 %s13662_s23, 6  ;;  %s432_s12 = scalar_lea.sflag [#allocation5], %s13662_s23 }
  0x6b   : > { %s13668_s19 = scalar_lea.vmem [#allocation4], %s12149_s20 }
  0x6c   : > { %13373 = dma.done.wait (%p15928_p4), %s432_s12, 1024  }
  0x6d   : > { %13375 = vsyncadd (%p15928_p4), %s432_s12, 4294966272  ;;  %p15929_p7 = scmp.eq.s32.totalorder %s13514_s29, 0 }
  0x6f   : > { %13377 = dma.done.wait (%p15929_p7), [#allocation8], 3840   ;;  %p15930_p8 = pmov %p15929_p7 }
  0x70   : > { %v15895_v0 = vmov 0.0   ;;  %v13408_v1 = vmov 0   ;;  %vm501_vm0 = vcmask 64512   ;;  %v487_v2 = vld [vmem:[%s13668_s19 + $0x8] sm:$0xff]  ;;  %v489_v3 = vld [vmem:[%s13668_s19 + $0x18] sm:$0xff]  ;;  %v486_v4 = vld [vmem:[%s13668_s19] sm:$0xff] }
  0x71   : > { %13379 = vsyncadd (%p15930_p8), [#allocation8], 4294963456  ;;  %571 = vmatprep.mubr.f32.mxu0 %v15895_v0  ;;  %1036 = vmatprep.mubr.f32.mxu1 %v15895_v0  ;;  %v13683_v5 = vand.u32 4294901760, %v487_v2  ;;  %v13685_v6 = vand.u32 4294901760, %v489_v3  ;;  %v13687_v7 = vand.u32 4294901760, %v486_v4  ;;  %v488_v8 = vld [vmem:[%s13668_s19 + $0x10] sm:$0xff] }
  0x72   : > { %13192 = vset.pattern.permute.xlu0 %v13408_v1  ;;  %13193 = vset.pattern.permute.xlu1 %v13408_v1  ;;  %v494_v9 = vld [vmem:[%s15866_s3] sm:$0xf]  ;;  %v13693_v10 = vand.u32 4294901760, %v488_v8  ;;  %v493_v35 = vld [vmem:[%s13668_s19 + $0x38] sm:$0xff]  ;;  %v490_v36 = vld [vmem:[%s13668_s19 + $0x20] sm:$0xff]  ;;  %vm2404_vm1 = vcmask 31744  }
  0x73   : > { %v503_v11 = vsel %vm501_vm0, %v494_v9, 0  ;;  %506 = vmatprep.subr.mxu0 %v13683_v5  ;;  %971 = vmatprep.subr.mxu1 %v13685_v6  ;;  %v590_v12 = vsub.f32 %v486_v4, %v13687_v7  ;;  %v584_v14 = vsub.f32 %v487_v2, %v13683_v5  ;;  %v1049_v15 = vsub.f32 %v489_v3, %v13685_v6  ;;  %v495_v16 = vld [vmem:[%s15867_s4] sm:$0xf]  ;;  %v492_v39 = vld [vmem:[%s13668_s19 + $0x30] sm:$0xff]  ;;  %s13409_s21 = smov 96   ;;  %s13410_s17 = smov 127  }
  0x74   : > { %v13698_v13 = vand.u32 4294901760, %v503_v11  ;;  %508 = vmatpush1.msra.mxu0 %v13687_v7  ;;  %973 = vmatpush1.msra.mxu1 %v13693_v10  ;;  %v1055_v17 = vsub.f32 %v488_v8, %v13693_v10  ;;  %v491_v34 = vld [vmem:[%s13668_s19 + $0x28] sm:$0xff]  ;;  %v13739_v38 = vand.u32 4294901760, %v493_v35  ;;  %v13745_v40 = vand.u32 4294901760, %v490_v36  ;;  %s13411_s18 = smov 95   ;;  %s13412_s12 = smov 126  }
  0x75   : > { %v585_v19 = vand.u32 4294901760, %v584_v14  ;;  %v1050_v20 = vand.u32 4294901760, %v1049_v15  ;;  %v591_v21 = vand.u32 4294901760, %v590_v12  ;;  %498 = vperm.xlu0 %13192, %v495_v16   ;;  %v13737_v37 = vand.u32 4294901760, %v491_v34  ;;  %v2385_v58 = vld [vmem:[%s15870_s7] sm:$0xf] }
  0x76   : > { %v13709_v18 = vsub.f32 %v503_v11, %v13698_v13  ;;  %v1056_v22 = vand.u32 4294901760, %v1055_v17  ;;  %v13748_v41 = vand.u32 4294901760, %v492_v39  ;;  %v1979_v43 = vsub.f32 %v493_v35, %v13739_v38  ;;  %s13413_s14 = smov 64   ;;  %s13414_s16 = smov 94  }
  0x77   : > { %v586_v24 = vsub.f32 %v584_v14, %v585_v19  ;;  %v1051_v25 = vsub.f32 %v1049_v15, %v1050_v20  ;;  %v592_v26 = vsub.f32 %v590_v12, %v591_v21  ;;  %v1514_v42 = vsub.f32 %v491_v34, %v13737_v37  ;;  %s13415_s11 = smov 63   ;;  %s13416_s13 = smov 62  }
  0x78   : > { %v13712_v23 = vand.u32 4294901760, %v13709_v18  ;;  %v1057_v27 = vsub.f32 %v1055_v17, %v1056_v22  ;;  %v1520_v44 = vsub.f32 %v490_v36, %v13745_v40  ;;  %v1985_v45 = vsub.f32 %v492_v39, %v13748_v41  ;;  %s15985_s22 = sld [smem:[#allocation22_spill]]  ;;  %p15988_p0 = scmp.ne.s32.totalorder %s15926_s30, 0 }
  0x79   : > { %v587_v29 = vand.u32 4294901760, %v586_v24  ;;  %v1052_v30 = vand.u32 4294901760, %v1051_v25  ;;  %v593_v31 = vand.u32 4294901760, %v592_v26  ;;  %v1515_v46 = vand.u32 4294901760, %v1514_v42 }
  0x7a   : > { %v575_v28 = vsub.f32 %v13709_v18, %v13712_v23  ;;  %v1058_v33 = vand.u32 4294901760, %v1057_v27  ;;  %v1980_v47 = vand.u32 4294901760, %v1979_v43  ;;  %v1521_v48 = vand.u32 4294901760, %v1520_v44 }
  0x7b   : > { %588 = vmatprep.subr.mxu0 %v587_v29  ;;  %1053 = vmatprep.subr.mxu1 %v1052_v30  ;;  %v1986_v49 = vand.u32 4294901760, %v1985_v45  ;;  %v1516_v50 = vsub.f32 %v1514_v42, %v1515_v46  ;;  %v2406_v59 = vsel %vm2404_vm1, %v2385_v58, 0  ;;  %vm2408_vm2 = vcmask 1043456  }
  0x7c   : > { %v13716_v32 = vand.u32 4294901760, %v575_v28  ;;  %v1981_v51 = vsub.f32 %v1979_v43, %v1980_v47  ;;  %v1522_v52 = vsub.f32 %v1520_v44, %v1521_v48  ;;  %v13806_v60 = vand.u32 4294901760, %v2406_v59 }
  0x7d   : > { %v1987_v53 = vsub.f32 %v1985_v45, %v1986_v49  ;;  %v1517_v54 = vand.u32 4294901760, %v1516_v50  ;;  %vm4333_vm3 = vcmask 1039360   ;;  %vm4383_vm4 = vcmask 1031168  }
  0x7e   : > { %577 = vmatmul.mubr.f32.vlgmr.msra.gmra.mrb[0].mxu0 %v13716_v32  ;;  %1042 = vmatmul.mubr.f32.vlgmr.msra.gmra.mrb[0].mxu1 %v13716_v32  ;;  %v1982_v55 = vand.u32 4294901760, %v1981_v51  ;;  %v1523_v56 = vand.u32 4294901760, %v1522_v52  ;;  %v13809_v61 = vsub.f32 %v2406_v59, %v13806_v60  ;;  %vm4433_vm5 = vcmask 785408  }
  0x7f   : > { %594 = vmatpush1.msra.mxu0 %v593_v31  ;;  %657 = vmatprep.mubr.f32.mxu0 %v15895_v0  ;;  %v1988_v57 = vand.u32 4294901760, %v1987_v53  ;;  %vm4533_vm6 = vcmask 769024   ;;  %vm4633_vm7 = vcmask 515072   ;;  %vm4747_vm8 = vcmask 293888  }
  0x80   : > { %1059 = vmatpush1.msra.mxu1 %v1058_v33  ;;  %1122 = vmatprep.mubr.f32.mxu1 %v15895_v0  ;;  %vm4483_vm9 = vcmask 777216   ;;  %vm4583_vm10 = vcmask 523264   ;;  %vm4683_vm11 = vcmask 506880   ;;  %vm13418_vm12 = vmmov 0  }
  0x81   : > { %667 = vmatprep.subr.mxu0 %v584_v14  ;;  %1132 = vmatprep.subr.mxu1 %v1049_v15 }
  0x86   : > { %659 = vmatmul.mubr.f32.vlgmr.msra.gmra.mrb[0].mxu0 %v13698_v13  ;;  %1124 = vmatmul.mubr.f32.vlgmr.msra.gmra.mrb[0].mxu1 %v13698_v13 }
  0x87   : > { %670 = vmatpush1.msra.mxu0 %v590_v12  ;;  %733 = vmatprep.mubr.f32.mxu0 %v15895_v0 }
  0x88   : > { %1135 = vmatpush1.msra.mxu1 %v1055_v17  ;;  %1198 = vmatprep.mubr.f32.mxu1 %v15895_v0 }
  0x89   : > { %743 = vmatprep.subr.mxu0 %v13683_v5  ;;  %1208 = vmatprep.subr.mxu1 %v13685_v6 }
  0x8e   : > { %736 = vmatmul.mubr.f32.vlgmr.msra.gmra.mrb[0].mxu0 %v13709_v18  ;;  %1201 = vmatmul.mubr.f32.vlgmr.msra.gmra.mrb[0].mxu1 %v13709_v18 }
  0x8f   : > { %745 = vmatpush1.msra.mxu0 %v13687_v7  ;;  %808 = vmatprep.mubr.f32.mxu0 %v15895_v0 }
  0x90   : > { %1210 = vmatpush1.msra.mxu1 %v13693_v10  ;;  %1273 = vmatprep.mubr.f32.mxu1 %v15895_v0 }
  0x91   : > { %821 = vmatprep.subr.mxu0 %v585_v19  ;;  %1286 = vmatprep.subr.mxu1 %v1050_v20 }
  0x96   : > { %812 = vmatmul.mubr.f32.vlgmr.msra.gmra.mrb[0].mxu0 %v13712_v23  ;;  %1277 = vmatmul.mubr.f32.vlgmr.msra.gmra.mrb[0].mxu1 %v13712_v23 }
  0x97   : > { %825 = vmatpush1.msra.mxu0 %v591_v21  ;;  %888 = vmatprep.mubr.f32.mxu0 %v15895_v0 }
  0x98   : > { %1290 = vmatpush1.msra.mxu1 %v1056_v22  ;;  %1353 = vmatprep.mubr.f32.mxu1 %v15895_v0 }
  0x99   : > { %897 = vmatprep.subr.mxu0 %v13683_v5  ;;  %1362 = vmatprep.subr.mxu1 %v13685_v6  ;;  %v13818_v6 = vand.u32 4294901760, %v13809_v61 }
  0x9b   : > { %v2495_v11 = vsub.f32 %v13809_v61, %v13818_v6 }
  0x9e   : > { %890 = vmatmul.mubr.f32.vlgmr.msra.gmra.mrb[0].mxu0 %v13698_v13  ;;  %1355 = vmatmul.mubr.f32.vlgmr.msra.gmra.mrb[0].mxu1 %v13698_v13 }
  0x9f   : > { %899 = vmatpush1.msra.mxu0 %v13687_v7  ;;  %962 = vmatprep.mubr.f32.mxu0 %v15895_v0 }
  0xa0   : > { %1364 = vmatpush1.msra.mxu1 %v13693_v10  ;;  %1427 = vmatprep.mubr.f32.mxu1 %v15895_v0 }
  0xa1   : > { %1436 = vmatprep.subr.mxu0 %v13737_v37  ;;  %1901 = vmatprep.subr.mxu1 %v13739_v38 }
  0xa6   : > { %964 = vmatmul.mubr.f32.vlgmr.msra.gmra.mrb[0].mxu0 %v13698_v13  ;;  %1429 = vmatmul.mubr.f32.vlgmr.msra.gmra.mrb[0].mxu1 %v13698_v13 }
  0xa7   : > { %1438 = vmatpush1.msra.mxu0 %v13745_v40  ;;  %1501 = vmatprep.mubr.f32.mxu0 %v15895_v0 }
  0xa8   : > { %1903 = vmatpush1.msra.mxu1 %v13748_v41  ;;  %1966 = vmatprep.mubr.f32.mxu1 %v15895_v0 }
  0xa9   : > { %1518 = vmatprep.subr.mxu0 %v1517_v54  ;;  %1983 = vmatprep.subr.mxu1 %v1982_v55 }
  0xaa   : > { %1507 = vmatmul.mubr.f32.vlgmr.msra.gmra.mrb[2].mxu0 %v13716_v32  ;;  %1972 = vmatmul.mubr.f32.vlgmr.msra.gmra.mrb[2].mxu1 %v13716_v32 }
  0xab   : > { %1524 = vmatpush1.msra.mxu0 %v1523_v56  ;;  %1587 = vmatprep.mubr.f32.mxu0 %v15895_v0 }
  0xac   : > { %1989 = vmatpush1.msra.mxu1 %v1988_v57  ;;  %2052 = vmatprep.mubr.f32.mxu1 %v15895_v0 }
  0xad   : > { %1597 = vmatprep.subr.mxu0 %v1514_v42  ;;  %2062 = vmatprep.subr.mxu1 %v1979_v43 }
  0xb2   : > { %1589 = vmatmul.mubr.f32.vlgmr.msra.gmra.mrb[2].mxu0 %v13698_v13  ;;  %2054 = vmatmul.mubr.f32.vlgmr.msra.gmra.mrb[2].mxu1 %v13698_v13 }
  0xb3   : > { %1600 = vmatpush1.msra.mxu0 %v1520_v44  ;;  %1663 = vmatprep.mubr.f32.mxu0 %v15895_v0 }
  0xb4   : > { %2065 = vmatpush1.msra.mxu1 %v1985_v45  ;;  %2128 = vmatprep.mubr.f32.mxu1 %v15895_v0 }
  0xb5   : > { %1673 = vmatprep.subr.mxu0 %v13737_v37  ;;  %2138 = vmatprep.subr.mxu1 %v13739_v38 }
  0xba   : > { %1666 = vmatmul.mubr.f32.vlgmr.msra.gmra.mrb[2].mxu0 %v13709_v18  ;;  %2131 = vmatmul.mubr.f32.vlgmr.msra.gmra.mrb[2].mxu1 %v13709_v18 }
  0xbb   : > { %1675 = vmatpush1.msra.mxu0 %v13745_v40  ;;  %1738 = vmatprep.mubr.f32.mxu0 %v15895_v0 }
  0xbc   : > { %2140 = vmatpush1.msra.mxu1 %v13748_v41  ;;  %2203 = vmatprep.mubr.f32.mxu1 %v15895_v0 }
  0xbd   : > { %1751 = vmatprep.subr.mxu0 %v1515_v46  ;;  %2216 = vmatprep.subr.mxu1 %v1980_v47 }
  0xc2   : > { %1742 = vmatmul.mubr.f32.vlgmr.msra.gmra.mrb[2].mxu0 %v13712_v23  ;;  %2207 = vmatmul.mubr.f32.vlgmr.msra.gmra.mrb[2].mxu1 %v13712_v23  ;;  %v13860_v23 = vand.u32 4294901760, %v2495_v11 }
  0xc3   : > { %1755 = vmatpush1.msra.mxu0 %v1521_v48  ;;  %1818 = vmatprep.mubr.f32.mxu0 %v15895_v0 }
  0xc4   : > { %2220 = vmatpush1.msra.mxu1 %v1986_v49  ;;  %2283 = vmatprep.mubr.f32.mxu1 %v15895_v0 }
  0xc5   : > { %1827 = vmatprep.subr.mxu0 %v13737_v37  ;;  %2292 = vmatprep.subr.mxu1 %v13739_v38 }
  0xca   : > { %1820 = vmatmul.mubr.f32.vlgmr.msra.gmra.mrb[2].mxu0 %v13698_v13  ;;  %2285 = vmatmul.mubr.f32.vlgmr.msra.gmra.mrb[2].mxu1 %v13698_v13 }
  0xcb   : > { %1829 = vmatpush1.msra.mxu0 %v13745_v40  ;;  %1892 = vmatprep.mubr.f32.mxu0 %v15895_v0 }
  0xcc   : > { %2294 = vmatpush1.msra.mxu1 %v13748_v41  ;;  %2357 = vmatprep.mubr.f32.mxu1 %v15895_v0 }
  0xd2   : > { %1894 = vmatmul.mubr.f32.vlgmr.msra.gmra.mrb[2].mxu0 %v13698_v13  ;;  %2359 = vmatmul.mubr.f32.vlgmr.msra.gmra.mrb[2].mxu1 %v13698_v13 }
  0xd3   : > { %2491 = vmatprep.mubr.f32.mxu0 %v15895_v0  ;;  %2956 = vmatprep.mubr.f32.mxu1 %v15895_v0 }
  0xf4   : > { %v13811_v62 = vpop.permute.xlu0 %498 }
 0x179   : > { %v965_v63 = vpop.f32.mrb[0].mxu0  ;;  %v1430_v1 = vpop.f32.mrb[0].mxu1 }
 0x17a   : > { %v13814_v2 = vadd.f32 %v965_v63, %v13811_v62  ;;  %v12817_v3 = vadd.f32 %v1430_v1, %v13811_v62  ;;  %v967_v4 = vpop.f32.mrb[1].mxu0  ;;  %v1432_v5 = vpop.f32.mrb[1].mxu1 }
 0x17b   : > { %v12816_v7 = vadd.f32 %v967_v4, %v13811_v62  ;;  %v12818_v8 = vadd.f32 %v1432_v5, %v13811_v62 }
 0x17c   : > { %v13887_v35 = vcombine.low %v12817_v3, %v12817_v3  ;;  %v13237_v40 = vcombine.low %v13814_v2, %v13814_v2 }
 0x17d   : > { %v13823_v9 = vcombine.low %v13814_v2, %v12816_v7  ;;  %v13825_v10 = vcombine.low %v12817_v3, %v12818_v8  ;;  %v13829_v12 = vcombine.low %v12816_v7, %v12816_v7  ;;  %v13832_v13 = vcombine.low %v12818_v8, %v12818_v8 }
 0x17f   : > { %4298 = vst [vmem:[#allocation3] sm:$0xf] %v13823_v9  ;;  %4300 = vst [vmem:[#allocation3 + $0x10] sm:$0xf] %v13825_v10  ;;  %4419 = vrot.lane.b32.xlu1 %v13823_v9, %s13409_s21  ;;  %4319 = vrot.lane.b32.xlu0 %v13823_v9, %s13410_s17  ;;  %v2409_v14 = vsel %vm2408_vm2, %v13823_v9, 0  ;;  %v2413_v16 = vsel %vm2408_vm2, %v13825_v10, 0 }
 0x180   : > { %v13841_v15 = vand.u32 4294901760, %v2409_v14  ;;  %4299 = vst [vmem:[#allocation3 + $0x8] sm:$0xf] %v13829_v12  ;;  %4301 = vst [vmem:[#allocation3 + $0x18] sm:$0xf] %v13832_v13  ;;  %v2411_v17 = vsel %vm2408_vm2, %v13829_v12, 0 }
 0x181   : > { %v2415_v18 = vsel %vm2408_vm2, %v13832_v13, 0  ;;  %v13851_v19 = vand.u32 4294901760, %v2413_v16  ;;  %v13853_v20 = vand.u32 4294901760, %v2411_v17 }
 0x182   : > { %v13855_v21 = vand.u32 4294901760, %v2415_v18  ;;  %v13858_v22 = vsub.f32 %v2409_v14, %v13841_v15 }
 0x183   : > { %4471 = vrot.lane.b32.xlu1 %v13825_v10, %s13411_s18  ;;  %4371 = vrot.lane.b32.xlu0 %v13825_v10, %s13412_s12  ;;  %v13867_v24 = vsub.f32 %v2413_v16, %v13851_v19  ;;  %v2504_v25 = vsub.f32 %v2411_v17, %v13853_v20 }
 0x184   : > { %2426 = vmatprep.subr.mxu0 %v13853_v20  ;;  %2891 = vmatprep.subr.mxu1 %v13855_v21  ;;  %v2969_v26 = vsub.f32 %v2415_v18, %v13855_v21  ;;  %v2511_v27 = vand.u32 4294901760, %v13858_v22 }
 0x185   : > { %2428 = vmatpush1.msra.mxu0 %v13841_v15  ;;  %2893 = vmatpush1.msra.mxu1 %v13851_v19  ;;  %v2976_v28 = vand.u32 4294901760, %v13867_v24  ;;  %v2505_v29 = vand.u32 4294901760, %v2504_v25 }
 0x186   : > { %2497 = vmatmul.mubr.f32.vlgmr.msra.gmra.mrb[4].mxu0 %v13860_v23  ;;  %2962 = vmatmul.mubr.f32.vlgmr.msra.gmra.mrb[4].mxu1 %v13860_v23  ;;  %v2970_v30 = vand.u32 4294901760, %v2969_v26  ;;  %v2512_v31 = vsub.f32 %v13858_v22, %v2511_v27 }
 0x187   : > { %4571 = vrot.lane.b32.xlu1 %v13825_v10, %s13413_s14  ;;  %4367 = vrot.lane.b32.xlu0 %v13823_v9, %s13412_s12  ;;  %v2977_v32 = vsub.f32 %v13867_v24, %v2976_v28  ;;  %v2506_v33 = vsub.f32 %v2504_v25, %v2505_v29 }
 0x188   : > { %v2971_v34 = vsub.f32 %v2969_v26, %v2970_v30  ;;  %2577 = vmatprep.mubr.f32.mxu0 %v15895_v0  ;;  %3042 = vmatprep.mubr.f32.mxu1 %v15895_v0  ;;  %v2513_v38 = vand.u32 4294901760, %v2512_v31 }
 0x189   : > { %v2507_v36 = vand.u32 4294901760, %v2506_v33  ;;  %v2978_v39 = vand.u32 4294901760, %v2977_v32 }
 0x18a   : > { %v2972_v37 = vand.u32 4294901760, %v2971_v34 }
 0x18b   : > { %4321 = vrot.lane.b32.xlu1 %v13887_v35, %s13410_s17  ;;  %4323 = vrot.lane.b32.xlu0 %v13825_v10, %s13410_s17 }
 0x18c   : > { %2508 = vmatprep.subr.mxu0 %v2507_v36  ;;  %2973 = vmatprep.subr.mxu1 %v2972_v37 }
 0x18d   : > { %2514 = vmatpush1.msra.mxu0 %v2513_v38  ;;  %2979 = vmatpush1.msra.mxu1 %v2978_v39 }
 0x18e   : > { %2579 = vmatmul.mubr.f32.vlgmr.msra.gmra.mrb[4].mxu0 %v13806_v60  ;;  %2587 = vmatprep.subr.mxu0 %v2504_v25 }
 0x18f   : > { %3044 = vmatmul.mubr.f32.vlgmr.msra.gmra.mrb[4].mxu1 %v13806_v60  ;;  %3052 = vmatprep.subr.mxu1 %v2969_v26 }
 0x190   : > { %3055 = vmatpush1.msra.mxu1 %v13867_v24  ;;  %4369 = vrot.lane.b32.xlu1 %v13829_v12, %s13412_s12 }
 0x191   : > { %4423 = vrot.lane.b32.xlu0 %v13825_v10, %s13409_s21  ;;  %2590 = vmatpush1.msra.mxu0 %v13858_v22 }
 0x192   : > { %2663 = vmatprep.subr.mxu0 %v13853_v20  ;;  %3128 = vmatprep.subr.mxu1 %v13855_v21 }
 0x193   : > { %2653 = vmatprep.mubr.f32.mxu0 %v15895_v0  ;;  %3118 = vmatprep.mubr.f32.mxu1 %v15895_v0 }
 0x194   : > { %4317 = vrot.lane.b32.xlu1 %v13237_v40, %s13410_s17 }
 0x195   : > { %4519 = vrot.lane.b32.xlu0 %v13823_v9, %s13414_s16 }
 0x196   : > { %2656 = vmatmul.mubr.f32.vlgmr.msra.gmra.mrb[4].mxu0 %v13809_v61 }
 0x197   : > { %2665 = vmatpush1.msra.mxu0 %v13841_v15  ;;  %3121 = vmatmul.mubr.f32.vlgmr.msra.gmra.mrb[4].mxu1 %v13809_v61 }
 0x198   : > { %3130 = vmatpush1.msra.mxu1 %v13851_v19  ;;  %4417 = vrot.lane.b32.xlu1 %v13237_v40, %s13409_s21 }
 0x199   : > { %3206 = vmatprep.subr.mxu1 %v2970_v30  ;;  %4619 = vrot.lane.b32.xlu0 %v13823_v9, %s13415_s11 }
 0x19a   : > { %2741 = vmatprep.subr.mxu0 %v2505_v29  ;;  %2728 = vmatprep.mubr.f32.mxu0 %v15895_v0 }
 0x19b   : > { %3193 = vmatprep.mubr.f32.mxu1 %v15895_v0 }
 0x19c   : > { %4521 = vrot.lane.b32.xlu1 %v13887_v35, %s13414_s16 }
 0x19d   : > { %4467 = vrot.lane.b32.xlu0 %v13823_v9, %s13411_s18 }
 0x19e   : > { %2732 = vmatmul.mubr.f32.vlgmr.msra.gmra.mrb[4].mxu0 %v13818_v6 }
 0x19f   : > { %2745 = vmatpush1.msra.mxu0 %v2511_v27  ;;  %3197 = vmatmul.mubr.f32.vlgmr.msra.gmra.mrb[4].mxu1 %v13818_v6 }
 0x1a0   : > { %3210 = vmatpush1.msra.mxu1 %v2976_v28  ;;  %4621 = vrot.lane.b32.xlu1 %v13887_v35, %s13415_s11 }
 0x1a1   : > { %3282 = vmatprep.subr.mxu1 %v13855_v21  ;;  %4567 = vrot.lane.b32.xlu0 %v13823_v9, %s13413_s14 }
 0x1a2   : > { %2817 = vmatprep.subr.mxu0 %v13853_v20  ;;  %2808 = vmatprep.mubr.f32.mxu0 %v15895_v0 }
 0x1a3   : > { %3273 = vmatprep.mubr.f32.mxu1 %v15895_v0 }
 0x1a4   : > { %4517 = vrot.lane.b32.xlu1 %v13237_v40, %s13414_s16 }
 0x1a5   : > { %v1895_v41 = vpop.f32.mrb[2].mxu0  ;;  %v2360_v42 = vpop.f32.mrb[2].mxu1  ;;  %4523 = vrot.lane.b32.xlu0 %v13825_v10, %s13414_s16 }
 0x1a6   : > { %v12819_v43 = vadd.f32 %v1895_v41, %v13811_v62  ;;  %v13938_v44 = vadd.f32 %v2360_v42, %v13811_v62  ;;  %v1897_v45 = vpop.f32.mrb[3].mxu0  ;;  %v2362_v46 = vpop.f32.mrb[3].mxu1  ;;  %2810 = vmatmul.mubr.f32.vlgmr.msra.gmra.mrb[4].mxu0 %v13806_v60 }
 0x1a7   : > { %v12820_v47 = vadd.f32 %v1897_v45, %v13811_v62  ;;  %v12822_v48 = vadd.f32 %v2362_v46, %v13811_v62  ;;  %2819 = vmatpush1.msra.mxu0 %v13841_v15  ;;  %3275 = vmatmul.mubr.f32.vlgmr.msra.gmra.mrb[4].mxu1 %v13806_v60 }
 0x1a8   : > { %3284 = vmatpush1.msra.mxu1 %v13851_v19  ;;  %4617 = vrot.lane.b32.xlu1 %v13237_v40, %s13415_s11  ;;  %v13240_v18 = vcombine.low %v12819_v43, %v12819_v43 }
 0x1a9   : > { %v13947_v49 = vcombine.low %v12819_v43, %v12820_v47  ;;  %v13950_v50 = vcombine.low %v13938_v44, %v12822_v48  ;;  %4623 = vrot.lane.b32.xlu0 %v13825_v10, %s13415_s11  ;;  %2882 = vmatprep.mubr.f32.mxu0 %v15895_v0  ;;  %v13956_v51 = vcombine.low %v12820_v47, %v12820_v47 }
 0x1aa   : > { %3347 = vmatprep.mubr.f32.mxu1 %v15895_v0  ;;  %v13960_v52 = vcombine.low %v12822_v48, %v12822_v48 }
 0x1ab   : > { %4302 = vst [vmem:[#allocation3 + $0x20] sm:$0xf] %v13947_v49  ;;  %2384 = vst [vmem:[#allocation2 + $0x18] sm:$0xff] %v13950_v50  ;;  %v2417_v53 = vsel %vm2408_vm2, %v13947_v49, 0  ;;  %v2421_v54 = vsel %vm2408_vm2, %v13950_v50, 0  ;;  %v2419_v57 = vsel %vm2408_vm2, %v13956_v51, 0 }
 0x1ac   : > { %4375 = vrot.lane.b32.xlu1 %v13947_v49, %s13412_s12  ;;  %v13968_v55 = vand.u32 4294901760, %v2417_v53  ;;  %v13970_v56 = vand.u32 4294901760, %v2421_v54  ;;  %4303 = vst [vmem:[#allocation3 + $0x28] sm:$0xf] %v13956_v51  ;;  %v2423_v58 = vsel %vm2408_vm2, %v13960_v52, 0  ;;  %v13980_v59 = vand.u32 4294901760, %v2419_v57 }
 0x1ad   : > { %4421 = vrot.lane.b32.xlu0 %v13887_v35, %s13409_s21  ;;  %v13982_v62 = vand.u32 4294901760, %v2423_v58 }
 0x1ae   : > { %2884 = vmatmul.mubr.f32.vlgmr.msra.gmra.mrb[4].mxu0 %v13806_v60  ;;  %v13985_v63 = vsub.f32 %v2417_v53, %v13968_v55  ;;  %v13988_v1 = vsub.f32 %v2421_v54, %v13970_v56  ;;  %3356 = vmatprep.subr.mxu0 %v13980_v59  ;;  %v3434_v2 = vsub.f32 %v2419_v57, %v13980_v59 }
 0x1af   : > { %3349 = vmatmul.mubr.f32.vlgmr.msra.gmra.mrb[4].mxu1 %v13806_v60  ;;  %3421 = vmatprep.mubr.f32.mxu0 %v15895_v0  ;;  %v3899_v3 = vsub.f32 %v2423_v58, %v13982_v62 }
 0x1b0   : > { %4475 = vrot.lane.b32.xlu1 %v13947_v49, %s13411_s18  ;;  %v3441_v4 = vand.u32 4294901760, %v13985_v63  ;;  %v3906_v5 = vand.u32 4294901760, %v13988_v1  ;;  %3821 = vmatprep.subr.mxu1 %v13982_v62  ;;  %v3435_v8 = vand.u32 4294901760, %v3434_v2 }
 0x1b1   : > { %4373 = vrot.lane.b32.xlu0 %v13832_v13, %s13412_s12  ;;  %3358 = vmatpush1.msra.mxu0 %v13968_v55  ;;  %v3900_v11 = vand.u32 4294901760, %v3899_v3 }
 0x1b2   : > { %v4288_v7 = vld [vmem:[#allocation2 + $0x18] sm:$0xf]  ;;  %3823 = vmatpush1.msra.mxu1 %v13970_v56  ;;  %3886 = vmatprep.mubr.f32.mxu1 %v15895_v0  ;;  %v3442_v14 = vsub.f32 %v13985_v63, %v3441_v4  ;;  %v3436_v15 = vsub.f32 %v3434_v2, %v3435_v8  ;;  %v3907_v17 = vsub.f32 %v13988_v1, %v3906_v5 }
 0x1b3   : > { %4304 = vst [vmem:[#allocation3 + $0x30] sm:$0xf] %v4288_v7  ;;  %3427 = vmatmul.mubr.f32.vlgmr.msra.gmra.mrb[6].mxu0 %v13860_v23  ;;  %3892 = vmatmul.mubr.f32.vlgmr.msra.gmra.mrb[6].mxu1 %v13860_v23  ;;  %v3901_v16 = vsub.f32 %v3899_v3, %v3900_v11 }
 0x1b4   : > { %4575 = vrot.lane.b32.xlu1 %v13947_v49, %s13413_s14  ;;  %3507 = vmatprep.mubr.f32.mxu0 %v15895_v0  ;;  %v3437_v19 = vand.u32 4294901760, %v3436_v15  ;;  %v3443_v21 = vand.u32 4294901760, %v3442_v14  ;;  %v3908_v22 = vand.u32 4294901760, %v3907_v17 }
 0x1b5   : > { %4469 = vrot.lane.b32.xlu0 %v13829_v12, %s13411_s18  ;;  %v3902_v20 = vand.u32 4294901760, %v3901_v16  ;;  %3972 = vmatprep.mubr.f32.mxu1 %v15895_v0 }
 0x1b6   : > { %3438 = vmatprep.subr.mxu0 %v3437_v19 }
 0x1b7   : > { %3903 = vmatprep.subr.mxu1 %v3902_v20  ;;  %3444 = vmatpush1.msra.mxu0 %v3443_v21 }
 0x1b8   : > { %4325 = vrot.lane.b32.xlu1 %v13240_v18, %s13410_s17  ;;  %3909 = vmatpush1.msra.mxu1 %v3908_v22 }
 0x1b9   : > { %4569 = vrot.lane.b32.xlu0 %v13829_v12, %s13413_s14  ;;  %3517 = vmatprep.subr.mxu0 %v3434_v2 }
 0x1ba   : > { %3982 = vmatprep.subr.mxu1 %v3899_v3 }
 0x1bb   : > { %3509 = vmatmul.mubr.f32.vlgmr.msra.gmra.mrb[6].mxu0 %v13806_v60  ;;  %3974 = vmatmul.mubr.f32.vlgmr.msra.gmra.mrb[6].mxu1 %v13806_v60 }
 0x1bc   : > { %3985 = vmatpush1.msra.mxu1 %v13988_v1  ;;  %4425 = vrot.lane.b32.xlu1 %v13240_v18, %s13409_s21 }
 0x1bd   : > { %4473 = vrot.lane.b32.xlu0 %v13832_v13, %s13411_s18  ;;  %3520 = vmatpush1.msra.mxu0 %v13985_v63 }
 0x1be   : > { %3593 = vmatprep.subr.mxu0 %v13980_v59  ;;  %4058 = vmatprep.subr.mxu1 %v13982_v62 }
 0x1bf   : > { %3583 = vmatprep.mubr.f32.mxu0 %v15895_v0  ;;  %4048 = vmatprep.mubr.f32.mxu1 %v15895_v0 }
 0x1c0   : > { %4525 = vrot.lane.b32.xlu1 %v13240_v18, %s13414_s16 }
 0x1c1   : > { %4573 = vrot.lane.b32.xlu0 %v13832_v13, %s13413_s14 }
 0x1c3   : > { %3586 = vmatmul.mubr.f32.vlgmr.msra.gmra.mrb[6].mxu0 %v13809_v61  ;;  %4051 = vmatmul.mubr.f32.vlgmr.msra.gmra.mrb[6].mxu1 %v13809_v61  ;;  %v13241_v61 = vcombine.low %v13938_v44, %v13938_v44 }
 0x1c4   : > { %3595 = vmatpush1.msra.mxu0 %v13968_v55  ;;  %4060 = vmatpush1.msra.mxu1 %v13970_v56 }
 0x1c5   : > { %4669 = vrot.lane.b32.xlu0 %v13829_v12, %s13416_s13  ;;  %4136 = vmatprep.subr.mxu1 %v3900_v11 }
 0x1c6   : > { %4625 = vrot.lane.b32.xlu1 %v13240_v18, %s13415_s11  ;;  %3671 = vmatprep.subr.mxu0 %v3435_v8 }
 0x1c7   : > { %3658 = vmatprep.mubr.f32.mxu0 %v15895_v0  ;;  %4123 = vmatprep.mubr.f32.mxu1 %v15895_v0 }
 0x1c9   : > { %4667 = vrot.lane.b32.xlu0 %v13823_v9, %s13416_s13 }
 0x1ca   : > { %4671 = vrot.lane.b32.xlu1 %v13825_v10, %s13416_s13 }
 0x1cb   : > { %3662 = vmatmul.mubr.f32.vlgmr.msra.gmra.mrb[6].mxu0 %v13818_v6  ;;  %4127 = vmatmul.mubr.f32.vlgmr.msra.gmra.mrb[6].mxu1 %v13818_v6 }
 0x1cc   : > { %3675 = vmatpush1.msra.mxu0 %v3441_v4  ;;  %4140 = vmatpush1.msra.mxu1 %v3906_v5 }
 0x1cd   : > { %4675 = vrot.lane.b32.xlu0 %v13947_v49, %s13416_s13  ;;  %4212 = vmatprep.subr.mxu1 %v13982_v62 }
 0x1ce   : > { %4673 = vrot.lane.b32.xlu1 %v13832_v13, %s13416_s13  ;;  %3747 = vmatprep.subr.mxu0 %v13980_v59 }
 0x1cf   : > { %3738 = vmatprep.mubr.f32.mxu0 %v15895_v0  ;;  %4203 = vmatprep.mubr.f32.mxu1 %v15895_v0 }
 0x1d1   : > { %4379 = vrot.lane.b32.xlu0 %v13950_v50, %s13412_s12 }
 0x1d2   : > { %4327 = vrot.lane.b32.xlu1 %v13947_v49, %s13410_s17 }
 0x1d3   : > { %3740 = vmatmul.mubr.f32.vlgmr.msra.gmra.mrb[6].mxu0 %v13806_v60  ;;  %4205 = vmatmul.mubr.f32.vlgmr.msra.gmra.mrb[6].mxu1 %v13806_v60 }
 0x1d4   : > { %3749 = vmatpush1.msra.mxu0 %v13968_v55  ;;  %4214 = vmatpush1.msra.mxu1 %v13970_v56  ;;  %v4705_v55 = vld [vmem:[%s15868_s5] sm:$0xf] }
 0x1d5   : > { %4527 = vrot.lane.b32.xlu0 %v13947_v49, %s13414_s16  ;;  %3812 = vmatprep.mubr.f32.mxu0 %v15895_v0  ;;  %v4749_v62 = vsel %vm4747_vm8, %v4705_v55, 0 }
 0x1d6   : > { %4427 = vrot.lane.b32.xlu1 %v13947_v49, %s13409_s21  ;;  %4277 = vmatprep.mubr.f32.mxu1 %v15895_v0  ;;  %v14158_v5 = vand.u32 4294901760, %v4749_v62 }
 0x1d9   : > { %4627 = vrot.lane.b32.xlu0 %v13947_v49, %s13415_s11 }
 0x1da   : > { %4331 = vrot.lane.b32.xlu1 %v13950_v50, %s13410_s17 }
 0x1db   : > { %3814 = vmatmul.mubr.f32.vlgmr.msra.gmra.mrb[6].mxu0 %v13806_v60  ;;  %4279 = vmatmul.mubr.f32.vlgmr.msra.gmra.mrb[6].mxu1 %v13806_v60 }
 0x1dc   : > { %4846 = vmatprep.mubr.f32.mxu0 %v15895_v0  ;;  %5415 = vmatprep.mubr.f32.mxu1 %v15895_v0 }
 0x1dd   : > { %4329 = vrot.lane.b32.xlu0 %v13241_v61, %s13410_s17 }
 0x1de   : > { %4431 = vrot.lane.b32.xlu1 %v13950_v50, %s13409_s21 }
 0x1e1   : > { %4429 = vrot.lane.b32.xlu0 %v13241_v61, %s13409_s21 }
 0x1e2   : > { %4479 = vrot.lane.b32.xlu1 %v13950_v50, %s13411_s18 }
 0x1e5   : > { %4381 = vrot.lane.b32.xlu0 %v13960_v52, %s13412_s12 }
 0x1e6   : > { %4579 = vrot.lane.b32.xlu1 %v13950_v50, %s13413_s14 }
 0x1e9   : > { %4477 = vrot.lane.b32.xlu0 %v13956_v51, %s13411_s18 }
 0x1ea   : > { %4531 = vrot.lane.b32.xlu1 %v13950_v50, %s13414_s16 }
 0x1ed   : > { %4577 = vrot.lane.b32.xlu0 %v13956_v51, %s13413_s14 }
 0x1ee   : > { %4377 = vrot.lane.b32.xlu1 %v13956_v51, %s13412_s12  ;;  %s13420_s12 = smov 119  }
 0x1f1   : > { %4481 = vrot.lane.b32.xlu0 %v13960_v52, %s13411_s18  ;;  %v4420_v60 = vpop.permute.xlu1 %4419  ;;  %v4320_v6 = vpop.permute.xlu0 %4319  ;;  %s13419_s18 = smov 110  }
 0x1f2   : > { %4529 = vrot.lane.b32.xlu1 %v13241_v61, %s13414_s16 }
 0x1f5   : > { %4581 = vrot.lane.b32.xlu0 %v13960_v52, %s13413_s14  ;;  %v14102_v9 = vpop.permute.xlu1 %4471  ;;  %v14104_v10 = vpop.permute.xlu0 %4371 }
 0x1f6   : > { %4629 = vrot.lane.b32.xlu1 %v13241_v61, %s13415_s11 }
 0x1f9   : > { %4677 = vrot.lane.b32.xlu0 %v13956_v51, %s13416_s13  ;;  %v14109_v12 = vpop.permute.xlu1 %4571  ;;  %v4368_v13 = vpop.permute.xlu0 %4367 }
 0x1fa   : > { %4631 = vrot.lane.b32.xlu1 %v13950_v50, %s13415_s11  ;;  %s13421_s11 = smov 101  }
 0x1fd   : > { %4681 = vrot.lane.b32.xlu0 %v13960_v52, %s13416_s13  ;;  %v4322_v23 = vpop.permute.xlu1 %4321  ;;  %v14115_v24 = vpop.permute.xlu0 %4323 }
 0x1fe   : > { %4679 = vrot.lane.b32.xlu1 %v13950_v50, %s13416_s13  ;;  %v4335_v25 = vsel %vm4333_vm3, %v4320_v6, %v4322_v23  ;;  %v4336_v26 = vsel %vm4333_vm3, %v4322_v23, %v14115_v24  ;;  %s15987_s13 = sld [smem:[#allocation23_spill]] }
 0x1ff   : > { %4349 = vst [vmem:[#allocation3 + $0x8] sm:$0xf0] %v4335_v25  ;;  %4350 = vst [vmem:[#allocation3 + $0x10] sm:$0xf0] %v4336_v26 }
 0x202   : > { %v4370_v27 = vpop.permute.xlu1 %4369 }
 0x203   : > { %v4384_v28 = vsel %vm4383_vm4, %v4368_v13, %v4370_v27  ;;  %v4385_v29 = vsel %vm4383_vm4, %v4370_v27, %v14104_v10  ;;  %v14125_v30 = vpop.permute.xlu0 %4423 }
 0x204   : > { %4398 = vst [vmem:[#allocation3 + $0x38] sm:$0xf] %v4384_v28  ;;  %4399 = vst [vmem:[#allocation3 + $0x40] sm:$0xf] %v4385_v29 }
 0x206   : > { %v4318_v31 = vpop.permute.xlu1 %4317  ;;  %v4707_v2 = vld [vmem:[#allocation3 + $0x8] sm:$0xff]  ;;  %v14163_v15 = vld [vmem:[#allocation3 + $0x10] sm:$0xff] }
 0x207   : > { %v4520_v32 = vpop.permute.xlu0 %4519  ;;  %v4334_v33 = vsel %vm4333_vm3, %v4318_v31, %v4320_v6  ;;  %v4772_v16 = vand.u32 4294901760, %v4707_v2  ;;  %v5343_v61 = vand.u32 4294901760, %v14163_v15 }
 0x208   : > { %4348 = vst [vmem:[#allocation3] sm:$0xf0] %v4334_v33 }
 0x209   : > { %v14182_v23 = vsub.f32 %v4707_v2, %v4772_v16  ;;  %v14192_v27 = vsub.f32 %v14163_v15, %v5343_v61 }
 0x20a   : > { %v4418_v34 = vpop.permute.xlu1 %4417 }
 0x20b   : > { %v4620_v35 = vpop.permute.xlu0 %4619  ;;  %v4434_v36 = vsel %vm4433_vm5, %v4418_v34, %v4420_v60 }
 0x20c   : > { %4448 = vst [vmem:[#allocation3 + $0x38] sm:$0xf0] %v4434_v36 }
 0x20e   : > { %v4522_v37 = vpop.permute.xlu1 %4521 }
 0x20f   : > { %v4468_v38 = vpop.permute.xlu0 %4467  ;;  %v4535_v39 = vsel %vm4533_vm6, %v4520_v32, %v4522_v37  ;;  %v4706_v4 = vld [vmem:[#allocation3] sm:$0xff] }
 0x210   : > { %4549 = vst [vmem:[#allocation3 + $0x78] sm:$0xf0] %v4535_v39  ;;  %v4774_v19 = vand.u32 4294901760, %v4706_v4  ;;  %v15894_v39 = vand.u32 4294901760, %v14182_v23 }
 0x212   : > { %v4622_v40 = vpop.permute.xlu1 %4621  ;;  %v14199_v31 = vsub.f32 %v4706_v4, %v4774_v19 }
 0x213   : > { %v4568_v41 = vpop.permute.xlu0 %4567  ;;  %v4635_v42 = vsel %vm4633_vm7, %v4620_v35, %v4622_v40  ;;  %v4713_v63 = vld [vmem:[#allocation3 + $0x38] sm:$0xff] }
 0x214   : > { %4649 = vst [vmem:[#allocation3 + $0xb0] sm:$0xf0] %v4635_v42  ;;  %v4778_v14 = vand.u32 4294901760, %v4713_v63 }
 0x216   : > { %v4518_v43 = vpop.permute.xlu1 %4517  ;;  %v14179_v13 = vpack.c.bf16 %v4778_v14, %v4774_v19 }
 0x217   : > { %v14131_v44 = vpop.permute.xlu0 %4523  ;;  %v4534_v45 = vsel %vm4533_vm6, %v4518_v43, %v4520_v32  ;;  %v15884_v43 = vand.u32 4294901760, %v14192_v27 }
 0x218   : > { %v4536_v46 = vsel %vm4533_vm6, %v4522_v37, %v14131_v44  ;;  %4548 = vst [vmem:[#allocation3 + $0x70] sm:$0xf0] %v4534_v45 }
 0x219   : > { %4550 = vst [vmem:[#allocation3 + $0x80] sm:$0xf0] %v4536_v46 }
 0x21a   : > { %v4618_v47 = vpop.permute.xlu1 %4617 }
 0x21b   : > { %v14136_v48 = vpop.permute.xlu0 %4623  ;;  %v4634_v49 = vsel %vm4633_vm7, %v4618_v47, %v4620_v35 }
 0x21c   : > { %v4636_v50 = vsel %vm4633_vm7, %v4622_v40, %v14136_v48  ;;  %4648 = vst [vmem:[#allocation3 + $0xa8] sm:$0xf0] %v4634_v49 }
 0x21d   : > { %4650 = vst [vmem:[#allocation3 + $0xb8] sm:$0xf0] %v4636_v50 }
 0x21e   : > { %v14141_v51 = vpop.permute.xlu1 %4375 }
 0x21f   : > { %v4422_v52 = vpop.permute.xlu0 %4421 }
 0x220   : > { %v4435_v53 = vsel %vm4433_vm5, %v4420_v60, %v4422_v52  ;;  %v4436_v54 = vsel %vm4433_vm5, %v4422_v52, %v14125_v30  ;;  %v14174_v60 = vsub.f32 %v4749_v62, %v14158_v5 }
 0x221   : > { %4449 = vst [vmem:[#allocation3 + $0x40] sm:$0xf0] %v4435_v53  ;;  %4450 = vst [vmem:[#allocation3 + $0x48] sm:$0xf0] %v4436_v54  ;;  %v15891_v53 = vand.u32 4294901760, %v14199_v31 }
 0x222   : > { %v14149_v56 = vpop.permute.xlu1 %4475  ;;  %v14195_v28 = vand.u32 4294901760, %v14174_v60 }
 0x223   : > { %v4374_v57 = vpop.permute.xlu0 %4373  ;;  %v4867_v19 = vsub.f32 %v14199_v31, %v15891_v53 }
 0x224   : > { %v4386_v58 = vsel %vm4383_vm4, %v14104_v10, %v4374_v57  ;;  %v4387_v59 = vsel %vm4383_vm4, %v4374_v57, %v14141_v51  ;;  %15931 = vst [vmem:[#allocation16_spill] sm:$0xff] %v14195_v28  ;;  %v4850_v42 = vsub.f32 %v14174_v60, %v14195_v28  ;;  %v15937_v28 = vmov 0.0  }
 0x225   : > { %4400 = vst [vmem:[#allocation3 + $0x48] sm:$0xf] %v4386_v58  ;;  %4401 = vst [vmem:[#allocation3 + $0x50] sm:$0xf] %v4387_v59  ;;  %v14233_v59 = vsub.f32 %v14182_v23, %v15894_v39 }
 0x226   : > { %v14156_v1 = vpop.permute.xlu1 %4575 }
 0x227   : > { %v4470_v3 = vpop.permute.xlu0 %4469 }
 0x228   : > { %v4484_v7 = vsel %vm4483_vm9, %v4468_v38, %v4470_v3  ;;  %v4485_v8 = vsel %vm4483_vm9, %v4470_v3, %v14102_v9  ;;  %v4714_v11 = vld [vmem:[#allocation3 + $0x40] sm:$0xff] }
 0x229   : > { %4498 = vst [vmem:[#allocation3 + $0x70] sm:$0xf] %v4484_v7  ;;  %4499 = vst [vmem:[#allocation3 + $0x78] sm:$0xf] %v4485_v8  ;;  %v4776_v17 = vand.u32 4294901760, %v4714_v11 }
 0x22a   : > { %v14165_v18 = vpop.permute.xlu1 %4325 }
 0x22b   : > { %v4570_v20 = vpop.permute.xlu0 %4569  ;;  %v4337_v21 = vsel %vm4333_vm3, %v14115_v24, %v14165_v18  ;;  %v14170_v22 = vpack.c.bf16 %v4776_v17, %v4772_v16  ;;  %v14185_v24 = vsub.f32 %v4713_v63, %v4778_v14  ;;  %v14197_v29 = vsub.f32 %v4714_v11, %v4776_v17 }
 0x22c   : > { %v4584_v6 = vsel %vm4583_vm10, %v4568_v41, %v4570_v20  ;;  %v4585_v10 = vsel %vm4583_vm10, %v4570_v20, %v14109_v12  ;;  %4351 = vst [vmem:[#allocation3 + $0x18] sm:$0xf0] %v4337_v21  ;;  %v14187_v26 = vld [vmem:[#allocation3 + $0x48] sm:$0xff]  ;;  %v14248_v11 = vand.u32 4294901760, %v4850_v42  ;;  %v14263_v20 = vsub.f32 %v14192_v27, %v15884_v43 }
 0x22d   : > { %4598 = vst [vmem:[#allocation3 + $0xa8] sm:$0xf] %v4584_v6  ;;  %4599 = vst [vmem:[#allocation3 + $0xb0] sm:$0xf] %v4585_v10  ;;  %12498 = vmatprep.subr.bf16.mxu0 %v14170_v22  ;;  %v5347_v38 = vand.u32 4294901760, %v14187_v26  ;;  %v15893_v52 = vand.u32 4294901760, %v14197_v29 }
 0x22e   : > { %12500 = vmatpush1.bf16.msra.mxu0 %v14179_v13  ;;  %v14205_v34 = vpop.permute.xlu1 %4425  ;;  %v4862_v6 = vand.u32 4294901760, %v14233_v59 }
 0x22f   : > { %v4474_v25 = vpop.permute.xlu0 %4473  ;;  %v4437_v36 = vsel %vm4433_vm5, %v14125_v30, %v14205_v34  ;;  %v14228_v58 = vsub.f32 %v14187_v26, %v5347_v38  ;;  %v4873_v17 = vsub.f32 %v14197_v29, %v15893_v52 }
 0x230   : > { %v4486_v32 = vsel %vm4483_vm9, %v14102_v9, %v4474_v25  ;;  %v4487_v33 = vsel %vm4483_vm9, %v4474_v25, %v14149_v56  ;;  %v4721_v35 = vld [vmem:[#allocation3 + $0x78] sm:$0xff]  ;;  %4451 = vst [vmem:[#allocation3 + $0x50] sm:$0xf0] %v4437_v36  ;;  %v4720_v37 = vld [vmem:[#allocation3 + $0x70] sm:$0xff]  ;;  %v15887_v9 = vand.u32 4294901760, %v14185_v24 }
 0x231   : > { %4500 = vst [vmem:[#allocation3 + $0x80] sm:$0xf] %v4486_v32  ;;  %4501 = vst [vmem:[#allocation3 + $0x88] sm:$0xf] %v4487_v33  ;;  %v4780_v41 = vand.u32 4294901760, %v4721_v35  ;;  %v15883_v10 = vand.u32 4294901760, %v14228_v58 }
 0x232   : > { %v14220_v46 = vpop.permute.xlu1 %4525  ;;  %v4879_v62 = vsub.f32 %v14185_v24, %v15887_v9 }
 0x233   : > { %v4574_v40 = vpop.permute.xlu0 %4573  ;;  %v4709_v50 = vld [vmem:[#allocation3 + $0x18] sm:$0xff]  ;;  %v4537_v54 = vsel %vm4533_vm6, %v14131_v44, %v14220_v46  ;;  %v14240_v44 = vsub.f32 %v4721_v35, %v4780_v41 }
 0x234   : > { %v4586_v45 = vsel %vm4583_vm10, %v14109_v12, %v4574_v40  ;;  %v4587_v30 = vsel %vm4583_vm10, %v4574_v40, %v14156_v1  ;;  %v4728_v47 = vld [vmem:[#allocation3 + $0xb0] sm:$0xff]  ;;  %v4727_v49 = vld [vmem:[#allocation3 + $0xa8] sm:$0xff]  ;;  %v4782_v12 = vand.u32 4294901760, %v4720_v37  ;;  %4551 = vst [vmem:[#allocation3 + $0x88] sm:$0xf0] %v4537_v54  ;;  %v5341_v4 = vand.u32 4294901760, %v4709_v50 }
 0x235   : > { %4600 = vst [vmem:[#allocation3 + $0xb8] sm:$0xf] %v4586_v45  ;;  %4601 = vst [vmem:[#allocation3 + $0xc0] sm:$0xf] %v4587_v30  ;;  %v4784_v55 = vand.u32 4294901760, %v4728_v47  ;;  %v4786_v57 = vand.u32 4294901760, %v4727_v49 }
 0x236   : > { %v14272_v32 = vsub.f32 %v4709_v50, %v5341_v4  ;;  %v4880_v33 = vand.u32 4294901760, %v4879_v62  ;;  %v15886_v35 = vand.u32 4294901760, %v14240_v44  ;;  %v4874_v54 = vand.u32 4294901760, %v4873_v17 }
 0x237   : > { %v4670_v63 = vpop.permute.xlu0 %4669  ;;  %v14238_v2 = vpack.c.bf16 %v4784_v55, %v4780_v41  ;;  %v14242_v3 = vpack.c.bf16 %v4786_v57, %v4782_v12  ;;  %v14246_v8 = vsub.f32 %v4728_v47, %v4784_v55  ;;  %v4716_v16 = vld [vmem:[#allocation3 + $0x50] sm:$0xff]  ;;  %v14270_v25 = vsub.f32 %v4727_v49, %v4786_v57 }
 0x238   : > { %v14244_v7 = vpop.permute.xlu1 %4625  ;;  %v5345_v21 = vand.u32 4294901760, %v4716_v16  ;;  %v4722_v42 = vld [vmem:[#allocation3 + $0x80] sm:$0xff]  ;;  %v14284_v49 = vpack.c.bf16 %v5347_v38, %v5343_v61  ;;  %v4868_v55 = vand.u32 4294901760, %v4867_v19  ;;  %v14293_v62 = vsub.f32 %v14228_v58, %v15883_v10 }
 0x239   : > { %v4637_v14 = vsel %vm4633_vm7, %v14136_v48, %v14244_v7  ;;  %12502 = vmatprep.subr.bf16.mxu0 %v14238_v2  ;;  %v14266_v48 = vsub.f32 %v4720_v37, %v4782_v12  ;;  %v15885_v30 = vand.u32 4294901760, %v14246_v8  ;;  %v4741_v12 = vld [vmem:[%s15869_s6] sm:$0xf]  ;;  %v5351_v38 = vand.u32 4294901760, %v4722_v42 }
 0x23a   : > { %4651 = vst [vmem:[#allocation3 + $0xc0] sm:$0xf0] %v4637_v14  ;;  %12504 = vmatpush1.bf16.msra.mxu0 %v14242_v3  ;;  %v14276_v41 = vpack.c.bf16 %v5345_v21, %v5341_v4  ;;  %v14278_v37 = vsub.f32 %v4716_v16, %v5345_v21  ;;  %4744 = vperm.xlu1 %13193, %v4741_v12   ;;  %v15889_v4 = vand.u32 4294901760, %v14272_v32  ;;  %v15890_v14 = vand.u32 4294901760, %v14270_v25 }
 0x23b   : > { %v4668_v26 = vpop.permute.xlu0 %4667  ;;  %v4723_v50 = vld [vmem:[#allocation3 + $0x88] sm:$0xff]  ;;  %v15888_v15 = vand.u32 4294901760, %v14266_v48  ;;  %v14304_v17 = vpack.c.bf16 %v4880_v33, %v4868_v55  ;;  %v4897_v19 = vsub.f32 %v14246_v8, %v15885_v30  ;;  %v12505_v43 = vpack.c.bf16 %v4874_v54, %v4862_v6 }
 0x23c   : > { %v4684_v36 = vsel %vm4683_vm11, %v4668_v26, %v4670_v63  ;;  %v4672_v40 = vpop.permute.xlu1 %4671  ;;  %v4729_v45 = vld [vmem:[#allocation3 + $0xb8] sm:$0xff]  ;;  %12546 = vmatprep.subr.bf16.mxu1 %v14276_v41  ;;  %v5349_v57 = vand.u32 4294901760, %v4723_v50  ;;  %v15892_v21 = vand.u32 4294901760, %v14278_v37  ;;  %v14326_v9 = vsub.f32 %v4722_v42, %v5351_v38 }
 0x23d   : > { %4698 = vst [vmem:[#allocation3 + $0xe0] sm:$0xf] %v4684_v36  ;;  %v4685_v47 = vsel %vm4683_vm11, %v4670_v63, %v4672_v40  ;;  %v5355_v59 = vand.u32 4294901760, %v4729_v45  ;;  %12548 = vmatpush1.bf16.msra.mxu1 %v14284_v49  ;;  %v4885_v63 = vsub.f32 %v14240_v44, %v15886_v35  ;;  %v14322_v35 = vsub.f32 %v14266_v48, %v15888_v15 }
 0x23e   : > { %4699 = vst [vmem:[#allocation3 + $0xe8] sm:$0xf] %v4685_v47  ;;  %v14314_v10 = vsub.f32 %v4723_v50, %v5349_v57  ;;  %v5430_v6 = vsub.f32 %v14272_v32, %v15889_v4  ;;  %v4898_v15 = vand.u32 4294901760, %v4897_v19  ;;  %v5442_v42 = vsub.f32 %v14278_v37, %v15892_v21 }
 0x23f   : > { %v14297_v61 = vpop.permute.xlu0 %4675  ;;  %v14316_v55 = vsub.f32 %v4729_v45, %v5355_v59  ;;  %v14334_v45 = vsub.f32 %v14270_v25, %v15890_v14  ;;  %v14348_v4 = vpack.c.bf16 %v5355_v59, %v5351_v38 }
 0x240   : > { %15932 = vst [vmem:[#allocation17_spill] sm:$0xff] %v14297_v61  ;;  %v4674_v16 = vpop.permute.xlu1 %4673  ;;  %v5431_v38 = vand.u32 4294901760, %v5430_v6  ;;  %v5443_v30 = vand.u32 4294901760, %v5442_v42 }
 0x241   : > { %v4686_v36 = vsel %vm4683_vm11, %v4672_v40, %v4674_v16  ;;  %v4687_v47 = vsel %vm4683_vm11, %v4674_v16, %v14297_v61  ;;  %v4730_v12 = vld [vmem:[#allocation3 + $0xc0] sm:$0xff]  ;;  %v4886_v16 = vand.u32 4294901760, %v4885_v63  ;;  %v15899_v21 = vand.u32 4294901760, %v14316_v55 }
 0x242   : > { %4700 = vst [vmem:[#allocation3 + $0xf0] sm:$0xf] %v4686_v36  ;;  %4701 = vst [vmem:[#allocation3 + $0xf8] sm:$0xf] %v4687_v47  ;;  %v5353_v33 = vand.u32 4294901760, %v4730_v12 }
 0x243   : > { %v14324_v40 = vpop.permute.xlu0 %4379 }
 0x244   : > { %v14336_v50 = vpop.permute.xlu1 %4327  ;;  %v14338_v54 = vpack.c.bf16 %v5353_v33, %v5349_v57  ;;  %v14340_v36 = vsub.f32 %v4730_v12, %v5353_v33  ;;  %v4734_v47 = vld [vmem:[#allocation3 + $0xe0] sm:$0xf]  ;;  %v15898_v57 = vand.u32 4294901760, %v14314_v10 }
 0x245   : > { %v4338_v63 = vsel %vm4333_vm3, %v14165_v18, %v14336_v50  ;;  %v4735_v14 = vld [vmem:[#allocation3 + $0xe8] sm:$0xf]  ;;  %v4752_v53 = vsel %vm2408_vm2, %v4734_v47, 0  ;;  %v4904_v47 = vand.u32 4294901760, %v14334_v45  ;;  %v12509_v45 = vpack.c.bf16 %v4898_v15, %v4886_v16 }
 0x246   : > { %4352 = vst [vmem:[#allocation3 + $0x20] sm:$0xf0] %v4338_v63  ;;  %12550 = vmatprep.subr.bf16.mxu1 %v14338_v54  ;;  %v4755_v19 = vsel %vm2408_vm2, %v4735_v14, 0  ;;  %v14354_v12 = vand.u32 4294901760, %v4752_v53  ;;  %v15897_v33 = vand.u32 4294901760, %v14340_v36  ;;  %v15936_v15 = vand.u32 4294901760, %v14326_v9 }
 0x247   : > { %12552 = vmatpush1.bf16.msra.mxu1 %v14348_v4  ;;  %v14359_v18 = vpop.permute.xlu0 %4527  ;;  %v14361_v59 = vand.u32 4294901760, %v4755_v19 }
 0x248   : > { %15933 = vst [vmem:[#allocation18_spill] sm:$0xff] %v14354_v12  ;;  %v4538_v14 = vsel %vm4533_vm6, %v14220_v46, %v14359_v18  ;;  %v14368_v52 = vpop.permute.xlu1 %4427  ;;  %v14371_v39 = vsub.f32 %v4752_v53, %v14354_v12  ;;  %v5466_v26 = vsub.f32 %v14340_v36, %v15897_v33  ;;  %v5454_v53 = vsub.f32 %v14314_v10, %v15898_v57 }
 0x249   : > { %4552 = vst [vmem:[#allocation3 + $0x90] sm:$0xf0] %v4538_v14  ;;  %v4438_v6 = vsel %vm4433_vm5, %v14205_v34, %v14368_v52  ;;  %4789 = vmatprep.subr.mxu0 %v14361_v59  ;;  %v4737_v0 = vld [vmem:[#allocation3 + $0xf8] sm:$0xf]  ;;  %v4736_v46 = vld [vmem:[#allocation3 + $0xf0] sm:$0xf]  ;;  %v14381_v63 = vsub.f32 %v4755_v19, %v14361_v59  ;;  %v5472_v34 = vsub.f32 %v14316_v55, %v15899_v21 }
 0x24a   : > { %4452 = vst [vmem:[#allocation3 + $0x58] sm:$0xf0] %v4438_v6  ;;  %4791 = vmatpush1.msra.mxu0 %v14354_v12  ;;  %v4761_v42 = vsel %vm2408_vm2, %v4737_v0, 0  ;;  %v4758_v14 = vsel %vm2408_vm2, %v4736_v46, 0  ;;  %v5467_v0 = vand.u32 4294901760, %v5466_v26  ;;  %v12553_v21 = vpack.c.bf16 %v5443_v30, %v5431_v38 }
 0x24b   : > { %12506 = vmatprep.subr.bf16.mxu0 %v12505_v43  ;;  %v14393_v16 = vpop.permute.xlu0 %4627  ;;  %4852 = vmatmul.mubr.f32.vlgmr.msra.gmra.mrb[8].mxu0 %v14248_v11  ;;  %v14396_v19 = vand.u32 4294901760, %v4761_v42  ;;  %v14398_v6 = vand.u32 4294901760, %v4758_v14  ;;  %v15906_v33 = vand.u32 4294901760, %v14381_v63  ;;  %v4892_v43 = vand.u32 4294901760, %v14322_v35 }
 0x24c   : > { %15934 = vst [vmem:[#allocation19_spill] sm:$0xff] %v14393_v16  ;;  %v4638_v46 = vsel %vm4633_vm7, %v14244_v7, %v14393_v16  ;;  %v4332_v57 = vpop.permute.xlu1 %4331  ;;  %12508 = vmatpush1.bf16.msra.mxu0 %v14304_v17  ;;  %v5460_v61 = vsub.f32 %v14326_v9, %v15936_v15  ;;  %4972 = vmatprep.mubr.f32.mxu0 %v15937_v28  ;;  %v5455_v30 = vand.u32 4294901760, %v5454_v53  ;;  %v15938_v17 = vand.u32 4294901760, %v14263_v20 }
 0x24d   : > { %15935 = vst [vmem:[#allocation20_spill] sm:$0xff] %v14398_v6  ;;  %4652 = vst [vmem:[#allocation3 + $0xc8] sm:$0xf0] %v4638_v46  ;;  %12510 = vmatprep.subr.bf16.mxu0 %v12509_v45  ;;  %5358 = vmatprep.subr.mxu1 %v14396_v19  ;;  %v14412_v26 = vsub.f32 %v4758_v14, %v14398_v6  ;;  %v4909_v7 = vsub.f32 %v14381_v63, %v15906_v33  ;;  %v15939_v38 = vand.u32 4294901760, %v14293_v62 }
 0x24e   : > { %v14418_v35 = vsub.f32 %v4761_v42, %v14396_v19  ;;  %5360 = vmatpush1.msra.mxu1 %v14398_v6  ;;  %v12511_v15 = vpack.c.bf16 %v4904_v47, %v4892_v43  ;;  %v5473_v46 = vand.u32 4294901760, %v5472_v34  ;;  %v15940_v14 = vand.u32 4294901760, %v14371_v39 }
 0x24f   : > { %v12555_v45 = vpack.c.bf16 %v15939_v38, %v15938_v17  ;;  %12554 = vmatprep.subr.bf16.mxu1 %v12553_v21  ;;  %v4330_v16 = vpop.permute.xlu0 %4329  ;;  %5421 = vmatmul.mubr.f32.vlgmr.msra.gmra.mrb[8].mxu1 %v14248_v11  ;;  %v4910_v53 = vand.u32 4294901760, %v4909_v7  ;;  %v12557_v42 = vpack.c.bf16 %v5467_v0, %v5455_v30  ;;  %v5483_v6 = vand.u32 4294901760, %v14412_v26 }
 0x250   : > { %v4915_v12 = vsub.f32 %v14371_v39, %v15940_v14  ;;  %v5477_v33 = vand.u32 4294901760, %v14418_v35  ;;  %v4339_v20 = vsel %vm4333_vm3, %v14336_v50, %v4330_v16  ;;  %v4340_v62 = vsel %vm4333_vm3, %v4330_v16, %v4332_v57  ;;  %v4432_v47 = vpop.permute.xlu1 %4431  ;;  %12512 = vmatpush1.bf16.msra.mxu0 %v12511_v15  ;;  %5541 = vmatprep.mubr.f32.mxu1 %v15937_v28 }
 0x251   : > { %12556 = vmatpush1.bf16.msra.mxu1 %v12555_v45  ;;  %v5461_v34 = vand.u32 4294901760, %v5460_v61  ;;  %4353 = vst [vmem:[#allocation3 + $0x28] sm:$0xf0] %v4339_v20  ;;  %4354 = vst [vmem:[#allocation3 + $0x30] sm:$0xf0] %v4340_v62  ;;  %4911 = vmatprep.subr.mxu0 %v4910_v53  ;;  %v5484_v50 = vsub.f32 %v14412_v26, %v5483_v6  ;;  %v12513_v61 = vpack.c.bf16 %v14197_v29, %v14182_v23 }
 0x252   : > { %12558 = vmatprep.subr.bf16.mxu1 %v12557_v42  ;;  %v5478_v21 = vsub.f32 %v14418_v35, %v5477_v33  ;;  %v4916_v43 = vand.u32 4294901760, %v4915_v12  ;;  %v12515_v12 = vpack.c.bf16 %v14185_v24, %v14199_v31  ;;  %v12517_v38 = vpack.c.bf16 %v14246_v8, %v14240_v44 }
 0x253   : > { %v12559_v0 = vpack.c.bf16 %v5473_v46, %v5461_v34  ;;  %v4430_v57 = vpop.permute.xlu0 %4429  ;;  %v5485_v45 = vand.u32 4294901760, %v5484_v50  ;;  %v12561_v15 = vpack.c.bf16 %v14278_v37, %v14272_v32  ;;  %v12563_v53 = vpack.c.bf16 %v14228_v58, %v14192_v27 }
 0x254   : > { %v5479_v16 = vand.u32 4294901760, %v5478_v21  ;;  %v4439_v7 = vsel %vm4433_vm5, %v14368_v52, %v4430_v57  ;;  %v4440_v30 = vsel %vm4433_vm5, %v4430_v57, %v4432_v47  ;;  %v4480_v17 = vpop.permute.xlu1 %4479  ;;  %4917 = vmatpush1.msra.mxu0 %v4916_v43  ;;  %v12519_v42 = vpack.c.bf16 %v14270_v25, %v14266_v48 }
 0x255   : > { %12560 = vmatpush1.bf16.msra.mxu1 %v12559_v0  ;;  %4453 = vst [vmem:[#allocation3 + $0x60] sm:$0xf0] %v4439_v7  ;;  %4454 = vst [vmem:[#allocation3 + $0x68] sm:$0xf0] %v4440_v30  ;;  %12514 = vmatprep.subr.bf16.mxu0 %v12513_v61  ;;  %v12565_v20 = vpack.c.bf16 %v14340_v36, %v14314_v10  ;;  %v12567_v0 = vpack.c.bf16 %v14316_v55, %v14326_v9 }
 0x256   : > { %5480 = vmatprep.subr.mxu1 %v5479_v16  ;;  %4974 = vmatmul.mubr.f32.vlgmr.msra.gmra.mrb[8].mxu0 %v14158_v5 }
 0x257   : > { %12516 = vmatpush1.bf16.msra.mxu0 %v12515_v12  ;;  %v4382_v52 = vpop.permute.xlu0 %4381  ;;  %5064 = vmatprep.mubr.f32.mxu0 %v15937_v28 }
 0x258   : > { %12518 = vmatprep.subr.bf16.mxu0 %v12517_v38  ;;  %v4390_v46 = vsel %vm4383_vm4, %v14324_v40, %v4382_v52  ;;  %v4580_v14 = vpop.permute.xlu1 %4579 }
 0x259   : > { %5486 = vmatpush1.msra.mxu1 %v5485_v45  ;;  %4404 = vst [vmem:[#allocation3 + $0x68] sm:$0xf] %v4390_v46  ;;  %v15941_v45 = vand.u32 4294901760, %v14182_v23  ;;  %v15948_v23 = vand.u32 4294901760, %v14240_v44 }
 0x25a   : > { %12562 = vmatprep.subr.bf16.mxu1 %v12561_v15  ;;  %5543 = vmatmul.mubr.f32.vlgmr.msra.gmra.mrb[8].mxu1 %v14158_v5  ;;  %v15943_v15 = vld [vmem:[#allocation19_spill] sm:$0xff] }
 0x25b   : > { %12564 = vmatpush1.bf16.msra.mxu1 %v12563_v53  ;;  %5633 = vmatprep.mubr.f32.mxu1 %v15937_v28  ;;  %v4478_v62 = vpop.permute.xlu0 %4477  ;;  %v15944_v53 = vld [vmem:[#allocation18_spill] sm:$0xff] }
 0x25c   : > { %12520 = vmatpush1.bf16.msra.mxu0 %v12519_v42  ;;  %12566 = vmatprep.subr.bf16.mxu1 %v12565_v20  ;;  %v4488_v47 = vsel %vm4483_vm9, %v14149_v56, %v4478_v62  ;;  %v4489_v34 = vsel %vm4483_vm9, %v4478_v62, %v4480_v17  ;;  %v4532_v21 = vpop.permute.xlu1 %4531  ;;  %v15945_v42 = vand.u32 4294901760, %v14199_v31  ;;  %v15947_v62 = vld [vmem:[#allocation16_spill] sm:$0xff]  ;;  %v15951_v31 = vand.u32 4294901760, %v14278_v37 }
 0x25d   : > { %5006 = vmatprep.subr.mxu0 %v14381_v63  ;;  %4502 = vst [vmem:[#allocation3 + $0x90] sm:$0xf] %v4488_v47  ;;  %4503 = vst [vmem:[#allocation3 + $0x98] sm:$0xf] %v4489_v34  ;;  %v14515_v34 = vld [vmem:[#allocation3 + $0x20] sm:$0xff]  ;;  %v15956_v37 = vand.u32 4294901760, %v14266_v48 }
 0x25f   : > { %12568 = vmatpush1.bf16.msra.mxu1 %v12567_v0  ;;  %v4578_v43 = vpop.permute.xlu0 %4577  ;;  %v15950_v0 = vand.u32 4294901760, %v14272_v32 }
 0x260   : > { %5009 = vmatpush1.msra.mxu0 %v14371_v39  ;;  %5575 = vmatprep.subr.mxu1 %v14418_v35  ;;  %v4588_v50 = vsel %vm4583_vm10, %v14156_v1, %v4578_v43  ;;  %v4589_v56 = vsel %vm4583_vm10, %v4578_v43, %v4580_v14  ;;  %v4378_v57 = vpop.permute.xlu1 %4377 }
 0x261   : > { %12522 = vmatprep.subr.bf16.mxu0 %v14170_v22  ;;  %5067 = vmatmul.mubr.f32.vlgmr.msra.gmra.mrb[8].mxu0 %v14174_v60  ;;  %4602 = vst [vmem:[#allocation3 + $0xc8] sm:$0xf] %v4588_v50  ;;  %4603 = vst [vmem:[#allocation3 + $0xd0] sm:$0xf] %v4589_v56  ;;  %v4388_v61 = vsel %vm4383_vm4, %v14141_v51, %v4378_v57  ;;  %v4389_v16 = vsel %vm4383_vm4, %v4378_v57, %v14324_v40  ;;  %v15953_v56 = vld [vmem:[#allocation20_spill] sm:$0xff]  ;;  %v15955_v57 = vand.u32 4294901760, %v14228_v58 }
 0x262   : > { %12524 = vmatpush1.bf16.msra.mxu0 %v14179_v13  ;;  %5147 = vmatprep.mubr.f32.mxu0 %v15937_v28  ;;  %4402 = vst [vmem:[#allocation3 + $0x58] sm:$0xf] %v4388_v61  ;;  %4403 = vst [vmem:[#allocation3 + $0x60] sm:$0xf] %v4389_v16  ;;  %v12577_v43 = vpack.c.bf16 %v15951_v31, %v15950_v0  ;;  %v14529_v16 = vld [vmem:[#allocation3 + $0x28] sm:$0xff]  ;;  %v5912_v58 = vand.u32 4294901760, %v14515_v34 }
 0x263   : > { %12526 = vmatprep.subr.bf16.mxu0 %v14238_v2  ;;  %5578 = vmatpush1.msra.mxu1 %v14412_v26  ;;  %v4482_v1 = vpop.permute.xlu0 %4481  ;;  %vm7055_vm4 = vcmask 1040384  }
 0x264   : > { %12570 = vmatprep.subr.bf16.mxu1 %v14276_v41  ;;  %5636 = vmatmul.mubr.f32.vlgmr.msra.gmra.mrb[8].mxu1 %v14174_v60  ;;  %v4490_v51 = vsel %vm4483_vm9, %v4480_v17, %v4482_v1  ;;  %v4530_v40 = vpop.permute.xlu1 %4529  ;;  %v15957_v1 = vand.u32 4294901760, %v14270_v25  ;;  %v4724_v31 = vld [vmem:[#allocation3 + $0x90] sm:$0xff] }
 0x265   : > { %12572 = vmatpush1.bf16.msra.mxu1 %v14284_v49  ;;  %5716 = vmatprep.mubr.f32.mxu1 %v15937_v28  ;;  %4504 = vst [vmem:[#allocation3 + $0xa0] sm:$0xf] %v4490_v51  ;;  %v4539_v7 = vsel %vm4533_vm6, %v14359_v18, %v4530_v40  ;;  %v4540_v30 = vsel %vm4533_vm6, %v4530_v40, %v4532_v21  ;;  %v15942_v18 = vand.u32 4294901760, %v14197_v29  ;;  %v15949_v29 = vand.u32 4294901760, %v14246_v8 }
 0x266   : > { %12528 = vmatpush1.bf16.msra.mxu0 %v14242_v3  ;;  %12574 = vmatprep.subr.bf16.mxu1 %v14338_v54  ;;  %4553 = vst [vmem:[#allocation3 + $0x98] sm:$0xf0] %v4539_v7  ;;  %4554 = vst [vmem:[#allocation3 + $0xa0] sm:$0xf0] %v4540_v30  ;;  %v15954_v8 = vand.u32 4294901760, %v14192_v27  ;;  %v12535_v51 = vpack.c.bf16 %v15957_v1, %v15956_v37  ;;  %v15958_v40 = vand.u32 4294901760, %v14314_v10 }
 0x267   : > { %5090 = vmatprep.subr.mxu0 %v14361_v59  ;;  %v4582_v17 = vpop.permute.xlu0 %4581  ;;  %v12529_v52 = vpack.c.bf16 %v15942_v18, %v15941_v45  ;;  %v12533_v47 = vpack.c.bf16 %v15949_v29, %v15948_v23  ;;  %v15959_v27 = vand.u32 4294901760, %v14340_v36  ;;  %v14542_v30 = vld [vmem:[#allocation3 + $0x30] sm:$0xff]  ;;  %v15961_v36 = vand.u32 4294901760, %v14326_v9 }
 0x268   : > { %v4590_v12 = vsel %vm4583_vm10, %v4580_v14, %v4582_v17  ;;  %v4630_v38 = vpop.permute.xlu1 %4629  ;;  %v15946_v14 = vand.u32 4294901760, %v14185_v24  ;;  %v15952_v24 = vld [vmem:[#allocation17_spill] sm:$0xff]  ;;  %v12579_v61 = vpack.c.bf16 %v15955_v57, %v15954_v8  ;;  %v5910_v17 = vand.u32 4294901760, %v14529_v16 }
 0x269   : > { %12576 = vmatpush1.bf16.msra.mxu1 %v14348_v4  ;;  %4604 = vst [vmem:[#allocation3 + $0xd8] sm:$0xf] %v4590_v12  ;;  %v4639_v46 = vsel %vm4633_vm7, %v15943_v15, %v4630_v38  ;;  %v12581_v7 = vpack.c.bf16 %v15959_v27, %v15958_v40  ;;  %v4718_v25 = vld [vmem:[#allocation3 + $0x60] sm:$0xff]  ;;  %v15960_v12 = vand.u32 4294901760, %v14381_v63  ;;  %v14552_v18 = vld [vmem:[#allocation3 + $0x58] sm:$0xff]  ;;  %v5920_v26 = vand.u32 4294901760, %v4724_v31 }
 0x26a   : > { %5092 = vmatpush1.msra.mxu0 %v15944_v53  ;;  %5659 = vmatprep.subr.mxu1 %v14396_v19  ;;  %v12531_v20 = vpack.c.bf16 %v15946_v14, %v15945_v42  ;;  %4653 = vst [vmem:[#allocation3 + $0xd0] sm:$0xf0] %v4639_v46  ;;  %v14560_v42 = vsub.f32 %v14515_v34, %v5912_v58  ;;  %v5914_v9 = vand.u32 4294901760, %v4718_v25  ;;  %v15963_v14 = vand.u32 4294901760, %v14371_v39 }
 0x26b   : > { %12530 = vmatprep.subr.bf16.mxu0 %v12529_v52  ;;  %5151 = vmatmul.mubr.f32.vlgmr.msra.gmra.mrb[8].mxu0 %v15947_v62  ;;  %v4678_v21 = vpop.permute.xlu0 %4677  ;;  %v6480_v52 = vand.u32 4294901760, %v14542_v30  ;;  %v5916_v23 = vand.u32 4294901760, %v14552_v18 }
 0x26c   : > { %12532 = vmatpush1.bf16.msra.mxu0 %v12531_v20  ;;  %5251 = vmatprep.mubr.f32.mxu0 %v15937_v28  ;;  %v4688_v50 = vsel %vm4683_vm11, %v15952_v24, %v4678_v21  ;;  %v4632_v44 = vpop.permute.xlu1 %4631  ;;  %v14569_v20 = vsub.f32 %v14529_v16, %v5910_v17  ;;  %v6004_v35 = vand.u32 4294901760, %v14560_v42 }
 0x26d   : > { %12534 = vmatprep.subr.bf16.mxu0 %v12533_v47  ;;  %5661 = vmatpush1.msra.mxu1 %v15953_v56  ;;  %4702 = vst [vmem:[#allocation3 + $0x100] sm:$0xf] %v4688_v50  ;;  %v4640_v32 = vsel %vm4633_vm7, %v4630_v38, %v4632_v44  ;;  %v15962_v38 = vand.u32 4294901760, %v14316_v55  ;;  %v4719_v55 = vld [vmem:[#allocation3 + $0x68] sm:$0xff]  ;;  %v4725_v29 = vld [vmem:[#allocation3 + $0x98] sm:$0xff]  ;;  %v14580_v39 = vsub.f32 %v14542_v30, %v6480_v52  ;;  %v4726_v57 = vld [vmem:[#allocation3 + $0xa0] sm:$0xff] }
 0x26e   : > { %12578 = vmatprep.subr.bf16.mxu1 %v12577_v43  ;;  %5720 = vmatmul.mubr.f32.vlgmr.msra.gmra.mrb[8].mxu1 %v15947_v62  ;;  %4654 = vst [vmem:[#allocation3 + $0xd8] sm:$0xf0] %v4640_v32  ;;  %v5918_v0 = vand.u32 4294901760, %v4725_v29  ;;  %v14620_v32 = vpack.c.bf16 %v5914_v9, %v5910_v17  ;;  %v6486_v27 = vand.u32 4294901760, %v4726_v57  ;;  %v14640_v17 = vsub.f32 %v4724_v31, %v5920_v26 }
 0x26f   : > { %12580 = vmatpush1.bf16.msra.mxu1 %v12579_v61  ;;  %5820 = vmatprep.mubr.f32.mxu1 %v15937_v28  ;;  %v4682_v48 = vpop.permute.xlu0 %4681  ;;  %v12583_v45 = vpack.c.bf16 %v15962_v38, %v15961_v36 }
 0x270   : > { %12536 = vmatpush1.bf16.msra.mxu0 %v12535_v51  ;;  %12582 = vmatprep.subr.bf16.mxu1 %v12581_v7  ;;  %v4680_v10 = vpop.permute.xlu1 %4679  ;;  %v14615_v61 = vsub.f32 %v4725_v29, %v5918_v0 }
 0x271   : > { %5192 = vmatprep.subr.mxu0 %v15960_v12  ;;  %v4689_v15 = vsel %vm4683_vm11, %v4678_v21, %v4680_v10  ;;  %v4690_v46 = vsel %vm4683_vm11, %v4680_v10, %v4682_v48  ;;  %v14562_v63 = vld [vmem:[#allocation3 + $0xd0] sm:$0xff]  ;;  %v14575_v21 = vld [vmem:[#allocation3 + $0xc8] sm:$0xff] }
 0x272   : > { %4703 = vst [vmem:[#allocation3 + $0x108] sm:$0xf] %v4689_v15  ;;  %4704 = vst [vmem:[#allocation3 + $0x110] sm:$0xf] %v4690_v46  ;;  %v5922_v47 = vand.u32 4294901760, %v14562_v63  ;;  %v5924_v43 = vand.u32 4294901760, %v14575_v21 }
 0x273   : > { %12584 = vmatpush1.bf16.msra.mxu1 %v12583_v45  ;;  %v6022_v34 = vand.u32 4294901760, %v14615_v61  ;;  %v14669_v45 = vsub.f32 %v4726_v57, %v6486_v27  ;;  %v15910_v15 = vmov 0.0|0.0  }
 0x274   : > { %5196 = vmatpush1.msra.mxu0 %v15963_v14  ;;  %5761 = vmatprep.subr.mxu1 %v5477_v33  ;;  %v6483_v33 = vand.u32 4294901760, %v4719_v55  ;;  %v4738_v8 = vld [vmem:[#allocation3 + $0x100] sm:$0xf]  ;;  %v14623_v37 = vsub.f32 %v14575_v21, %v5924_v43  ;;  %v14649_v10 = vpack.c.bf16 %v5922_v47, %v5918_v0  ;;  %v14679_v46 = vpack.c.bf16 %v5924_v43, %v5920_v26 }
 0x275   : > { %12538 = vmatprep.subr.bf16.mxu0 %v14170_v22  ;;  %5253 = vmatmul.mubr.f32.vlgmr.msra.gmra.mrb[8].mxu0 %v14158_v5  ;;  %v14588_v22 = vsub.f32 %v4718_v25, %v5914_v9  ;;  %v14596_v24 = vld [vmem:[#allocation3 + $0xd8] sm:$0xff]  ;;  %v4764_v40 = vsel %vm2408_vm2, %v4738_v8, 0  ;;  %v14638_v25 = vpack.c.bf16 %v5916_v23, %v5912_v58  ;;  %v6023_v14 = vsub.f32 %v14615_v61, %v6022_v34 }
 0x276   : > { %12540 = vmatpush1.bf16.msra.mxu0 %v14179_v13  ;;  %5333 = vmatprep.mubr.f32.mxu0 %v15937_v28  ;;  %v14593_v13 = vsub.f32 %v14552_v18, %v5916_v23  ;;  %v14607_v50 = vsub.f32 %v4719_v55, %v6483_v33  ;;  %v14659_v58 = vand.u32 4294901760, %v4764_v40  ;;  %v6040_v38 = vand.u32 4294901760, %v14623_v37 }
 0x277   : > { %12542 = vmatprep.subr.bf16.mxu0 %v14238_v2  ;;  %5765 = vmatpush1.msra.mxu1 %v5483_v6  ;;  %v5998_v2 = vand.u32 4294901760, %v14569_v20  ;;  %v14601_v6 = vsub.f32 %v14562_v63, %v5922_v47  ;;  %v6028_v63 = vand.u32 4294901760, %v14640_v17  ;;  %v6576_v26 = vand.u32 4294901760, %v14669_v45 }
 0x278   : > { %12586 = vmatprep.subr.bf16.mxu1 %v14276_v41  ;;  %5822 = vmatmul.mubr.f32.vlgmr.msra.gmra.mrb[8].mxu1 %v14158_v5  ;;  %v6562_v41 = vand.u32 4294901760, %v14580_v39  ;;  %v6016_v51 = vand.u32 4294901760, %v14593_v13  ;;  %v6569_v12 = vand.u32 4294901760, %v14607_v50  ;;  %v14700_v47 = vsub.f32 %v4764_v40, %v14659_v58 }
 0x279   : > { %12588 = vmatpush1.bf16.msra.mxu1 %v14284_v49  ;;  %5902 = vmatprep.mubr.f32.mxu1 %v15937_v28  ;;  %v4739_v44 = vld [vmem:[#allocation3 + $0x108] sm:$0xf]  ;;  %v14612_v49 = vsub.f32 %v14560_v42, %v6004_v35  ;;  %v5999_v1 = vsub.f32 %v14569_v20, %v5998_v2  ;;  %v6034_v7 = vand.u32 4294901760, %v14601_v6  ;;  %v4740_v48 = vld [vmem:[#allocation3 + $0x110] sm:$0xf]  ;;  %v6041_v0 = vsub.f32 %v14623_v37, %v6040_v38 }
 0x27a   : > { %12544 = vmatpush1.bf16.msra.mxu0 %v14242_v3  ;;  %12590 = vmatprep.subr.bf16.mxu1 %v14338_v54  ;;  %v4767_v16 = vsel %vm2408_vm2, %v4739_v44, 0  ;;  %v6489_v3 = vand.u32 4294901760, %v14596_v24  ;;  %v6010_v54 = vand.u32 4294901760, %v14588_v22  ;;  %v6017_v30 = vsub.f32 %v14593_v13, %v6016_v51 }
 0x27b   : > { %5276 = vmatprep.subr.mxu0 %v14361_v59  ;;  %v14630_v59 = vand.u32 4294901760, %v4767_v16  ;;  %v4770_v36 = vsel %vm2408_vm2, %v4740_v48, 0  ;;  %v6035_v18 = vsub.f32 %v14601_v6, %v6034_v7  ;;  %v6570_v9 = vsub.f32 %v14607_v50, %v6569_v12 }
 0x27c   : > { %v14692_v23 = vand.u32 4294901760, %v4770_v36  ;;  %v6000_v21 = vand.u32 4294901760, %v5999_v1  ;;  %v14706_v31 = vpack.c.bf16 %v6489_v3, %v6486_v27  ;;  %v6006_v44 = vand.u32 4294901760, %v14612_v49 }
 0x27d   : > { %12592 = vmatpush1.bf16.msra.mxu1 %v14348_v4  ;;  %v14644_v4 = vpack.c.bf16 %v6483_v33, %v6480_v52  ;;  %v14675_v52 = vsub.f32 %v4767_v16, %v14630_v59  ;;  %v6018_v33 = vand.u32 4294901760, %v6017_v30  ;;  %v6036_v43 = vand.u32 4294901760, %v6035_v18 }
 0x27e   : > { %5278 = vmatpush1.msra.mxu0 %v15944_v53  ;;  %5845 = vmatprep.subr.mxu1 %v14396_v19  ;;  %v14652_v19 = vsub.f32 %v14596_v24, %v6489_v3  ;;  %v6011_v53 = vsub.f32 %v14588_v22, %v6010_v54  ;;  %v6029_v8 = vsub.f32 %v14640_v17, %v6028_v63  ;;  %v6571_v57 = vand.u32 4294901760, %v6570_v9 }
 0x27f   : > { %5335 = vmatmul.mubr.f32.vlgmr.msra.gmra.mrb[8].mxu0 %v14158_v5  ;;  %12594 = vmatprep.subr.bf16.mxu0 %v14620_v32  ;;  %v6046_v24 = vand.u32 4294901760, %v14675_v52  ;;  %v6024_v1 = vand.u32 4294901760, %v6023_v14  ;;  %v14716_v40 = vsub.f32 %v4770_v36, %v14692_v23  ;;  %v12603_v27 = vpack.c.bf16 %v6018_v33, %v6006_v44 }
 0x280   : > { %12596 = vmatpush1.bf16.msra.mxu0 %v14638_v25  ;;  %5984 = vmatprep.mubr.f32.mxu0 %v15937_v28  ;;  %v6012_v55 = vand.u32 4294901760, %v6011_v53  ;;  %v6583_v29 = vand.u32 4294901760, %v14652_v19  ;;  %v6042_v49 = vand.u32 4294901760, %v6041_v0  ;;  %v6052_v48 = vand.u32 4294901760, %v14700_v47 }
 0x281   : > { %12598 = vmatprep.subr.bf16.mxu0 %v14649_v10  ;;  %5847 = vmatpush1.msra.mxu1 %v15953_v56  ;;  %v6563_v56 = vsub.f32 %v14580_v39, %v6562_v41  ;;  %v12605_v53 = vpack.c.bf16 %v6036_v43, %v6024_v1  ;;  %v6047_v36 = vsub.f32 %v14675_v52, %v6046_v24  ;;  %v6030_v9 = vand.u32 4294901760, %v6029_v8 }
 0x282   : > { %5904 = vmatmul.mubr.f32.vlgmr.msra.gmra.mrb[8].mxu1 %v14158_v5  ;;  %12641 = vmatprep.subr.bf16.mxu1 %v15910_v15  ;;  %v12601_v16 = vpack.c.bf16 %v6012_v55, %v6000_v21  ;;  %v6584_v3 = vsub.f32 %v14652_v19, %v6583_v29  ;;  %v6577_v18 = vsub.f32 %v14669_v45, %v6576_v26  ;;  %v6590_v21 = vand.u32 4294901760, %v14716_v40 }
 0x283   : > { %12643 = vmatpush3.bf16.msra.mxu1 %v14644_v4  ;;  %12279 = vmatprep.mubr.msk.f32.mxu1 %vm13418_vm12, %v15937_v28  ;;  %v6564_v30 = vand.u32 4294901760, %v6563_v56  ;;  %v12607_v56 = vpack.c.bf16 %v6042_v49, %v6030_v9  ;;  %v6053_v33 = vsub.f32 %v14700_v47, %v6052_v48  ;;  %v6048_v0 = vand.u32 4294901760, %v6047_v36 }
 0x284   : > { %12600 = vmatpush1.bf16.msra.mxu0 %v14679_v46  ;;  %12644 = vmatprep.subr.bf16.mxu1 %v15910_v15  ;;  %v6585_v14 = vand.u32 4294901760, %v6584_v3  ;;  %v6578_v43 = vand.u32 4294901760, %v6577_v18  ;;  %v6591_v8 = vsub.f32 %v14716_v40, %v6590_v21  ;;  %v12613_v1 = vpack.c.bf16 %v14601_v6, %v14615_v61  ;;  %v14856_v6 = vld [vmem:[#allocation9 + $0x38] sm:$0x1] }
 0x285   : > { %5927 = vmatprep.subr.mxu0 %v14630_v59  ;;  %v12648_v55 = vpack.c.bf16 %v6571_v57, %v6564_v30  ;;  %v12609_v57 = vpack.c.bf16 %v14588_v22, %v14569_v20  ;;  %v12615_v49 = vpack.c.bf16 %v14623_v37, %v14640_v17  ;;  %v12625_v30 = vpack.c.bf16 %v6010_v54, %v5998_v2  ;;  %v14854_v2 = vld [vmem:[#allocation9 + $0x8] sm:$0xff]  ;;  %v14869_v54 = vld [vmem:[#allocation9 + $0x10] sm:$0xff] }
 0x286   : > { %v12651_v44 = vpack.c.bf16 %v6585_v14, %v6578_v43  ;;  %v6592_v3 = vand.u32 4294901760, %v6591_v8  ;;  %v12629_v20 = vpack.c.bf16 %v6034_v7, %v6022_v34  ;;  %v14880_v7 = vld [vmem:[#allocation9 + $0x50] sm:$0x1]  ;;  %vm6992_vm14 = vcmp.gt.f32.partialorder %v14854_v2, 0.5 }
 0x287   : > { %12646 = vmatpush3.bf16.msra.mxu1 %v14706_v31  ;;  %vm6998_vm15 = vcmp.gt.f32.partialorder %v14856_v6, 0.5  ;;  %vm6993_vm0 = vcmp.gt.f32.partialorder %v14869_v54, 0.5  ;;  %vm7001_vm7 = vcmp.gt.f32.partialorder %v14880_v7, 0.5  ;;  %v6981_v7 = vld [vmem:[#allocation9 + $0x20] sm:$0xff] }
 0x288   : > { %5929 = vmatpush1.msra.mxu0 %v14659_v58  ;;  %12277 = vmatprep.subr.mxu1 %v15937_v28  ;;  %vm6995_vm9 = vcmp.gt.f32.partialorder %v6981_v7, 0.5 }
 0x289   : > { %12602 = vmatprep.subr.bf16.mxu0 %v12601_v16  ;;  %5990 = vmatmul.mubr.f32.vlgmr.msra.gmra.mrb[10].mxu0 %v14248_v11  ;;  %v12611_v16 = vpack.c.bf16 %v14593_v13, %v14560_v42  ;;  %v12666_v42 = vpack.c.bf16 %v6569_v12, %v6562_v41  ;;  %v14852_v13 = vld [vmem:[#allocation9] sm:$0xff] }
 0x28a   : > { %12604 = vmatpush1.bf16.msra.mxu0 %v12603_v27  ;;  %6110 = vmatprep.mubr.f32.mxu0 %v15937_v28  ;;  %v12654_v27 = vpack.c.bf16 %v14607_v50, %v14580_v39  ;;  %v12669_v39 = vpack.c.bf16 %v6583_v29, %v6576_v26  ;;  %vm6991_vm13 = vcmp.gt.f32.partialorder %v14852_v13, 0.5 }
 0x28b   : > { %12606 = vmatprep.subr.bf16.mxu0 %v12605_v53  ;;  %12278 = vmatpush3.msra.mxu1 %v14692_v23  ;;  %v12657_v53 = vpack.c.bf16 %v14652_v19, %v14669_v45 }
 0x28c   : > { %12647 = vmatprep.subr.bf16.mxu1 %v15910_v15  ;;  %12280 = vmatmul.mubr.f32.vlgmr.msra.gmra.mrb[10].mxu1 %v14248_v11  ;;  %v6054_v11 = vand.u32 4294901760, %v6053_v33 }
 0x28d   : > { %12649 = vmatpush3.bf16.msra.mxu1 %v12648_v55  ;;  %12292 = vmatprep.mubr.msk.f32.mxu1 %vm13418_vm12, %v15937_v28 }
 0x28e   : > { %12608 = vmatpush1.bf16.msra.mxu0 %v12607_v56  ;;  %12650 = vmatprep.subr.bf16.mxu1 %v15910_v15 }
 0x28f   : > { %6049 = vmatprep.subr.mxu0 %v6048_v0 }
 0x291   : > { %12652 = vmatpush3.bf16.msra.mxu1 %v12651_v44 }
 0x292   : > { %6055 = vmatpush1.msra.mxu0 %v6054_v11  ;;  %12290 = vmatprep.subr.mxu1 %v15937_v28 }
 0x293   : > { %12610 = vmatprep.subr.bf16.mxu0 %v12609_v57  ;;  %6112 = vmatmul.mubr.f32.vlgmr.msra.gmra.mrb[10].mxu0 %v14158_v5 }
 0x294   : > { %12612 = vmatpush1.bf16.msra.mxu0 %v12611_v16  ;;  %6202 = vmatprep.mubr.f32.mxu0 %v15937_v28 }
 0x295   : > { %12614 = vmatprep.subr.bf16.mxu0 %v12613_v1  ;;  %12291 = vmatpush3.msra.mxu1 %v6592_v3 }
 0x296   : > { %12653 = vmatprep.subr.bf16.mxu1 %v15910_v15  ;;  %12293 = vmatmul.mubr.f32.vlgmr.msra.gmra.mrb[10].mxu1 %v14158_v5 }
 0x297   : > { %12655 = vmatpush3.bf16.msra.mxu1 %v12654_v27  ;;  %12305 = vmatprep.mubr.msk.f32.mxu1 %vm13418_vm12, %v15937_v28 }
 0x298   : > { %12616 = vmatpush1.bf16.msra.mxu0 %v12615_v49  ;;  %12656 = vmatprep.subr.bf16.mxu1 %v15910_v15 }
 0x299   : > { %6144 = vmatprep.subr.mxu0 %v14675_v52 }
 0x29b   : > { %12658 = vmatpush3.bf16.msra.mxu1 %v12657_v53 }
 0x29c   : > { %6147 = vmatpush1.msra.mxu0 %v14700_v47  ;;  %12303 = vmatprep.subr.mxu1 %v15937_v28 }
 0x29d   : > { %12618 = vmatprep.subr.bf16.mxu0 %v14620_v32  ;;  %6205 = vmatmul.mubr.f32.vlgmr.msra.gmra.mrb[10].mxu0 %v14174_v60 }
 0x29e   : > { %12620 = vmatpush1.bf16.msra.mxu0 %v14638_v25  ;;  %6285 = vmatprep.mubr.f32.mxu0 %v15937_v28 }
 0x29f   : > { %12622 = vmatprep.subr.bf16.mxu0 %v14649_v10  ;;  %12304 = vmatpush3.msra.mxu1 %v14716_v40 }
 0x2a0   : > { %12659 = vmatprep.subr.bf16.mxu1 %v15910_v15  ;;  %12306 = vmatmul.mubr.f32.vlgmr.msra.gmra.mrb[10].mxu1 %v14174_v60  ;;  %v12627_v60 = vpack.c.bf16 %v6016_v51, %v6004_v35  ;;  %v12631_v35 = vpack.c.bf16 %v6040_v38, %v6028_v63  ;;  %v14876_v51 = vld [vmem:[#allocation9 + $0x18] sm:$0xff] }
 0x2a1   : > { %12661 = vmatpush3.bf16.msra.mxu1 %v14644_v4  ;;  %12318 = vmatprep.mubr.msk.f32.mxu1 %vm13418_vm12, %v15937_v28  ;;  %vm6994_vm5 = vcmp.gt.f32.partialorder %v14876_v51, 0.5 }
 0x2a2   : > { %12624 = vmatpush1.bf16.msra.mxu0 %v14679_v46  ;;  %12662 = vmatprep.subr.bf16.mxu1 %v15910_v15 }
 0x2a3   : > { %6228 = vmatprep.subr.mxu0 %v14630_v59 }
 0x2a5   : > { %12664 = vmatpush3.bf16.msra.mxu1 %v14706_v31 }
 0x2a6   : > { %6230 = vmatpush1.msra.mxu0 %v14659_v58  ;;  %12316 = vmatprep.subr.mxu1 %v15937_v28 }
 0x2a7   : > { %12626 = vmatprep.subr.bf16.mxu0 %v12625_v30  ;;  %6289 = vmatmul.mubr.f32.vlgmr.msra.gmra.mrb[10].mxu0 %v15947_v62 }
 0x2a8   : > { %12628 = vmatpush1.bf16.msra.mxu0 %v12627_v60  ;;  %6389 = vmatprep.mubr.f32.mxu0 %v15937_v28 }
 0x2a9   : > { %12630 = vmatprep.subr.bf16.mxu0 %v12629_v20  ;;  %12317 = vmatpush3.msra.mxu1 %v14692_v23 }
 0x2aa   : > { %12665 = vmatprep.subr.bf16.mxu1 %v15910_v15  ;;  %12319 = vmatmul.mubr.f32.vlgmr.msra.gmra.mrb[10].mxu1 %v15947_v62  ;;  %v15909_v62 = vlaneseq }
 0x2ab   : > { %12667 = vmatpush3.bf16.msra.mxu1 %v12666_v42  ;;  %12331 = vmatprep.mubr.msk.f32.mxu1 %vm13418_vm12, %v15937_v28 }
 0x2ac   : > { %12632 = vmatpush1.bf16.msra.mxu0 %v12631_v35  ;;  %12668 = vmatprep.subr.bf16.mxu1 %v15910_v15  ;;  %v14850_v22 = vshrl.u32 %v15909_v62, 7 }
 0x2ad   : > { %6330 = vmatprep.subr.mxu0 %v6046_v24 }
 0x2ae   : > { %15964 = vst [vmem:[#allocation19_spill] sm:$0xff] %v14850_v22  ;;  %v14861_v50 = vsub.s32 0, %v14850_v22  ;;  %v14867_v61 = vsub.s32 2, %v14850_v22  ;;  %v14874_v37 = vsub.s32 3, %v14850_v22 }
 0x2af   : > { %12670 = vmatpush3.bf16.msra.mxu1 %v12669_v39 }
 0x2b0   : > { %6334 = vmatpush1.msra.mxu0 %v6052_v48  ;;  %12329 = vmatprep.subr.mxu1 %v15937_v28 }
 0x2b1   : > { %12634 = vmatprep.subr.bf16.mxu0 %v14620_v32  ;;  %6391 = vmatmul.mubr.f32.vlgmr.msra.gmra.mrb[10].mxu0 %v14158_v5  ;;  %v14871_v32 = vld [vmem:[#allocation9 + $0x40] sm:$0x1] }
 0x2b2   : > { %12636 = vmatpush1.bf16.msra.mxu0 %v14638_v25  ;;  %6471 = vmatprep.mubr.f32.mxu0 %v15937_v28  ;;  %vm6999_vm3 = vcmp.gt.f32.partialorder %v14871_v32, 0.5 }
 0x2b3   : > { %12638 = vmatprep.subr.bf16.mxu0 %v14649_v10  ;;  %12330 = vmatpush3.msra.mxu1 %v6590_v21 }
 0x2b4   : > { %12671 = vmatprep.subr.bf16.mxu1 %v15910_v15  ;;  %12332 = vmatmul.mubr.f32.vlgmr.msra.gmra.mrb[10].mxu1 %v14158_v5 }
 0x2b5   : > { %12673 = vmatpush3.bf16.msra.mxu1 %v14644_v4  ;;  %12344 = vmatprep.mubr.msk.f32.mxu1 %vm13418_vm12, %v15937_v28 }
 0x2b6   : > { %12640 = vmatpush1.bf16.msra.mxu0 %v14679_v46  ;;  %12674 = vmatprep.subr.bf16.mxu1 %v15910_v15 }
 0x2b7   : > { %6414 = vmatprep.subr.mxu0 %v14630_v59  ;;  %v14878_v59 = vld [vmem:[#allocation9 + $0x48] sm:$0x1] }
 0x2b8   : > { %vm7000_vm6 = vcmp.gt.f32.partialorder %v14878_v59, 0.5 }
 0x2b9   : > { %12676 = vmatpush3.bf16.msra.mxu1 %v14706_v31  ;;  %v14858_v41 = vpop.permute.xlu1 %4744 }
 0x2ba   : > { %6416 = vmatpush1.msra.mxu0 %v14659_v58  ;;  %12342 = vmatprep.subr.mxu1 %v15937_v28 }
 0x2bb   : > { %6473 = vmatmul.mubr.f32.vlgmr.msra.gmra.mrb[10].mxu0 %v14158_v5  ;;  %12677 = vmatprep.subr.bf16.mxu0 %v15910_v15 }
 0x2bc   : > { %12357 = vmatprep.mubr.msk.f32.mxu0 %vm13418_vm12, %v15937_v28 }
 0x2bd   : > { %12343 = vmatpush3.msra.mxu1 %v14692_v23 }
 0x2be   : > { %12345 = vmatmul.mubr.f32.vlgmr.msra.gmra.mrb[10].mxu1 %v14158_v5  ;;  %12809 = vmatprep.subr.bf16.mxu1 %v15910_v15  ;;  %v14864_v5 = vsub.s32 1, %v14850_v22 }
 0x2bf   : > { %12488 = vmatprep.mubr.msk.f32.mxu1 %vm13418_vm12, %v15937_v28 }
 0x352   : > { %v5336_v25 = vpop.f32.mrb[8].mxu0 }
 0x353   : > { %v12831_v17 = vadd.f32 %v5336_v25, %v14858_v41  ;;  %v5338_v4 = vpop.f32.mrb[9].mxu0 }
 0x354   : > { %v12832_v12 = vadd.f32 %v5338_v4, %v14858_v41 }
 0x355   : > { %v7008_v10 = vrot.slane %v12831_v17, %v14861_v50  ;;  %v7074_v19 = vrot.slane %v12831_v17, %v14864_v5  ;;  %v7139_v34 = vrot.slane %v12831_v17, %v14867_v61  ;;  %v14896_v58 = vrot.slane %v12831_v17, %v14874_v37  ;;  %v5905_v38 = vpop.f32.mrb[8].mxu1 }
 0x356   : > { %v7012_v45 = vrot.slane %v12832_v12, %v14861_v50  ;;  %v12833_v52 = vadd.f32 %v5905_v38, %v14858_v41  ;;  %v5907_v46 = vpop.f32.mrb[9].mxu1  ;;  %v7143_v63 = vrot.slane %v12832_v12, %v14867_v61  ;;  %v7078_v23 = vrot.slane %v12832_v12, %v14864_v5 }
 0x357   : > { %v12834_v29 = vadd.f32 %v5907_v46, %v14858_v41  ;;  %v14905_v47 = vsel %vm6991_vm13, %v7139_v34, -1e+30  ;;  %v14909_v31 = vsel %vm6991_vm13, %v7074_v19, -1e+30  ;;  %v7040_v24 = vsel %vm6998_vm15, %v7008_v10, -1e+30 }
 0x358   : > { %v7016_v26 = vrot.slane %v12833_v52, %v14861_v50  ;;  %v7082_v40 = vrot.slane %v12833_v52, %v14864_v5  ;;  %v7147_v48 = vrot.slane %v12833_v52, %v14867_v61  ;;  %v7212_v36 = vrot.slane %v12833_v52, %v14874_v37 }
 0x359   : > { %v7020_v18 = vrot.slane %v12834_v29, %v14861_v50  ;;  %v7151_v9 = vrot.slane %v12834_v29, %v14867_v61  ;;  %v14921_v55 = vsel %vm6992_vm14, %v7143_v63, -1e+30  ;;  %v7086_v14 = vrot.slane %v12834_v29, %v14864_v5 }
 0x35a   : > { %v14926_v21 = vsel %vm6993_vm0, %v7147_v48, -1e+30  ;;  %v14930_v56 = vsel %vm6992_vm14, %v7078_v23, -1e+30  ;;  %v14934_v33 = vsel %vm6993_vm0, %v7082_v40, -1e+30  ;;  %v7208_v0 = vrot.slane %v12832_v12, %v14874_v37 }
 0x35b   : > { %v14939_v43 = vsel %vm6994_vm5, %v7151_v9, -1e+30  ;;  %v7178_v44 = vmax.f32 %v14905_v47, %v14926_v21  ;;  %v14945_v8 = vsel %vm6994_vm5, %v7086_v14, -1e+30  ;;  %v7041_v1 = vsel %vm6999_vm3, %v7012_v45, -1e+30 }
 0x35c   : > { %v7179_v57 = vmax.f32 %v14921_v55, %v14939_v43  ;;  %v7042_v3 = vsel %vm7000_vm6, %v7016_v26, -1e+30  ;;  %v7043_v27 = vsel %vm7001_vm7, %v7020_v18, -1e+30  ;;  %v14960_v49 = vsel %vm7055_vm4, %v7040_v24, -inf }
 0x35d   : > { %v14963_v53 = vsel %vm7055_vm4, %v7041_v1, -inf  ;;  %v14966_v30 = vsel %vm7055_vm4, %v7042_v3, -inf  ;;  %v14971_v20 = vsel %vm7055_vm4, %v7043_v27, -inf  ;;  %v14975_v42 = vsel %vm6991_vm13, %v7008_v10, -1e+30 }
 0x35e   : > { %v14979_v35 = vsel %vm6992_vm14, %v7012_v45, -1e+30  ;;  %v14985_v25 = vsel %vm6993_vm0, %v7016_v26, -1e+30  ;;  %v14989_v17 = vsel %vm6994_vm5, %v7020_v18, -1e+30  ;;  %v7216_v4 = vrot.slane %v12834_v29, %v14874_v37 }
 0x35f   : > { %v14999_v38 = vsel %vm6991_vm13, %v14896_v58, -1e+30  ;;  %v15003_v45 = vsel %vm6992_vm14, %v7208_v0, -1e+30  ;;  %v15007_v52 = vsel %vm6993_vm0, %v7212_v36, -1e+30  ;;  %v15966_v28 = vmax.f32 %v14909_v31, %v14934_v33 }
 0x360   : > { %v15011_v46 = vsel %vm6994_vm5, %v7216_v4, -1e+30  ;;  %v7106_v29 = vsel %vm6998_vm15, %v7074_v19, -1e+30  ;;  %v7107_v2 = vsel %vm6999_vm3, %v7078_v23, -1e+30  ;;  %v15968_v31 = vmax.f32 %v14960_v49, %v14966_v30 }
 0x361   : > { %v7108_v54 = vsel %vm7000_vm6, %v7082_v40, -1e+30  ;;  %v7109_v51 = vsel %vm7001_vm7, %v7086_v14, -1e+30  ;;  %v15026_v26 = vsel %vm7055_vm4, %v7106_v29, -inf  ;;  %v15029_v19 = vsel %vm7055_vm4, %v7107_v2, -inf }
 0x362   : > { %v15032_v18 = vsel %vm7055_vm4, %v7108_v54, -inf  ;;  %v15037_v23 = vsel %vm7055_vm4, %v7109_v51, -inf  ;;  %v7171_v40 = vsel %vm6998_vm15, %v7139_v34, -1e+30  ;;  %v7172_v14 = vsel %vm6999_vm3, %v7143_v63, -1e+30 }
 0x363   : > { %v7173_v27 = vsel %vm7000_vm6, %v7147_v48, -1e+30  ;;  %v7174_v29 = vsel %vm7001_vm7, %v7151_v9, -1e+30  ;;  %v15050_v2 = vsel %vm7055_vm4, %v7171_v40, -inf  ;;  %v15053_v54 = vsel %vm7055_vm4, %v7172_v14, -inf }
 0x364   : > { %v15056_v34 = vsel %vm7055_vm4, %v7173_v27, -inf  ;;  %v15059_v63 = vsel %vm7055_vm4, %v7174_v29, -inf  ;;  %v7236_v51 = vsel %vm6998_vm15, %v14896_v58, -1e+30  ;;  %v7237_v40 = vsel %vm6999_vm3, %v7208_v0, -1e+30 }
 0x365   : > { %v7238_v14 = vsel %vm7000_vm6, %v7212_v36, -1e+30  ;;  %v7239_v27 = vsel %vm7001_vm7, %v7216_v4, -1e+30  ;;  %v15075_v29 = vsel %vm7055_vm4, %v7236_v51, -inf  ;;  %v15081_v58 = vsel %vm7055_vm4, %v7237_v40, -inf }
 0x366   : > { %v15078_v6 = vsel %vm7055_vm4, %v7238_v14, -inf  ;;  %v15086_v32 = vsel %vm7055_vm4, %v7239_v27, -inf  ;;  %v6982_v36 = vld [vmem:[#allocation9 + $0x28] sm:$0xff]  ;;  %v15090_v0 = vld [vmem:[#allocation9 + $0x30] sm:$0xff]  ;;  %v15092_v4 = vld [vmem:[#allocation9 + $0x58] sm:$0x1]  ;;  %v15970_v49 = vmax.f32 %v14975_v42, %v14985_v25  ;;  %v15972_v42 = vmax.f32 %v14999_v38, %v15007_v52 }
 0x367   : > { %15965 = vst [vmem:[#allocation18_spill] sm:$0xff] %v15086_v32  ;;  %v15094_v51 = vld [vmem:[#allocation9 + $0x60] sm:$0x1]  ;;  %v15096_v14 = vld [vmem:[#allocation9 + $0x68] sm:$0x1]  ;;  %vm6996_vm10 = vcmp.gt.f32.partialorder %v6982_v36, 0.5 }
 0x368   : > { %vm6997_vm11 = vcmp.gt.f32.partialorder %v15090_v0, 0.5  ;;  %vm7002_vm13 = vcmp.gt.f32.partialorder %v15092_v4, 0.5  ;;  %vm7003_vm14 = vcmp.gt.f32.partialorder %v15094_v51, 0.5  ;;  %vm7004_vm15 = vcmp.gt.f32.partialorder %v15096_v14, 0.5 }
 0x369   : > { %vm7275_vm0 = vcmask 1041408   ;;  %vm7283_vm3 = vcmask 1042432  }
 0x36e   : > { %v15979_v4 = vld [vmem:[#allocation18_spill] sm:$0xff] }
 0x38e   : > { %v6474_v40 = vpop.f32.mrb[10].mxu0 }
 0x38f   : > { %v12835_v15 = vadd.f32 %v6474_v40, %v14858_v41  ;;  %v6476_v62 = vpop.f32.mrb[11].mxu0 }
 0x390   : > { %v12836_v27 = vadd.f32 %v6476_v62, %v14858_v41 }
 0x391   : > { %v7024_v59 = vrot.slane %v12835_v15, %v14861_v50  ;;  %v6973_v9 = vpop.f32.mrb[10].mxu1  ;;  %v7155_v48 = vrot.slane %v12835_v15, %v14867_v61  ;;  %v7090_v40 = vrot.slane %v12835_v15, %v14864_v5  ;;  %v15108_v3 = vrot.slane %v12835_v15, %v14874_v37 }
 0x392   : > { %v12837_v1 = vadd.f32 %v6973_v9, %v14858_v41  ;;  %v12346_v24 = vpop.f32.mrb[11].mxu1  ;;  %v7159_v62 = vrot.slane %v12836_v27, %v14867_v61  ;;  %v7094_v13 = vrot.slane %v12836_v27, %v14864_v5  ;;  %v7028_v10 = vrot.slane %v12836_v27, %v14861_v50 }
 0x393   : > { %v7168_v12 = vsel %vm6995_vm9, %v7155_v48, -1e+30  ;;  %v7103_v39 = vsel %vm6995_vm9, %v7090_v40, -1e+30  ;;  %v7044_v60 = vsel %vm7002_vm13, %v7024_v59, -1e+30  ;;  %v7224_v16 = vrot.slane %v12836_v27, %v14874_v37 }
 0x394   : > { %v7163_v15 = vrot.slane %v12837_v1, %v14867_v61  ;;  %v7169_v41 = vsel %vm6996_vm10, %v7159_v62, -1e+30  ;;  %v7180_v24 = vmax.f32 %v7178_v44, %v7168_v12  ;;  %v7098_v9 = vrot.slane %v12837_v1, %v14864_v5 }
 0x395   : > { %v7181_v11 = vmax.f32 %v7179_v57, %v7169_v41  ;;  %v7104_v22 = vsel %vm6996_vm10, %v7094_v13, -1e+30  ;;  %v7115_v27 = vmax.f32 %v15966_v28, %v7103_v39  ;;  %v7032_v61 = vrot.slane %v12837_v1, %v14861_v50 }
 0x396   : > { %v7170_v32 = vsel %vm6997_vm11, %v7163_v15, -1e+30  ;;  %v7105_v47 = vsel %vm6997_vm11, %v7098_v9, -1e+30  ;;  %v15967_v5 = vmax.f32 %v14930_v56, %v14945_v8  ;;  %v7045_v55 = vsel %vm7003_vm14, %v7028_v10, -1e+30 }
 0x397   : > { %v7182_v43 = vmax.f32 %v7180_v24, %v7170_v32  ;;  %v7117_v44 = vmax.f32 %v7115_v27, %v7105_v47  ;;  %v7046_v28 = vsel %vm7004_vm15, %v7032_v61, -1e+30  ;;  %v7062_v50 = vsel %vm7055_vm4, %v7044_v60, -inf }
 0x398   : > { %v7116_v21 = vmax.f32 %v15967_v5, %v7104_v22  ;;  %v7063_v33 = vmax.f32 %v15968_v31, %v7062_v50  ;;  %v7064_v57 = vsel %vm7055_vm4, %v7045_v55, -inf  ;;  %v7066_v39 = vsel %vm7055_vm4, %v7046_v28, -inf }
 0x399   : > { %v7037_v22 = vsel %vm6995_vm9, %v7024_v59, -1e+30  ;;  %v7183_v56 = vmax.f32 %v7182_v43, %v7181_v11  ;;  %v15969_v12 = vmax.f32 %v14963_v53, %v14971_v20  ;;  %v7038_v41 = vsel %vm6996_vm10, %v7028_v10, -1e+30 }
 0x39a   : > { %v7118_v8 = vmax.f32 %v7117_v44, %v7116_v21  ;;  %v7067_v24 = vmax.f32 %v7063_v33, %v7066_v39  ;;  %v7039_v60 = vsel %vm6997_vm11, %v7032_v61, -1e+30  ;;  %v7049_v30 = vmax.f32 %v15970_v49, %v7037_v22 }
 0x39b   : > { %v7065_v32 = vmax.f32 %v15969_v12, %v7064_v57  ;;  %v15971_v27 = vmax.f32 %v14979_v35, %v14989_v17  ;;  %7184 = vmax.xlane.f32.xlu1 %v7183_v56  ;;  %v7228_v11 = vrot.slane %v12837_v1, %v14874_v37  ;;  %v7233_v53 = vsel %vm6995_vm9, %v15108_v3, -1e+30  ;;  %v7291_v12 = vld [vmem:[%s15872_s9] sm:$0xff] }
 0x39c   : > { %7119 = vmax.xlane.f32.xlu0 %v7118_v8  ;;  %v7234_v20 = vsel %vm6996_vm10, %v7224_v16, -1e+30  ;;  %v7110_v10 = vsel %vm7002_vm13, %v7090_v40, -1e+30  ;;  %v7051_v47 = vmax.f32 %v7049_v30, %v7039_v60  ;;  %v7245_v25 = vmax.f32 %v15972_v42, %v7233_v53  ;;  %v7292_v30 = vld [vmem:[%s15872_s9 + $0x8] sm:$0xff]  ;;  %v7293_v42 = vld [vmem:[%s15872_s9 + $0x10] sm:$0xff] }
 0x39d   : > { %v7050_v59 = vmax.f32 %v15971_v27, %v7038_v41  ;;  %v7068_v61 = vmax.f32 %v7067_v24, %v7065_v32  ;;  %v15973_v35 = vmax.f32 %v15003_v45, %v15011_v46  ;;  %v7235_v37 = vsel %vm6997_vm11, %v7228_v11, -1e+30 }
 0x39e   : > { %v7111_v1 = vsel %vm7003_vm14, %v7094_v13, -1e+30  ;;  %v7112_v7 = vsel %vm7004_vm15, %v7098_v9, -1e+30  ;;  %v7247_v40 = vmax.f32 %v7245_v25, %v7235_v37  ;;  %v7127_v5 = vsel %vm7055_vm4, %v7110_v10, -inf }
 0x39f   : > { %v7246_v17 = vmax.f32 %v15973_v35, %v7234_v20  ;;  %v7052_v36 = vmax.f32 %v7051_v47, %v7050_v59  ;;  %v7129_v38 = vsel %vm7055_vm4, %v7111_v1, -inf  ;;  %7069 = vmax.xlane.f32.xlu1 %v7068_v61  ;;  %v15974_v45 = vmax.f32 %v15026_v26, %v15032_v18 }
 0x3a0   : > { %v15975_v46 = vmax.f32 %v15029_v19, %v15037_v23  ;;  %v7131_v13 = vsel %vm7055_vm4, %v7112_v7, -inf  ;;  %v7175_v9 = vsel %vm7002_vm13, %v7155_v48, -1e+30  ;;  %v7176_v55 = vsel %vm7003_vm14, %v7159_v62, -1e+30 }
 0x3a1   : > { %v7128_v52 = vmax.f32 %v15974_v45, %v7127_v5  ;;  %7053 = vmax.xlane.f32.xlu0 %v7052_v36  ;;  %v7248_v21 = vmax.f32 %v7247_v40, %v7246_v17  ;;  %v7177_v43 = vsel %vm7004_vm15, %v7163_v15, -1e+30  ;;  %v7192_v26 = vsel %vm7055_vm4, %v7175_v9, -inf }
 0x3a2   : > { %v7130_v0 = vmax.f32 %v15975_v46, %v7129_v38  ;;  %v15976_v19 = vmax.f32 %v15050_v2, %v15056_v34  ;;  %v7194_v44 = vsel %vm7055_vm4, %v7176_v55, -inf  ;;  %v7196_v28 = vsel %vm7055_vm4, %v7177_v43, -inf }
 0x3a3   : > { %v7132_v18 = vmax.f32 %v7128_v52, %v7131_v13  ;;  %v15977_v48 = vmax.f32 %v15053_v54, %v15059_v63  ;;  %v7240_v62 = vsel %vm7002_vm13, %v15108_v3, -1e+30  ;;  %v7241_v15 = vsel %vm7003_vm14, %v7224_v16, -1e+30  ;;  %7249 = vmax.xlane.f32.xlu1 %v7248_v21  ;;  %v7294_v52 = vld [vmem:[%s15872_s9 + $0x18] sm:$0xff] }
 0x3a4   : > { %v7193_v23 = vmax.f32 %v15976_v19, %v7192_v26  ;;  %v7242_v31 = vsel %vm7004_vm15, %v7228_v11, -1e+30  ;;  %v7257_v33 = vsel %vm7055_vm4, %v7240_v62, -inf  ;;  %v7259_v57 = vsel %vm7055_vm4, %v7241_v15, -inf }
 0x3a5   : > { %v7195_v50 = vmax.f32 %v15977_v48, %v7194_v44  ;;  %v7133_v2 = vmax.f32 %v7132_v18, %v7130_v0  ;;  %v15978_v54 = vmax.f32 %v15075_v29, %v15078_v6  ;;  %v15980_v3 = vmax.f32 %v15081_v58, %v15979_v4  ;;  %v7295_v18 = vld [vmem:[%s15872_s9 + $0x20] sm:$0xf] }
 0x3a6   : > { %v7197_v34 = vmax.f32 %v7193_v23, %v7196_v28  ;;  %v7261_v16 = vsel %vm7055_vm4, %v7242_v31, -inf  ;;  %v7302_v6 = vsel %vm4747_vm8, %v7291_v12, 0  ;;  %v7305_v53 = vsel %vm4747_vm8, %v7292_v30, 0 }
 0x3a7   : > { %v7258_v63 = vmax.f32 %v15978_v54, %v7257_v33  ;;  %v7260_v39 = vmax.f32 %v15980_v3, %v7259_v57  ;;  %7134 = vmax.xlane.f32.xlu0 %v7133_v2  ;;  %v15226_v49 = vand.u32 4294901760, %v7302_v6  ;;  %v15981_v35 = vmov 0.0|0.0  }
 0x3a8   : > { %v7198_v51 = vmax.f32 %v7197_v34, %v7195_v50  ;;  %v15250_v37 = vand.u32 4294901760, %v7305_v53  ;;  %v7308_v40 = vsel %vm4747_vm8, %v7293_v42, 0  ;;  %v7311_v26 = vsel %vm4747_vm8, %v7294_v52, 0 }
 0x3a9   : > { %v7262_v14 = vmax.f32 %v7258_v63, %v7261_v16  ;;  %v15243_v47 = vsub.f32 %v7302_v6, %v15226_v49  ;;  %v15264_v21 = vand.u32 4294901760, %v7308_v40  ;;  %v15283_v2 = vand.u32 4294901760, %v7311_v26 }
 0x3aa   : > { %v15262_v9 = vsub.f32 %v7305_v53, %v15250_v37  ;;  %v7314_v34 = vsel %vm4747_vm8, %v7295_v18, 0  ;;  %vm8048_vm10 = vcmask 289792  }
 0x3ab   : > { %v7263_v22 = vmax.f32 %v7262_v14, %v7260_v39  ;;  %7199 = vmax.xlane.f32.xlu0 %v7198_v51  ;;  %v7390_v45 = vand.u32 4294901760, %v15243_v47  ;;  %v15281_v31 = vsub.f32 %v7308_v40, %v15264_v21  ;;  %v15305_v12 = vsub.f32 %v7311_v26, %v15283_v2 }
 0x3ac   : > { %v7400_v15 = vand.u32 4294901760, %v15262_v9 }
 0x3ad   : > { %v7391_v44 = vsub.f32 %v15243_v47, %v7390_v45 }
 0x3af   : > { %7264 = vmax.xlane.f32.xlu0 %v7263_v22  ;;  %v7392_v3 = vand.u32 4294901760, %v7391_v44  ;;  %v15982_v22 = vmov 0.0  }
 0x428   : > { %v7185_v56 = vpop.xlane.xlu1 %7184 }
 0x429   : > { %v7120_v8 = vpop.xlane.xlu0 %7119  ;;  %v7276_v17 = vrot.slane %v7185_v56, 6  ;;  %v7401_v56 = vsub.f32 %v15262_v9, %v7400_v15 }
 0x42a   : > { %v7268_v29 = vrot.slane %v7120_v8, 7  ;;  %v7410_v8 = vand.u32 4294901760, %v15281_v31 }
 0x42b   : > { %v7402_v53 = vand.u32 4294901760, %v7401_v56 }
 0x42c   : > { %v7070_v32 = vpop.xlane.xlu1 %7069 }
 0x42d   : > { %v7288_v58 = vsel %vm7055_vm4, %v7070_v32, %v7268_v29 }
 0x42e   : > { %v7054_v41 = vpop.xlane.xlu0 %7053  ;;  %v7322_v24 = vand.u32 4294901760, %v7288_v58 }
 0x42f   : > { %v7319_v60 = vand.u32 4294901760, %v7054_v41 }
 0x430   : > { %v15231_v27 = vsub.f32 %v7288_v58, %v7322_v24  ;;  %v7250_v7 = vpop.xlane.xlu1 %7249 }
 0x431   : > { %v15233_v59 = vpack.c.bf16 %v7322_v24, %v7319_v60  ;;  %v15235_v11 = vsub.f32 %v7054_v41, %v7319_v60  ;;  %v7284_v13 = vrot.slane %v7250_v7, 5 }
 0x432   : > { %v7448_v20 = vand.u32 4294901760, %v15231_v27 }
 0x433   : > { %v7441_v10 = vand.u32 4294901760, %v15235_v11  ;;  %12679 = vmatpush3.bf16.msra.mxu0 %v15233_v59  ;;  %12812 = vmatpush3.bf16.msra.mxu1 %v15233_v59 }
 0x434   : > { %v7135_v61 = vpop.xlane.xlu0 %7134  ;;  %12680 = vmatprep.subr.bf16.mxu0 %v15981_v35  ;;  %12810 = vmatprep.subr.bf16.mxu1 %v15981_v35  ;;  %v7449_v28 = vsub.f32 %v15231_v27, %v7448_v20 }
 0x435   : > { %v7269_v25 = vrot.slane %v7135_v61, 7  ;;  %v15252_v1 = vpack.c.bf16 %v7448_v20, %v7441_v10  ;;  %v7442_v48 = vsub.f32 %v15235_v11, %v7441_v10  ;;  %v7411_v20 = vsub.f32 %v15281_v31, %v7410_v8 }
 0x436   : > { %v7450_v39 = vand.u32 4294901760, %v7449_v28  ;;  %v7420_v10 = vand.u32 4294901760, %v15305_v12 }
 0x437   : > { %v7270_v36 = vsel %vm7055_vm4, %v7268_v29, %v7269_v25  ;;  %v7443_v16 = vand.u32 4294901760, %v7442_v48  ;;  %v15307_v29 = vand.u32 4294901760, %v7314_v34  ;;  %v7412_v7 = vand.u32 4294901760, %v7411_v20 }
 0x438   : > { %v7289_v5 = vsel %vm7275_vm0, %v7270_v36, %v7276_v17  ;;  %v7200_v38 = vpop.xlane.xlu0 %7199  ;;  %v7421_v36 = vsub.f32 %v15305_v12, %v7420_v10 }
 0x439   : > { %v7325_v46 = vand.u32 4294901760, %v7289_v5  ;;  %v7277_v0 = vrot.slane %v7200_v38, 6  ;;  %v12684_v24 = vpack.c.bf16 %v7450_v39, %v7443_v16  ;;  %v15325_v61 = vsub.f32 %v7314_v34, %v15307_v29  ;;  %v7297_v34 = vld [vmem:[%s15873_s10 + $0x8] sm:$0xff] }
 0x43a   : > { %v7422_v38 = vand.u32 4294901760, %v7421_v36 }
 0x43b   : > { %v15266_v55 = vsub.f32 %v7289_v5, %v7325_v46  ;;  %v7278_v43 = vsel %vm7275_vm0, %v7276_v17, %v7277_v0  ;;  %v7430_v40 = vand.u32 4294901760, %v15325_v61  ;;  %v12690_v0 = vpack.c.bf16 %v15231_v27, %v15235_v11 }
 0x43c   : > { %v7290_v19 = vsel %vm7283_vm3, %v7278_v43, %v7284_v13  ;;  %v7265_v23 = vpop.xlane.xlu0 %7264 }
 0x43d   : > { %v7328_v50 = vand.u32 4294901760, %v7290_v19  ;;  %v7285_v62 = vrot.slane %v7265_v23, 5  ;;  %v7455_v63 = vand.u32 4294901760, %v15266_v55  ;;  %v7431_v52 = vsub.f32 %v15325_v61, %v7430_v40 }
 0x43f   : > { %v15286_v33 = vsub.f32 %v7290_v19, %v7328_v50  ;;  %v7286_v57 = vsel %vm7283_vm3, %v7284_v13, %v7285_v62  ;;  %v15289_v54 = vpack.c.bf16 %v7328_v50, %v7325_v46  ;;  %v7456_v32 = vsub.f32 %v15266_v55, %v7455_v63  ;;  %v7300_v19 = vld [vmem:[%s15873_s10 + $0x20] sm:$0xf] }
 0x440   : > { %v7316_v4 = vsel %vm2408_vm2, %v7286_v57, 0  ;;  %v7432_v46 = vand.u32 4294901760, %v7431_v52  ;;  %v7296_v50 = vld [vmem:[%s15873_s10] sm:$0xff] }
 0x441   : > { %v15293_v51 = vand.u32 4294901760, %v7316_v4  ;;  %12682 = vmatpush3.bf16.msra.mxu0 %v15289_v54  ;;  %12813 = vmatpush3.bf16.msra.mxu1 %v15289_v54  ;;  %v7462_v14 = vand.u32 4294901760, %v15286_v33  ;;  %v7457_v42 = vand.u32 4294901760, %v7456_v32  ;;  %v12693_v13 = vpack.c.bf16 %v15286_v33, %v15266_v55  ;;  %v7299_v55 = vld [vmem:[%s15873_s10 + $0x18] sm:$0xff] }
 0x442   : > { %12355 = vmatprep.subr.mxu0 %v15982_v22  ;;  %12811 = vmatprep.subr.mxu1 %v15982_v22 }
 0x443   : > { %v15310_v6 = vsub.f32 %v7316_v4, %v15293_v51  ;;  %v7463_v58 = vsub.f32 %v15286_v33, %v7462_v14  ;;  %v15314_v41 = vpack.c.bf16 %v7462_v14, %v7455_v63  ;;  %v15983_v63 = vlaneseq }
 0x445   : > { %12356 = vmatpush3.msra.mxu0 %v15293_v51  ;;  %12814 = vmatpush3.msra.mxu1 %v15293_v51  ;;  %v7464_v60 = vand.u32 4294901760, %v7463_v58  ;;  %v7469_v30 = vand.u32 4294901760, %v15310_v6  ;;  %v7995_v4 = vand.u32 127, %v15983_v63 }
 0x446   : > { %12358 = vmatmul.mubr.f32.vlgmr.msra.gmra.mrb[12].mxu0 %v7392_v3  ;;  %12683 = vmatprep.subr.bf16.mxu0 %v15981_v35  ;;  %v15984_v3 = vld [vmem:[#allocation19_spill] sm:$0xff] }
 0x447   : > { %12685 = vmatpush3.bf16.msra.mxu0 %v12684_v24  ;;  %12360 = vmatprep.mubr.msk.f32.mxu0 %vm13418_vm12, %v15982_v22  ;;  %v12687_v25 = vpack.c.bf16 %v7464_v60, %v7457_v42  ;;  %v7470_v17 = vsub.f32 %v15310_v6, %v7469_v30  ;;  %v7991_v39 = vadd.s32 16, %v15984_v3  ;;  %v7990_v16 = vadd.s32 8, %v15984_v3 }
 0x448   : > { %12686 = vmatprep.subr.bf16.mxu0 %v15981_v35  ;;  %12489 = vmatmul.mubr.f32.vlgmr.msra.gmra.mrb[12].mxu1 %v15264_v21  ;;  %v7993_v14 = vadd.s32 32, %v15984_v3 }
 0x449   : > { %12491 = vmatprep.mubr.msk.f32.mxu1 %vm13418_vm12, %v15982_v22  ;;  %v7471_v5 = vand.u32 4294901760, %v7470_v17  ;;  %vm7998_vm5 = vcmp.eq.s32.totalorder %v7991_v39, %v7995_v4  ;;  %vm7997_vm6 = vcmp.eq.s32.totalorder %v7990_v16, %v7995_v4 }
 0x44a   : > { %12361 = vmatmul.mubr.f32.gmra.mrb[14].mxu0 %v7402_v53  ;;  %vm8000_vm9 = vcmp.eq.s32.totalorder %v7993_v14, %v7995_v4 }
 0x44b   : > { %12688 = vmatpush3.bf16.msra.mxu0 %v12687_v25  ;;  %12363 = vmatprep.mubr.msk.f32.mxu0 %vm13418_vm12, %v15982_v22 }
 0x44c   : > { %12380 = vmatprep.subr.mxu0 %v15982_v22  ;;  %12492 = vmatmul.mubr.f32.gmra.mrb[14].mxu1 %v15283_v2 }
 0x44d   : > { %12494 = vmatprep.mubr.msk.f32.mxu1 %vm13418_vm12, %v15982_v22 }
 0x44e   : > { %12364 = vmatmul.mubr.f32.gmra.mrb[16].mxu0 %v7412_v7 }
 0x44f   : > { %12381 = vmatpush3.msra.mxu0 %v7471_v5  ;;  %12366 = vmatprep.mubr.msk.f32.mxu0 %vm13418_vm12, %v15982_v22 }
 0x450   : > { %12689 = vmatprep.subr.bf16.mxu0 %v15981_v35  ;;  %12495 = vmatmul.mubr.f32.gmra.mrb[16].mxu1 %v15307_v29 }
 0x451   : > { %8674 = vmatprep.mubr.f32.mxu1 %v15982_v22 }
 0x452   : > { %12367 = vmatmul.mubr.f32.gmra.mrb[18].mxu0 %v7422_v38 }
 0x453   : > { %12369 = vmatprep.mubr.msk.f32.mxu0 %vm13418_vm12, %v15982_v22 }
 0x456   : > { %12370 = vmatmul.mubr.f32.gmra.mrb[20].mxu0 %v7432_v46 }
 0x457   : > { %12382 = vmatprep.mubr.msk.f32.mxu0 %vm13418_vm12, %v15982_v22 }
 0x45a   : > { %12383 = vmatmul.mubr.f32.vlgmr.msra.gmra.mrb[12].mxu0 %v15226_v49 }
 0x45b   : > { %12691 = vmatpush3.bf16.msra.mxu0 %v12690_v0  ;;  %12385 = vmatprep.mubr.msk.f32.mxu0 %vm13418_vm12, %v15982_v22 }
 0x45c   : > { %12692 = vmatprep.subr.bf16.mxu0 %v15981_v35 }
 0x45e   : > { %12386 = vmatmul.mubr.f32.gmra.mrb[14].mxu0 %v15250_v37 }
 0x45f   : > { %12694 = vmatpush3.bf16.msra.mxu0 %v12693_v13  ;;  %12388 = vmatprep.mubr.msk.f32.mxu0 %vm13418_vm12, %v15982_v22 }
 0x460   : > { %12405 = vmatprep.subr.mxu0 %v15982_v22 }
 0x462   : > { %12389 = vmatmul.mubr.f32.gmra.mrb[16].mxu0 %v15264_v21 }
 0x463   : > { %12406 = vmatpush3.msra.mxu0 %v15310_v6  ;;  %12391 = vmatprep.mubr.msk.f32.mxu0 %vm13418_vm12, %v15982_v22 }
 0x464   : > { %12695 = vmatprep.subr.bf16.mxu0 %v15981_v35 }
 0x466   : > { %12392 = vmatmul.mubr.f32.gmra.mrb[18].mxu0 %v15283_v2 }
 0x467   : > { %12394 = vmatprep.mubr.msk.f32.mxu0 %vm13418_vm12, %v15982_v22 }
 0x46a   : > { %12395 = vmatmul.mubr.f32.gmra.mrb[20].mxu0 %v15307_v29 }
 0x46b   : > { %12407 = vmatprep.mubr.msk.f32.mxu0 %vm13418_vm12, %v15982_v22 }
 0x46e   : > { %12408 = vmatmul.mubr.f32.vlgmr.msra.gmra.mrb[12].mxu0 %v15243_v47 }
 0x46f   : > { %12697 = vmatpush3.bf16.msra.mxu0 %v15233_v59  ;;  %12410 = vmatprep.mubr.msk.f32.mxu0 %vm13418_vm12, %v15982_v22 }
 0x470   : > { %12698 = vmatprep.subr.bf16.mxu0 %v15981_v35 }
 0x472   : > { %12411 = vmatmul.mubr.f32.gmra.mrb[14].mxu0 %v15262_v9 }
 0x473   : > { %12700 = vmatpush3.bf16.msra.mxu0 %v15289_v54  ;;  %12413 = vmatprep.mubr.msk.f32.mxu0 %vm13418_vm12, %v15982_v22 }
 0x474   : > { %12430 = vmatprep.subr.mxu0 %v15982_v22 }
 0x476   : > { %12414 = vmatmul.mubr.f32.gmra.mrb[16].mxu0 %v15281_v31 }
 0x477   : > { %12431 = vmatpush3.msra.mxu0 %v15293_v51  ;;  %12416 = vmatprep.mubr.msk.f32.mxu0 %vm13418_vm12, %v15982_v22 }
 0x478   : > { %12701 = vmatprep.subr.bf16.mxu0 %v15981_v35 }
 0x47a   : > { %12417 = vmatmul.mubr.f32.gmra.mrb[18].mxu0 %v15305_v12  ;;  %v12155_v12 = vsel %vm7998_vm5, 1.0, %v15982_v22 }
 0x47b   : > { %12419 = vmatprep.mubr.msk.f32.mxu0 %vm13418_vm12, %v15982_v22 }
 0x47e   : > { %12420 = vmatmul.mubr.f32.gmra.mrb[20].mxu0 %v15325_v61 }
 0x47f   : > { %12432 = vmatprep.mubr.msk.f32.mxu0 %vm13418_vm12, %v15982_v22 }
 0x482   : > { %12433 = vmatmul.mubr.f32.vlgmr.msra.gmra.mrb[12].mxu0 %v7390_v45  ;;  %v7298_v45 = vld [vmem:[%s15873_s10 + $0x10] sm:$0xff] }
 0x483   : > { %12703 = vmatpush3.bf16.msra.mxu0 %v15252_v1  ;;  %12435 = vmatprep.mubr.msk.f32.mxu0 %vm13418_vm12, %v15982_v22 }
 0x484   : > { %12704 = vmatprep.subr.bf16.mxu0 %v15981_v35 }
 0x486   : > { %12436 = vmatmul.mubr.f32.gmra.mrb[14].mxu0 %v7400_v15 }
 0x487   : > { %12706 = vmatpush3.bf16.msra.mxu0 %v15314_v41  ;;  %12438 = vmatprep.mubr.msk.f32.mxu0 %vm13418_vm12, %v15982_v22 }
 0x488   : > { %12455 = vmatprep.subr.mxu0 %v15982_v22 }
 0x48a   : > { %12439 = vmatmul.mubr.f32.gmra.mrb[16].mxu0 %v7410_v8 }
 0x48b   : > { %12456 = vmatpush3.msra.mxu0 %v7469_v30  ;;  %12441 = vmatprep.mubr.msk.f32.mxu0 %vm13418_vm12, %v15982_v22  ;;  %v12157_v30 = vsel %vm8000_vm9, 1.0, %v15982_v22 }
 0x48c   : > { %12707 = vmatprep.subr.bf16.mxu0 %v15981_v35 }
 0x48e   : > { %12442 = vmatmul.mubr.f32.gmra.mrb[18].mxu0 %v7420_v10 }
 0x48f   : > { %12444 = vmatprep.mubr.msk.f32.mxu0 %vm13418_vm12, %v15982_v22 }
 0x492   : > { %12445 = vmatmul.mubr.f32.gmra.mrb[20].mxu0 %v7430_v40 }
 0x493   : > { %12457 = vmatprep.mubr.msk.f32.mxu0 %vm13418_vm12, %v15982_v22 }
 0x496   : > { %12458 = vmatmul.mubr.f32.vlgmr.msra.gmra.mrb[12].mxu0 %v15226_v49 }
 0x497   : > { %12709 = vmatpush3.bf16.msra.mxu0 %v15233_v59  ;;  %12460 = vmatprep.mubr.msk.f32.mxu0 %vm13418_vm12, %v15982_v22 }
 0x498   : > { %12710 = vmatprep.subr.bf16.mxu0 %v15981_v35 }
 0x49a   : > { %12461 = vmatmul.mubr.f32.gmra.mrb[14].mxu0 %v15250_v37 }
 0x49b   : > { %12712 = vmatpush3.bf16.msra.mxu0 %v15289_v54  ;;  %12463 = vmatprep.mubr.msk.f32.mxu0 %vm13418_vm12, %v15982_v22 }
 0x49c   : > { %12480 = vmatprep.subr.mxu0 %v15982_v22 }
 0x49e   : > { %12464 = vmatmul.mubr.f32.gmra.mrb[16].mxu0 %v15264_v21 }
 0x49f   : > { %12481 = vmatpush3.msra.mxu0 %v15293_v51  ;;  %12466 = vmatprep.mubr.msk.f32.mxu0 %vm13418_vm12, %v15982_v22  ;;  %v7992_v51 = vadd.s32 24, %v15984_v3 }
 0x4a1   : > { %vm7999_vm7 = vcmp.eq.s32.totalorder %v7992_v51, %v7995_v4 }
 0x4a2   : > { %12467 = vmatmul.mubr.f32.gmra.mrb[18].mxu0 %v15283_v2  ;;  %v12156_v60 = vsel %vm7999_vm7, 1.0, %v15982_v22 }
 0x4a3   : > { %12469 = vmatprep.mubr.msk.f32.mxu0 %vm13418_vm12, %v15982_v22 }
 0x4a6   : > { %12470 = vmatmul.mubr.f32.gmra.mrb[20].mxu0 %v15307_v29  ;;  %v12154_v29 = vsel %vm7997_vm6, 1.0, %v15982_v22 }
 0x4a7   : > { %12482 = vmatprep.mubr.msk.f32.mxu0 %vm13418_vm12, %v15982_v22 }
 0x4aa   : > { %12483 = vmatmul.mubr.f32.vlgmr.msra.gmra.mrb[12].mxu0 %v15226_v49 }
 0x4ab   : > { %12485 = vmatprep.mubr.msk.f32.mxu0 %vm13418_vm12, %v15982_v22  ;;  %vm7996_vm12 = vcmp.eq.s32.totalorder %v15984_v3, %v7995_v4 }
 0x4ac   : > { %v12153_v56 = vsel %vm7996_vm12, 1.0, %v15982_v22 }
 0x4ae   : > { %12486 = vmatmul.mubr.f32.gmra.mrb[14].mxu0 %v15250_v37 }
 0x4af   : > { %8183 = vmatprep.mubr.f32.mxu0 %v15982_v22 }
 0x51b   : > { %v7972_v27 = vpop.f32.mrb[12].mxu1 }
 0x51c   : > { %v12490_v59 = vpop.f32.mrb[13].mxu1 }
 0x51f   : > { %v7978_v11 = vpop.f32.mrb[14].mxu1 }
 0x520   : > { %v12493_v47 = vpop.f32.mrb[15].mxu1 }
 0x521   : > { %v8079_v47 = vld [vmem:[#allocation7 + $0x48] sm:$0x1] }
 0x523   : > { %v7984_v35 = vpop.f32.mrb[16].mxu1 }
 0x524   : > { %v12496_v1 = vpop.f32.mrb[17].mxu1 }
 0x571   : > { %v7872_v9 = vpop.f32.mrb[16].mxu0 }
 0x572   : > { %v12840_v21 = vadd.f32 %v7872_v9, %v7298_v45  ;;  %v12465_v49 = vpop.f32.mrb[17].mxu0  ;;  %v8095_v45 = vsel %vm7055_vm4, %v8079_v47, 0 }
 0x574   : > { %v12841_v37 = vadd.f32 %v12840_v21, %v7972_v27  ;;  %v8081_v21 = vld [vmem:[#allocation7 + $0x58] sm:$0x1] }
 0x575   : > { %v7878_v43 = vpop.f32.mrb[18].mxu0 }
 0x576   : > { %v12842_v26 = vadd.f32 %v7878_v43, %v7299_v55  ;;  %v12468_v18 = vpop.f32.mrb[19].mxu0  ;;  %v8070_v55 = vld [vmem:[#allocation7] sm:$0xff]  ;;  %v8101_v43 = vsel %vm7055_vm4, %v8081_v21, 0 }
 0x577   : > { %v8117_v18 = vand.u32 4294901760, %v8070_v55 }
 0x578   : > { %v12843_v23 = vadd.f32 %v12842_v26, %v7978_v11  ;;  %v8071_v11 = vld [vmem:[#allocation7 + $0x8] sm:$0xff]  ;;  %v8078_v26 = vld [vmem:[#allocation7 + $0x40] sm:$0x1] }
 0x579   : > { %v7884_v44 = vpop.f32.mrb[20].mxu0  ;;  %v8115_v9 = vand.u32 4294901760, %v8071_v11 }
 0x57a   : > { %v12844_v28 = vadd.f32 %v7884_v44, %v7300_v19  ;;  %v12471_v48 = vpop.f32.mrb[21].mxu0  ;;  %v8072_v19 = vld [vmem:[#allocation7 + $0x10] sm:$0xff]  ;;  %v8610_v44 = vand.u32 4294901760, %v8101_v43 }
 0x57b   : > { %v8092_v48 = vsel %vm7055_vm4, %v8078_v26, 0  ;;  %v8608_v63 = vand.u32 4294901760, %v8072_v19 }
 0x57c   : > { %v12845_v62 = vadd.f32 %v12844_v28, %v7984_v35  ;;  %v8073_v35 = vld [vmem:[#allocation7 + $0x18] sm:$0xff] }
 0x57d   : > { %v7960_v15 = vpop.f32.mrb[12].mxu0  ;;  %v8606_v49 = vand.u32 4294901760, %v8073_v35  ;;  %v15516_v51 = vsub.f32 %v8072_v19, %v8608_v63 }
 0x57e   : > { %v12838_v31 = vadd.f32 %v7960_v15, %v7296_v50  ;;  %v12484_v2 = vpop.f32.mrb[13].mxu0  ;;  %v8080_v50 = vld [vmem:[#allocation7 + $0x50] sm:$0x1] }
 0x57f   : > { %v15492_v28 = vsub.f32 %v8073_v35, %v8606_v49  ;;  %v8121_v2 = vand.u32 4294901760, %v8092_v48 }
 0x580   : > { %8013 = vperm.xlu1 %13193, %v12838_v31  }
 0x581   : > { %v7966_v33 = vpop.f32.mrb[14].mxu0  ;;  %v15510_v4 = vpack.c.bf16 %v8121_v2, %v8117_v18  ;;  %v15512_v3 = vsub.f32 %v8092_v48, %v8121_v2  ;;  %v8085_v2 = vld [vmem:[#allocation7 + $0x78] sm:$0x1] }
 0x582   : > { %v12839_v57 = vadd.f32 %v7966_v33, %v7297_v34  ;;  %v12487_v54 = vpop.f32.mrb[15].mxu0  ;;  %v15502_v34 = vsub.f32 %v8070_v55, %v8117_v18  ;;  %v15504_v33 = vpack.c.bf16 %v8610_v44, %v8606_v49 }
 0x583   : > { %v8098_v54 = vsel %vm7055_vm4, %v8080_v50, 0 }
 0x584   : > { %8023 = vperm.xlu1 %13193, %v12841_v37   ;;  %8018 = vperm.xlu0 %13192, %v12839_v57   ;;  %v8119_v37 = vand.u32 4294901760, %v8095_v45  ;;  %v15506_v57 = vsub.f32 %v8101_v43, %v8610_v44  ;;  %v8612_v39 = vand.u32 4294901760, %v8098_v54 }
 0x585   : > { %12738 = vmatprep.subr.bf16.mxu1 %v15504_v33 }
 0x586   : > { %v15498_v15 = vpack.c.bf16 %v8119_v37, %v8115_v9  ;;  %v15500_v31 = vsub.f32 %v8095_v45, %v8119_v37 }
 0x588   : > { %8028 = vperm.xlu1 %13193, %v12843_v23   ;;  %8033 = vperm.xlu0 %13192, %v12845_v62   ;;  %v15490_v23 = vsub.f32 %v8071_v11, %v8115_v9  ;;  %v2390_v62 = vld [vmem:[%s15871_s8] sm:$0xf]  ;;  %v8209_v14 = vand.u32 4294901760, %v15500_v31  ;;  %v12723_v11 = vpack.c.bf16 %v15512_v3, %v15502_v34 }
 0x589   : > { %12714 = vmatprep.subr.bf16.mxu0 %v15498_v15 }
 0x58a   : > { %v8197_v16 = vand.u32 4294901760, %v15490_v23  ;;  %12716 = vmatpush1.bf16.msra.mxu0 %v15510_v4 }
 0x58c   : > { %v12729_v9 = vpack.c.bf16 %v8209_v14, %v8197_v16 }
 0x5ff   : > { %v8014_v8 = vpop.permute.xlu1 %8013 }
 0x600   : > { %v8036_v6 = vmul.f32 %v12153_v56, %v8014_v8  ;;  %v8688_v56 = vand.u32 4294901760, %v15492_v28  ;;  %v8700_v8 = vand.u32 4294901760, %v15506_v57 }
 0x602   : > { %v8041_v53 = vsel %vm4747_vm8, %v8036_v6, 0.0  ;;  %v8705_v6 = vsub.f32 %v8098_v54, %v8612_v39  ;;  %v12753_v21 = vpack.c.bf16 %v8700_v8, %v8688_v56  ;;  %v8075_v54 = vld [vmem:[#allocation7 + $0x28] sm:$0xff] }
 0x603   : > { %v8024_v32 = vpop.permute.xlu1 %8023  ;;  %v8019_v58 = vpop.permute.xlu0 %8018 }
 0x604   : > { %v8038_v41 = vmul.f32 %v12155_v12, %v8024_v32  ;;  %v8037_v24 = vmul.f32 %v12154_v29, %v8019_v58  ;;  %v10079_v12 = vld [vmem:[%s15985_s22] sm:$0xff]  ;;  %v15526_v29 = vpack.c.bf16 %v8612_v39, %v8608_v63  ;;  %v8198_v32 = vsub.f32 %v15490_v23, %v8197_v16  ;;  %v15582_v16 = vld [vmem:[#allocation7 + $0x20] sm:$0xff] }
 0x605   : > { %v8210_v58 = vsub.f32 %v15500_v31, %v8209_v14  ;;  %v12747_v47 = vpack.c.bf16 %v8705_v6, %v15516_v51  ;;  %v8113_v39 = vsel %vm7055_vm4, %v8085_v2, 0  ;;  %v8076_v14 = vld [vmem:[#allocation7 + $0x30] sm:$0xff] }
 0x606   : > { %v8042_v20 = vsel %vm4747_vm8, %v8037_v24, 0.0  ;;  %v8044_v25 = vsel %vm4747_vm8, %v8038_v41, 0.0  ;;  %v8689_v41 = vsub.f32 %v15492_v28, %v8688_v56  ;;  %v8701_v24 = vsub.f32 %v15506_v57, %v8700_v8  ;;  %12740 = vmatpush1.bf16.msra.mxu1 %v15526_v29 }
 0x607   : > { %v8043_v10 = vadd.f32 %v8042_v20, %v8041_v53  ;;  %v8029_v61 = vpop.permute.xlu1 %8028  ;;  %v8034_v42 = vpop.permute.xlu0 %8033  ;;  %v8215_v53 = vand.u32 4294901760, %v15512_v3  ;;  %v8694_v20 = vand.u32 4294901760, %v15516_v51  ;;  %v9097_v8 = vand.u32 4294901760, %v8075_v54 }
 0x608   : > { %v8039_v17 = vmul.f32 %v12156_v60, %v8029_v61  ;;  %v8040_v7 = vmul.f32 %v12157_v30, %v8034_v42  ;;  %v8199_v60 = vand.u32 4294901760, %v8198_v32  ;;  %v8203_v30 = vand.u32 4294901760, %v15502_v34 }
 0x609   : > { %v8045_v36 = vadd.f32 %v8044_v25, %v8043_v10  ;;  %v8211_v10 = vand.u32 4294901760, %v8210_v58  ;;  %v8690_v61 = vand.u32 4294901760, %v8689_v41  ;;  %v8702_v42 = vand.u32 4294901760, %v8701_v24 }
 0x60a   : > { %v8046_v40 = vsel %vm4747_vm8, %v8039_v17, 0.0  ;;  %v8049_v38 = vsel %vm8048_vm10, %v8040_v7, 0.0  ;;  %v8706_v25 = vand.u32 4294901760, %v8705_v6  ;;  %v8204_v17 = vsub.f32 %v15502_v34, %v8203_v30  ;;  %v8082_v34 = vld [vmem:[#allocation7 + $0x60] sm:$0x1] }
 0x60b   : > { %v8047_v5 = vadd.f32 %v8046_v40, %v8045_v36  ;;  %v8216_v7 = vsub.f32 %v15512_v3, %v8215_v53  ;;  %v8695_v36 = vsub.f32 %v15516_v51, %v8694_v20  ;;  %v12717_v40 = vpack.c.bf16 %v8211_v10, %v8199_v60  ;;  %v8077_v3 = vld [vmem:[#allocation7 + $0x38] sm:$0xff] }
 0x60c   : > { %v15546_v49 = vpack.c.bf16 %v8215_v53, %v8203_v30  ;;  %v15548_v55 = vpack.c.bf16 %v8706_v25, %v8694_v20  ;;  %vm8087_vm8 = vcmask 72704   ;;  %v8104_v51 = vsel %vm7055_vm4, %v8082_v34, 0 }
 0x60d   : > { %v8050_v52 = vadd.f32 %v8049_v38, %v8047_v5  ;;  %v12741_v5 = vpack.c.bf16 %v8702_v42, %v8690_v61  ;;  %v8707_v38 = vsub.f32 %v8705_v6, %v8706_v25  ;;  %12718 = vmatprep.subr.bf16.mxu0 %v12717_v40  ;;  %v9588_v6 = vand.u32 4294901760, %v8077_v3 }
 0x60e   : > { %v9592_v32 = vand.u32 4294901760, %v8113_v39  ;;  %v9099_v58 = vand.u32 4294901760, %v15582_v16  ;;  %v9103_v41 = vand.u32 4294901760, %v8104_v51  ;;  %v9590_v24 = vand.u32 4294901760, %v8076_v14 }
 0x60f   : > { %v8051_v46 = vrot.slane %v8050_v52, 4  ;;  %12742 = vmatprep.subr.bf16.mxu1 %v12741_v5  ;;  %v15589_v30 = vsub.f32 %v8075_v54, %v9097_v8  ;;  %v15593_v20 = vsub.f32 %v8077_v3, %v9588_v6 }
 0x610   : > { %v15595_v10 = vsub.f32 %v8113_v39, %v9592_v32  ;;  %v15600_v61 = vsub.f32 %v15582_v16, %v9099_v58  ;;  %v15604_v42 = vsub.f32 %v8104_v51, %v9103_v41  ;;  %v15606_v25 = vsub.f32 %v8076_v14, %v9590_v24 }
 0x611   : > { %v8052_v0 = vadd.f32 %v8051_v46, %v8050_v52  ;;  %v8205_v52 = vand.u32 4294901760, %v8204_v17  ;;  %v8217_v46 = vand.u32 4294901760, %v8216_v7  ;;  %v9179_v7 = vand.u32 4294901760, %v15589_v30 }
 0x612   : > { %v9670_v40 = vand.u32 4294901760, %v15593_v20  ;;  %v9682_v5 = vand.u32 4294901760, %v15595_v10  ;;  %v12793_v34 = vpack.c.bf16 %v15595_v10, %v15593_v20 }
 0x613   : > { %v8053_v13 = vrot.slane %v8052_v0, 2  ;;  %v12719_v35 = vpack.c.bf16 %v8217_v46, %v8205_v52  ;;  %v9197_v52 = vand.u32 4294901760, %v15604_v42  ;;  %v9676_v46 = vand.u32 4294901760, %v15606_v25 }
 0x615   : > { %v8054_v27 = vadd.f32 %v8053_v13, %v8052_v0  ;;  %v8696_v0 = vand.u32 4294901760, %v8695_v36  ;;  %v12721_v13 = vpack.c.bf16 %v15500_v31, %v15490_v23 }
 0x617   : > { %v8055_v59 = vrot.slane %v8054_v27, 1 }
 0x619   : > { %v15484_v1 = vadd.f32 %v8055_v59, %v8054_v27  ;;  %v8708_v27 = vand.u32 4294901760, %v8707_v38  ;;  %v12745_v59 = vpack.c.bf16 %v15506_v57, %v15492_v28  ;;  %v8084_v57 = vld [vmem:[#allocation7 + $0x70] sm:$0x1]  ;;  %v9185_v38 = vand.u32 4294901760, %v15600_v61 }
 0x61a   : > { %v8110_v56 = vsel %vm7055_vm4, %v8084_v57, 0  ;;  %v12771_v57 = vpack.c.bf16 %v15604_v42, %v15600_v61 }
 0x61b   : > { %8061 = vrot.lane.b32.xlu0 %v15484_v1, %s13419_s18  ;;  %8058 = vrot.lane.b32.xlu1 %v15484_v1, %s13420_s12  ;;  %v12743_v45 = vpack.c.bf16 %v8708_v27, %v8696_v0  ;;  %v9594_v60 = vand.u32 4294901760, %v8110_v56  ;;  %v12779_v3 = vpack.c.bf16 %v9197_v52, %v9185_v38  ;;  %s15986_s18 = sld [smem:[#allocation21_spill]]  ;;  %s15792_s12 = scalar_lea.vmem [#allocation10], %s12149_s20 }
 0x61c   : > { %s12172_s20 = sshll.u32 %s13514_s29, 10  ;;  %s12051_s14 = sshll.u32 %s15792_s12, 4  ;;  %s15819_s14 = int_to_ptr.vmem [resolvable:$true] %s12051_s14 }
 0x61d   : > { %v15608_v17 = vsub.f32 %v8110_v56, %v9594_v60  ;;  %s15817_s25 = scalar_lea.hbm %s15987_s13, %s12172_s20  ;;  %s12037_s29 = scalar_lea.sflag [#allocation6], %s13662_s23 }
 0x61e   : > { %s13328_s22 = scalar_lea.vmem %s15819_s14, 1024 }
 0x61f   : > { %2393 = vperm.xlu0 %13192, %v2390_v62   ;;  %8064 = vrot.lane.b32.xlu1 %v15484_v1, %s13421_s11  ;;  %v9688_v0 = vand.u32 4294901760, %v15608_v17  ;;  %v12795_v54 = vpack.c.bf16 %v15608_v17, %v15606_v25  ;;  %p13329_p11 = scmp.ne.s32.totalorder %s15819_s14, %s13328_s22 }
 0x621   : > { %v12803_v39 = vpack.c.bf16 %v9688_v0, %v9676_v46  ;;  %p13330_p1 = pnand %p13329_p11, %p15988_p0 }
 0x623   : > { %10082 = vperm.xlu1 %13193, %v10079_v12   ;;  %p13331_p3 = pneg %p13330_p1 }
 0x68d   : > { %v8059_v37 = vpop.permute.xlu1 %8058  ;;  %v8062_v43 = vpop.permute.xlu0 %8061 }
 0x68e   : > { %v8067_v26 = vsel %vm7055_vm4, %v15484_v1, %v8059_v37  ;;  %v8083_v1 = vld [vmem:[#allocation7 + $0x68] sm:$0x1]  ;;  %v12787_v37 = vpack.c.bf16 %v9594_v60, %v9590_v24 }
 0x68f   : > { %v8068_v18 = vsel %vm7275_vm0, %v8067_v26, %v8062_v43  ;;  %v8107_v63 = vsel %vm7055_vm4, %v8083_v1, 0 }
 0x690   : > { %v9101_v12 = vand.u32 4294901760, %v8107_v63 }
 0x691   : > { %v8065_v19 = vpop.permute.xlu1 %8064 }
 0x692   : > { %v8069_v23 = vsel %vm7283_vm3, %v8068_v18, %v8065_v19  ;;  %v15591_v53 = vsub.f32 %v8107_v63, %v9101_v12  ;;  %v12801_v63 = vpack.c.bf16 %v9682_v5, %v9670_v40 }
 0x693   : > { %v8089_v44 = vsel %vm8087_vm8, %v8069_v23, 0 }
 0x694   : > { %v15554_v28 = vand.u32 4294901760, %v8089_v44  ;;  %v9191_v36 = vand.u32 4294901760, %v15591_v53  ;;  %v12769_v2 = vpack.c.bf16 %v15591_v53, %v15589_v30 }
 0x696   : > { %v15557_v48 = vsub.f32 %v8089_v44, %v15554_v28  ;;  %v9192_v27 = vsub.f32 %v15591_v53, %v9191_v36 }
 0x698   : > { %v15560_v50 = vand.u32 4294901760, %v15557_v48 }
 0x69a   : > { %v8187_v62 = vsub.f32 %v15557_v48, %v15560_v50 }
 0x69c   : > { %v15564_v31 = vand.u32 4294901760, %v8187_v62 }
 0x69e   : > { %8189 = vmatmul.mubr.f32.vlgmr.msra.gmra.mrb[4].mxu0 %v15564_v31  ;;  %8680 = vmatmul.mubr.f32.vlgmr.msra.gmra.mrb[4].mxu1 %v15564_v31  ;;  %v2394_v56 = vpop.permute.xlu0 %2393 }
 0x69f   : > { %12720 = vmatpush1.bf16.msra.mxu0 %v12719_v35  ;;  %12744 = vmatpush1.bf16.msra.mxu1 %v12743_v45  ;;  %v9198_v35 = vsub.f32 %v15604_v42, %v9197_v52  ;;  %v9677_v45 = vsub.f32 %v15606_v25, %v9676_v46 }
 0x6a0   : > { %8279 = vmatprep.mubr.f32.mxu0 %v15982_v22  ;;  %8770 = vmatprep.mubr.f32.mxu1 %v15982_v22 }
 0x6a1   : > { %12722 = vmatprep.subr.bf16.mxu0 %v12721_v13  ;;  %12746 = vmatprep.subr.bf16.mxu1 %v12745_v59  ;;  %v15622_v13 = vpack.c.bf16 %v9101_v12, %v9097_v8  ;;  %v9671_v59 = vsub.f32 %v15593_v20, %v9670_v40  ;;  %v9199_v26 = vand.u32 4294901760, %v9198_v35  ;;  %v9678_v18 = vand.u32 4294901760, %v9677_v45 }
 0x6a6   : > { %8281 = vmatmul.mubr.f32.vlgmr.msra.gmra.mrb[4].mxu0 %v15554_v28  ;;  %8772 = vmatmul.mubr.f32.vlgmr.msra.gmra.mrb[4].mxu1 %v15554_v28 }
 0x6a7   : > { %12724 = vmatpush1.bf16.msra.mxu0 %v12723_v11  ;;  %12748 = vmatpush1.bf16.msra.mxu1 %v12747_v47  ;;  %v9683_v11 = vsub.f32 %v15595_v10, %v9682_v5  ;;  %v9186_v47 = vsub.f32 %v15600_v61, %v9185_v38 }
 0x6a8   : > { %8359 = vmatprep.mubr.f32.mxu0 %v15982_v22  ;;  %8850 = vmatprep.mubr.f32.mxu1 %v15982_v22 }
 0x6a9   : > { %12726 = vmatprep.subr.bf16.mxu0 %v15498_v15  ;;  %12750 = vmatprep.subr.bf16.mxu1 %v15504_v33  ;;  %v9187_v43 = vand.u32 4294901760, %v9186_v47 }
 0x6ab   : > { %v12767_v62 = vpack.c.bf16 %v9199_v26, %v9187_v43 }
 0x6ae   : > { %8362 = vmatmul.mubr.f32.vlgmr.msra.gmra.mrb[4].mxu0 %v15557_v48  ;;  %8853 = vmatmul.mubr.f32.vlgmr.msra.gmra.mrb[4].mxu1 %v15557_v48 }
 0x6af   : > { %12728 = vmatpush1.bf16.msra.mxu0 %v15510_v4  ;;  %12752 = vmatpush1.bf16.msra.mxu1 %v15526_v29 }
 0x6b0   : > { %8436 = vmatprep.mubr.f32.mxu0 %v15982_v22  ;;  %8927 = vmatprep.mubr.f32.mxu1 %v15982_v22 }
 0x6b1   : > { %12730 = vmatprep.subr.bf16.mxu0 %v12729_v9  ;;  %12754 = vmatprep.subr.bf16.mxu1 %v12753_v21  ;;  %v9689_v9 = vsub.f32 %v15608_v17, %v9688_v0  ;;  %v9672_v21 = vand.u32 4294901760, %v9671_v59 }
 0x6b3   : > { %v9690_v19 = vand.u32 4294901760, %v9689_v9 }
 0x6b5   : > { %v12791_v1 = vpack.c.bf16 %v9690_v19, %v9678_v18 }
 0x6b6   : > { %8440 = vmatmul.mubr.f32.vlgmr.msra.gmra.mrb[4].mxu0 %v15560_v50  ;;  %8931 = vmatmul.mubr.f32.vlgmr.msra.gmra.mrb[4].mxu1 %v15560_v50 }
 0x6b7   : > { %12732 = vmatpush1.bf16.msra.mxu0 %v15546_v49  ;;  %12756 = vmatpush1.bf16.msra.mxu1 %v15548_v55  ;;  %v9684_v49 = vand.u32 4294901760, %v9683_v11  ;;  %v12763_v55 = vpack.c.bf16 %v9103_v41, %v9099_v58 }
 0x6b8   : > { %8522 = vmatprep.mubr.f32.mxu0 %v15982_v22  ;;  %9013 = vmatprep.mubr.f32.mxu1 %v15982_v22 }
 0x6b9   : > { %12734 = vmatprep.subr.bf16.mxu0 %v15498_v15  ;;  %12758 = vmatprep.subr.bf16.mxu1 %v15504_v33  ;;  %v15624_v15 = vpack.c.bf16 %v9592_v32, %v9588_v6  ;;  %v9180_v33 = vsub.f32 %v15589_v30, %v9179_v7  ;;  %v12789_v44 = vpack.c.bf16 %v9684_v49, %v9672_v21 }
 0x6be   : > { %8524 = vmatmul.mubr.f32.vlgmr.msra.gmra.mrb[4].mxu0 %v15554_v28  ;;  %9015 = vmatmul.mubr.f32.vlgmr.msra.gmra.mrb[4].mxu1 %v15554_v28 }
 0x6bf   : > { %12736 = vmatpush1.bf16.msra.mxu0 %v15510_v4  ;;  %12760 = vmatpush1.bf16.msra.mxu1 %v15526_v29  ;;  %v9181_v4 = vand.u32 4294901760, %v9180_v33  ;;  %v9193_v29 = vand.u32 4294901760, %v9192_v27 }
 0x6c0   : > { %8598 = vmatprep.mubr.f32.mxu0 %v15982_v22  ;;  %9089 = vmatprep.mubr.f32.mxu1 %v15982_v22 }
 0x6c1   : > { %12762 = vmatprep.subr.bf16.mxu0 %v15622_v13  ;;  %12786 = vmatprep.subr.bf16.mxu1 %v15624_v15  ;;  %v12765_v23 = vpack.c.bf16 %v9193_v29, %v9181_v4 }
 0x6c6   : > { %8600 = vmatmul.mubr.f32.vlgmr.msra.gmra.mrb[4].mxu0 %v15554_v28  ;;  %9091 = vmatmul.mubr.f32.vlgmr.msra.gmra.mrb[4].mxu1 %v15554_v28 }
 0x6c7   : > { %12764 = vmatpush1.bf16.msra.mxu0 %v12763_v55  ;;  %12788 = vmatpush1.bf16.msra.mxu1 %v12787_v37 }
 0x6c8   : > { %9165 = vmatprep.mubr.f32.mxu0 %v15982_v22  ;;  %9656 = vmatprep.mubr.f32.mxu1 %v15982_v22 }
 0x6c9   : > { %12766 = vmatprep.subr.bf16.mxu0 %v12765_v23  ;;  %12790 = vmatprep.subr.bf16.mxu1 %v12789_v44 }
 0x6ca   : > { %9171 = vmatmul.mubr.f32.vlgmr.msra.gmra.mrb[6].mxu0 %v15564_v31  ;;  %9662 = vmatmul.mubr.f32.vlgmr.msra.gmra.mrb[6].mxu1 %v15564_v31  ;;  %v12777_v31 = vpack.c.bf16 %v9191_v36, %v9179_v7 }
 0x6cb   : > { %12768 = vmatpush1.bf16.msra.mxu0 %v12767_v62  ;;  %12792 = vmatpush1.bf16.msra.mxu1 %v12791_v1 }
 0x6cc   : > { %9261 = vmatprep.mubr.f32.mxu0 %v15982_v22  ;;  %9752 = vmatprep.mubr.f32.mxu1 %v15982_v22 }
 0x6cd   : > { %12770 = vmatprep.subr.bf16.mxu0 %v12769_v2  ;;  %12794 = vmatprep.subr.bf16.mxu1 %v12793_v34 }
 0x6d2   : > { %9263 = vmatmul.mubr.f32.vlgmr.msra.gmra.mrb[6].mxu0 %v15554_v28  ;;  %9754 = vmatmul.mubr.f32.vlgmr.msra.gmra.mrb[6].mxu1 %v15554_v28 }
 0x6d3   : > { %12772 = vmatpush1.bf16.msra.mxu0 %v12771_v57  ;;  %12796 = vmatpush1.bf16.msra.mxu1 %v12795_v54 }
 0x6d4   : > { %9341 = vmatprep.mubr.f32.mxu0 %v15982_v22  ;;  %9832 = vmatprep.mubr.f32.mxu1 %v15982_v22 }
 0x6d5   : > { %12774 = vmatprep.subr.bf16.mxu0 %v15622_v13  ;;  %12798 = vmatprep.subr.bf16.mxu1 %v15624_v15 }
 0x6da   : > { %9344 = vmatmul.mubr.f32.vlgmr.msra.gmra.mrb[6].mxu0 %v15557_v48  ;;  %9835 = vmatmul.mubr.f32.vlgmr.msra.gmra.mrb[6].mxu1 %v15557_v48  ;;  %v8086_v48 = vld [vmem:[%s15986_s18] sm:$0xff] }
 0x6db   : > { %12776 = vmatpush1.bf16.msra.mxu0 %v12763_v55  ;;  %12800 = vmatpush1.bf16.msra.mxu1 %v12787_v37 }
 0x6dc   : > { %9418 = vmatprep.mubr.f32.mxu0 %v15982_v22  ;;  %9909 = vmatprep.mubr.f32.mxu1 %v15982_v22 }
 0x6dd   : > { %12778 = vmatprep.subr.bf16.mxu0 %v12777_v31  ;;  %12802 = vmatprep.subr.bf16.mxu1 %v12801_v63 }
 0x6e2   : > { %9422 = vmatmul.mubr.f32.vlgmr.msra.gmra.mrb[6].mxu0 %v15560_v50  ;;  %9913 = vmatmul.mubr.f32.vlgmr.msra.gmra.mrb[6].mxu1 %v15560_v50  ;;  %v10086_v50 = vsel %vm2404_vm1, %v8086_v48, 0 }
 0x6e3   : > { %12780 = vmatpush1.bf16.msra.mxu0 %v12779_v3  ;;  %12804 = vmatpush1.bf16.msra.mxu1 %v12803_v39  ;;  %v15717_v16 = vand.u32 4294901760, %v10086_v50 }
 0x6e4   : > { %9504 = vmatprep.mubr.f32.mxu0 %v15982_v22  ;;  %9995 = vmatprep.mubr.f32.mxu1 %v15982_v22 }
 0x6e5   : > { %12782 = vmatprep.subr.bf16.mxu0 %v15622_v13  ;;  %12806 = vmatprep.subr.bf16.mxu1 %v15624_v15  ;;  %v15720_v51 = vsub.f32 %v10086_v50, %v15717_v16 }
 0x6e7   : > { %v15723_v14 = vand.u32 4294901760, %v15720_v51 }
 0x6e9   : > { %v10182_v58 = vsub.f32 %v15720_v51, %v15723_v14 }
 0x6ea   : > { %9506 = vmatmul.mubr.f32.vlgmr.msra.gmra.mrb[6].mxu0 %v15554_v28  ;;  %9997 = vmatmul.mubr.f32.vlgmr.msra.gmra.mrb[6].mxu1 %v15554_v28 }
 0x6eb   : > { %12784 = vmatpush1.bf16.msra.mxu0 %v12763_v55  ;;  %12808 = vmatpush1.bf16.msra.mxu1 %v12787_v37  ;;  %v15729_v20 = vand.u32 4294901760, %v10182_v58 }
 0x6ec   : > { %9580 = vmatprep.mubr.f32.mxu0 %v15982_v22  ;;  %10071 = vmatprep.mubr.f32.mxu1 %v15982_v22 }
 0x6f2   : > { %9582 = vmatmul.mubr.f32.vlgmr.msra.gmra.mrb[6].mxu0 %v15554_v28  ;;  %10073 = vmatmul.mubr.f32.vlgmr.msra.gmra.mrb[6].mxu1 %v15554_v28 }
 0x6f3   : > { %10178 = vmatprep.mubr.f32.mxu1 %v15982_v22 }
 0x799   : > { %v8601_v8 = vpop.f32.mrb[4].mxu0  ;;  %v9092_v12 = vpop.f32.mrb[4].mxu1 }
 0x79a   : > { %v12823_v28 = vadd.f32 %v8601_v8, %v2394_v56  ;;  %v8603_v6 = vpop.f32.mrb[5].mxu0  ;;  %v9094_v32 = vpop.f32.mrb[5].mxu1  ;;  %v12825_v38 = vadd.f32 %v9092_v12, %v2394_v56 }
 0x79b   : > { %v12824_v41 = vadd.f32 %v8603_v6, %v2394_v56  ;;  %v12826_v5 = vadd.f32 %v9094_v32, %v2394_v56 }
 0x79c   : > { %v10089_v24 = vsel %vm2408_vm2, %v12823_v28, 0  ;;  %v10095_v46 = vsel %vm2408_vm2, %v12825_v38, 0 }
 0x79d   : > { %v10114_v60 = vand.u32 4294901760, %v10089_v24  ;;  %v10092_v30 = vsel %vm2408_vm2, %v12824_v41, 0  ;;  %v10098_v52 = vsel %vm2408_vm2, %v12826_v5, 0  ;;  %v10579_v13 = vand.u32 4294901760, %v10095_v46  ;;  %v15784_v41 = vpop.permute.xlu1 %10082 }
 0x79e   : > { %v10112_v53 = vand.u32 4294901760, %v10092_v30  ;;  %v10577_v0 = vand.u32 4294901760, %v10098_v52 }
 0x79f   : > { %v10197_v10 = vsub.f32 %v10089_v24, %v10114_v60  ;;  %v10662_v33 = vsub.f32 %v10095_v46, %v10579_v13 }
 0x7a0   : > { %v10191_v61 = vsub.f32 %v10092_v30, %v10112_v53  ;;  %10113 = vmatprep.subr.mxu1 %v10112_v53  ;;  %v10656_v15 = vsub.f32 %v10098_v52, %v10577_v0 }
 0x7a1   : > { %v10198_v42 = vand.u32 4294901760, %v10197_v10  ;;  %10115 = vmatpush1.msra.mxu1 %v10114_v60  ;;  %v10663_v59 = vand.u32 4294901760, %v10662_v33 }
 0x7a2   : > { %10184 = vmatmul.mubr.f32.vlgmr.msra.gmra.mrb[18].mxu1 %v15729_v20  ;;  %v10192_v25 = vand.u32 4294901760, %v10191_v61  ;;  %v10657_v27 = vand.u32 4294901760, %v10656_v15 }
 0x7a3   : > { %v10199_v17 = vsub.f32 %v10197_v10, %v10198_v42  ;;  %10264 = vmatprep.mubr.f32.mxu1 %v15982_v22  ;;  %v10664_v55 = vsub.f32 %v10662_v33, %v10663_v59 }
 0x7a4   : > { %v10193_v7 = vsub.f32 %v10191_v61, %v10192_v25  ;;  %v10658_v29 = vsub.f32 %v10656_v15, %v10657_v27 }
 0x7a5   : > { %v10200_v40 = vand.u32 4294901760, %v10199_v17  ;;  %v10665_v43 = vand.u32 4294901760, %v10664_v55 }
 0x7a6   : > { %v10194_v36 = vand.u32 4294901760, %v10193_v7  ;;  %v10659_v37 = vand.u32 4294901760, %v10658_v29  ;;  %v13227_v7 = vld [vmem:[%s13668_s19 + $0x8] sm:$0xff] }
 0x7a8   : > { %10195 = vmatprep.subr.mxu1 %v10194_v36 }
 0x7a9   : > { %10201 = vmatpush1.msra.mxu1 %v10200_v40 }
 0x7aa   : > { %10266 = vmatmul.mubr.f32.vlgmr.msra.gmra.mrb[18].mxu1 %v15717_v16  ;;  %10274 = vmatprep.subr.mxu1 %v10191_v61 }
 0x7ab   : > { %10277 = vmatpush1.msra.mxu1 %v10197_v10  ;;  %10340 = vmatprep.mubr.f32.mxu1 %v15982_v22 }
 0x7ac   : > { %10350 = vmatprep.subr.mxu1 %v10112_v53 }
 0x7b2   : > { %10343 = vmatmul.mubr.f32.vlgmr.msra.gmra.mrb[18].mxu1 %v15720_v51 }
 0x7b3   : > { %10352 = vmatpush1.msra.mxu1 %v10114_v60  ;;  %10415 = vmatprep.mubr.f32.mxu1 %v15982_v22 }
 0x7b4   : > { %10428 = vmatprep.subr.mxu1 %v10192_v25  ;;  %v13226_v25 = vld [vmem:[%s13668_s19] sm:$0xff] }
 0x7ba   : > { %10419 = vmatmul.mubr.f32.vlgmr.msra.gmra.mrb[18].mxu1 %v15723_v14 }
 0x7bb   : > { %10432 = vmatpush1.msra.mxu1 %v10198_v42  ;;  %10495 = vmatprep.mubr.f32.mxu1 %v15982_v22 }
 0x7bc   : > { %10504 = vmatprep.subr.mxu1 %v10112_v53 }
 0x7c2   : > { %10497 = vmatmul.mubr.f32.vlgmr.msra.gmra.mrb[18].mxu1 %v15717_v16 }
 0x7c3   : > { %10506 = vmatpush1.msra.mxu1 %v10114_v60  ;;  %10569 = vmatprep.mubr.f32.mxu1 %v15982_v22 }
 0x7c4   : > { %10578 = vmatprep.subr.mxu1 %v10577_v0 }
 0x7c5   : > { %v9583_v11 = vpop.f32.mrb[6].mxu0  ;;  %v10074_v47 = vpop.f32.mrb[6].mxu1 }
 0x7c6   : > { %v12827_v35 = vadd.f32 %v9583_v11, %v2394_v56  ;;  %v12829_v45 = vadd.f32 %v10074_v47, %v2394_v56  ;;  %v9585_v9 = vpop.f32.mrb[7].mxu0  ;;  %v10076_v4 = vpop.f32.mrb[7].mxu1  ;;  %v13228_v47 = vld [vmem:[%s13668_s19 + $0x10] sm:$0xff] }
 0x7c7   : > { %v12828_v21 = vadd.f32 %v9585_v9, %v2394_v56  ;;  %v12830_v49 = vadd.f32 %v10076_v4, %v2394_v56 }
 0x7c8   : > { %v10101_v18 = vsel %vm2408_vm2, %v12827_v35, 0  ;;  %v10107_v3 = vsel %vm2408_vm2, %v12829_v45, 0  ;;  %v13229_v45 = vld [vmem:[%s13668_s19 + $0x18] sm:$0xff] }
 0x7c9   : > { %v10104_v26 = vsel %vm2408_vm2, %v12828_v21, 0  ;;  %v11044_v23 = vand.u32 4294901760, %v10101_v18  ;;  %v10110_v63 = vsel %vm2408_vm2, %v12830_v49, 0  ;;  %v11509_v48 = vand.u32 4294901760, %v10107_v3 }
 0x7ca   : > { %10571 = vmatmul.mubr.f32.vlgmr.msra.gmra.mrb[18].mxu1 %v15717_v16  ;;  %v11042_v19 = vand.u32 4294901760, %v10104_v26  ;;  %v11507_v39 = vand.u32 4294901760, %v10110_v63 }
 0x7cb   : > { %10580 = vmatpush1.msra.mxu1 %v10579_v13  ;;  %10643 = vmatprep.mubr.f32.mxu1 %v15982_v22  ;;  %v11127_v62 = vsub.f32 %v10101_v18, %v11044_v23  ;;  %v11592_v56 = vsub.f32 %v10107_v3, %v11509_v48 }
 0x7cc   : > { %10660 = vmatprep.subr.mxu1 %v10659_v37  ;;  %v11121_v44 = vsub.f32 %v10104_v26, %v11042_v19  ;;  %v11586_v50 = vsub.f32 %v10110_v63, %v11507_v39 }
 0x7cd   : > { %v11128_v2 = vand.u32 4294901760, %v11127_v62  ;;  %v11593_v12 = vand.u32 4294901760, %v11592_v56 }
 0x7ce   : > { %10649 = vmatmul.mubr.f32.vlgmr.msra.gmra.mrb[20].mxu1 %v15729_v20  ;;  %v11122_v1 = vand.u32 4294901760, %v11121_v44  ;;  %v11587_v8 = vand.u32 4294901760, %v11586_v50 }
 0x7cf   : > { %10666 = vmatpush1.msra.mxu1 %v10665_v43  ;;  %10729 = vmatprep.mubr.f32.mxu1 %v15982_v22  ;;  %v11129_v57 = vsub.f32 %v11127_v62, %v11128_v2  ;;  %v11594_v6 = vsub.f32 %v11592_v56, %v11593_v12 }
 0x7d0   : > { %10739 = vmatprep.subr.mxu1 %v10656_v15  ;;  %v11123_v34 = vsub.f32 %v11121_v44, %v11122_v1  ;;  %v11588_v28 = vsub.f32 %v11586_v50, %v11587_v8 }
 0x7d1   : > { %v11130_v31 = vand.u32 4294901760, %v11129_v57  ;;  %v11595_v58 = vand.u32 4294901760, %v11594_v6  ;;  %v13232_v6 = vld [vmem:[%s13668_s19 + $0x30] sm:$0xff] }
 0x7d2   : > { %v11124_v54 = vand.u32 4294901760, %v11123_v34  ;;  %v11589_v32 = vand.u32 4294901760, %v11588_v28 }
 0x7d6   : > { %10731 = vmatmul.mubr.f32.vlgmr.msra.gmra.mrb[20].mxu1 %v15717_v16 }
 0x7d7   : > { %10742 = vmatpush1.msra.mxu1 %v10662_v33  ;;  %10805 = vmatprep.mubr.f32.mxu1 %v15982_v22 }
 0x7d8   : > { %10815 = vmatprep.subr.mxu1 %v10577_v0 }
 0x7de   : > { %10808 = vmatmul.mubr.f32.vlgmr.msra.gmra.mrb[20].mxu1 %v15720_v51 }
 0x7df   : > { %10817 = vmatpush1.msra.mxu1 %v10579_v13  ;;  %10880 = vmatprep.mubr.f32.mxu1 %v15982_v22 }
 0x7e0   : > { %10893 = vmatprep.subr.mxu1 %v10657_v27 }
 0x7e6   : > { %10884 = vmatmul.mubr.f32.vlgmr.msra.gmra.mrb[20].mxu1 %v15723_v14 }
 0x7e7   : > { %10897 = vmatpush1.msra.mxu1 %v10663_v59  ;;  %10960 = vmatprep.mubr.f32.mxu1 %v15982_v22 }
 0x7e8   : > { %10969 = vmatprep.subr.mxu1 %v10577_v0 }
 0x7ee   : > { %10962 = vmatmul.mubr.f32.vlgmr.msra.gmra.mrb[20].mxu1 %v15717_v16 }
 0x7ef   : > { %10971 = vmatpush1.msra.mxu1 %v10579_v13  ;;  %11034 = vmatprep.mubr.f32.mxu1 %v15982_v22 }
 0x7f0   : > { %11043 = vmatprep.subr.mxu1 %v11042_v19 }
 0x7f6   : > { %11036 = vmatmul.mubr.f32.vlgmr.msra.gmra.mrb[20].mxu1 %v15717_v16 }
 0x7f7   : > { %11045 = vmatpush1.msra.mxu1 %v11044_v23  ;;  %11108 = vmatprep.mubr.f32.mxu1 %v15982_v22 }
 0x7f8   : > { %11125 = vmatprep.subr.mxu1 %v11124_v54 }
 0x7fa   : > { %11114 = vmatmul.mubr.f32.vlgmr.msra.gmra.mrb[22].mxu1 %v15729_v20 }
 0x7fb   : > { %11131 = vmatpush1.msra.mxu1 %v11130_v31  ;;  %11194 = vmatprep.mubr.f32.mxu1 %v15982_v22 }
 0x7fc   : > { %11204 = vmatprep.subr.mxu1 %v11121_v44 }
 0x802   : > { %11196 = vmatmul.mubr.f32.vlgmr.msra.gmra.mrb[22].mxu1 %v15717_v16 }
 0x803   : > { %11207 = vmatpush1.msra.mxu1 %v11127_v62  ;;  %11270 = vmatprep.mubr.f32.mxu1 %v15982_v22  ;;  %v13230_v62 = vld [vmem:[%s13668_s19 + $0x20] sm:$0xff] }
 0x804   : > { %11280 = vmatprep.subr.mxu1 %v11042_v19 }
 0x80a   : > { %11273 = vmatmul.mubr.f32.vlgmr.msra.gmra.mrb[22].mxu1 %v15720_v51 }
 0x80b   : > { %11282 = vmatpush1.msra.mxu1 %v11044_v23  ;;  %11345 = vmatprep.mubr.f32.mxu1 %v15982_v22 }
 0x80c   : > { %11358 = vmatprep.subr.mxu1 %v11122_v1 }
 0x812   : > { %11349 = vmatmul.mubr.f32.vlgmr.msra.gmra.mrb[22].mxu1 %v15723_v14 }
 0x813   : > { %11362 = vmatpush1.msra.mxu1 %v11128_v2  ;;  %11425 = vmatprep.mubr.f32.mxu1 %v15982_v22  ;;  %v13231_v2 = vld [vmem:[%s13668_s19 + $0x28] sm:$0xff] }
 0x814   : > { %11434 = vmatprep.subr.mxu1 %v11042_v19 }
 0x81a   : > { %11427 = vmatmul.mubr.f32.vlgmr.msra.gmra.mrb[22].mxu1 %v15717_v16 }
 0x81b   : > { %11436 = vmatpush1.msra.mxu1 %v11044_v23  ;;  %11499 = vmatprep.mubr.f32.mxu1 %v15982_v22 }
 0x81c   : > { %11508 = vmatprep.subr.mxu1 %v11507_v39 }
 0x822   : > { %11501 = vmatmul.mubr.f32.vlgmr.msra.gmra.mrb[22].mxu1 %v15717_v16 }
 0x823   : > { %11510 = vmatpush1.msra.mxu1 %v11509_v48  ;;  %11573 = vmatprep.mubr.f32.mxu1 %v15982_v22 }
 0x824   : > { %11590 = vmatprep.subr.mxu1 %v11589_v32 }
 0x826   : > { %11579 = vmatmul.mubr.f32.vlgmr.msra.gmra.mrb[24].mxu1 %v15729_v20 }
 0x827   : > { %11596 = vmatpush1.msra.mxu1 %v11595_v58  ;;  %11659 = vmatprep.mubr.f32.mxu1 %v15982_v22  ;;  %v13233_v58 = vld [vmem:[%s13668_s19 + $0x38] sm:$0xff]  ;;  %s13422_s19 = smov [#allocation10]  }
 0x828   : > { %11669 = vmatprep.subr.mxu1 %v11586_v50  ;;  %s13332_s21 = sshll.u32 %s13422_s19, 4  ;;  %s13333_s21 = int_to_ptr.vmem [resolvable:$false] %s13332_s21 }
 0x829   : > { %s13334_s17 = scalar_lea.vmem %s13333_s21, 2048  ;;  %p13335_p5 = scmp.lt.s32.totalorder %s15819_s14, %s13333_s21 }
 0x82a   : > { %p13336_p9 = scmp.lt.s32.totalorder %s13334_s17, %s13328_s22 }
 0x82c   : > { %p13337_p12 = por %p13336_p9, %p13335_p5 }
 0x82e   : > { %11661 = vmatmul.mubr.f32.vlgmr.msra.gmra.mrb[24].mxu1 %v15717_v16  ;;  %p13338_p2 = pnand %p13337_p12, %p13331_p3 }
 0x82f   : > { %11672 = vmatpush1.msra.mxu1 %v11592_v56  ;;  %11735 = vmatprep.mubr.f32.mxu1 %v15982_v22 }
 0x830   : > { %11745 = vmatprep.subr.mxu1 %v11507_v39 }
 0x836   : > { %11738 = vmatmul.mubr.f32.vlgmr.msra.gmra.mrb[24].mxu1 %v15720_v51 }
 0x837   : > { %11747 = vmatpush1.msra.mxu1 %v11509_v48  ;;  %11810 = vmatprep.mubr.f32.mxu1 %v15982_v22 }
 0x838   : > { %11823 = vmatprep.subr.mxu1 %v11587_v8 }
 0x83e   : > { %11814 = vmatmul.mubr.f32.vlgmr.msra.gmra.mrb[24].mxu1 %v15723_v14 }
 0x83f   : > { %11827 = vmatpush1.msra.mxu1 %v11593_v12  ;;  %11890 = vmatprep.mubr.f32.mxu1 %v15982_v22 }
 0x840   : > { %11899 = vmatprep.subr.mxu1 %v11507_v39 }
 0x846   : > { %11892 = vmatmul.mubr.f32.vlgmr.msra.gmra.mrb[24].mxu1 %v15717_v16 }
 0x847   : > { %11901 = vmatpush1.msra.mxu1 %v11509_v48  ;;  %11964 = vmatprep.mubr.f32.mxu1 %v15982_v22 }
 0x84e   : > { %11966 = vmatmul.mubr.f32.vlgmr.msra.gmra.mrb[24].mxu1 %v15717_v16 }
 0x89d   : > { %v10572_v51 = vpop.f32.mrb[18].mxu1 }
 0x89e   : > { %v12846_v24 = vadd.f32 %v10572_v51, %v15784_v41  ;;  %v10574_v60 = vpop.f32.mrb[19].mxu1 }
 0x89f   : > { %v12847_v14 = vadd.f32 %v10574_v60, %v15784_v41 }
 0x8a0   : > { %v12158_v30 = vmul.f32 -1.442695, %v12846_v24 }
 0x8a1   : > { %v12159_v53 = vmul.f32 -1.442695, %v12847_v14 }
 0x8a2   : > { %13194 = vpow2.f32 %v12158_v30 }
 0x8a3   : > { %13196 = vpow2.f32 %v12159_v53 }
 0x8ac   : > { %v13195_v20 = vpop.eup %13194 }
 0x8ad   : > { %v13197_v10 = vpop.eup %13196  ;;  %v11996_v22 = vadd.f32 1.0, %v13195_v20 }
 0x8ae   : > { %v11997_v61 = vadd.f32 1.0, %v13197_v10 }
 0x8af   : > { %13198 = vrcp.f32 %v11996_v22 }
 0x8b0   : > { %13200 = vrcp.f32 %v11997_v61 }
 0x8b9   : > { %v13199_v16 = vpop.eup %13198 }
 0x8ba   : > { %v13201_v42 = vpop.eup %13200  ;;  %v12020_v17 = vmul.f32 %v13226_v25, %v13199_v16 }
 0x8bb   : > { %v12021_v36 = vmul.f32 %v13227_v7, %v13201_v42 }
 0x8bc   : > { %12028 = vst [vmem:[%s15792_s12] sm:$0xff] %v12020_v17 }
 0x8bd   : > { %12029 = vst [vmem:[%s15792_s12 + $0x8] sm:$0xff] %v12021_v36 }
 0x8c9   : > { %v11037_v40 = vpop.f32.mrb[20].mxu1 }
 0x8ca   : > { %v12848_v5 = vadd.f32 %v11037_v40, %v15784_v41  ;;  %v11039_v38 = vpop.f32.mrb[21].mxu1 }
 0x8cb   : > { %v12849_v52 = vadd.f32 %v11039_v38, %v15784_v41 }
 0x8cc   : > { %v12160_v46 = vmul.f32 -1.442695, %v12848_v5 }
 0x8cd   : > { %v12161_v0 = vmul.f32 -1.442695, %v12849_v52 }
 0x8ce   : > { %13202 = vpow2.f32 %v12160_v46 }
 0x8cf   : > { %13204 = vpow2.f32 %v12161_v0 }
 0x8d8   : > { %v13203_v13 = vpop.eup %13202 }
 0x8d9   : > { %v13205_v15 = vpop.eup %13204  ;;  %v11998_v33 = vadd.f32 1.0, %v13203_v13 }
 0x8da   : > { %v11999_v27 = vadd.f32 1.0, %v13205_v15 }
 0x8db   : > { %13206 = vrcp.f32 %v11998_v33 }
 0x8dc   : > { %13208 = vrcp.f32 %v11999_v27 }
 0x8e5   : > { %v13207_v59 = vpop.eup %13206 }
 0x8e6   : > { %v13209_v11 = vpop.eup %13208  ;;  %v12022_v35 = vmul.f32 %v13228_v47, %v13207_v59 }
 0x8e7   : > { %v12023_v9 = vmul.f32 %v13229_v45, %v13209_v11 }
 0x8e8   : > { %12030 = vst [vmem:[%s15792_s12 + $0x10] sm:$0xff] %v12022_v35 }
 0x8e9   : > { %12031 = vst [vmem:[%s15792_s12 + $0x18] sm:$0xff] %v12023_v9 }
 0x8f5   : > { %v11502_v4 = vpop.f32.mrb[22].mxu1 }
 0x8f6   : > { %v12850_v29 = vadd.f32 %v11502_v4, %v15784_v41  ;;  %v11504_v21 = vpop.f32.mrb[23].mxu1 }
 0x8f7   : > { %v12851_v49 = vadd.f32 %v11504_v21, %v15784_v41 }
 0x8f8   : > { %v12162_v55 = vmul.f32 -1.442695, %v12850_v29 }
 0x8f9   : > { %v12163_v37 = vmul.f32 -1.442695, %v12851_v49 }
 0x8fa   : > { %13210 = vpow2.f32 %v12162_v55 }
 0x8fb   : > { %13212 = vpow2.f32 %v12163_v37 }
 0x904   : > { %v13211_v43 = vpop.eup %13210 }
 0x905   : > { %v13213_v26 = vpop.eup %13212  ;;  %v12000_v18 = vadd.f32 1.0, %v13211_v43 }
 0x906   : > { %v12001_v19 = vadd.f32 1.0, %v13213_v26 }
 0x907   : > { %13214 = vrcp.f32 %v12000_v18 }
 0x908   : > { %13216 = vrcp.f32 %v12001_v19 }
 0x911   : > { %v13215_v23 = vpop.eup %13214 }
 0x912   : > { %v13217_v44 = vpop.eup %13216  ;;  %v12024_v1 = vmul.f32 %v13230_v62, %v13215_v23 }
 0x913   : > { %v12025_v34 = vmul.f32 %v13231_v2, %v13217_v44 }
 0x914   : > { %12032 = vst [vmem:[%s15792_s12 + $0x20] sm:$0xff] %v12024_v1 }
 0x915   : > { %12033 = vst [vmem:[%s15792_s12 + $0x28] sm:$0xff] %v12025_v34 }
 0x921   : > { %v11967_v57 = vpop.f32.mrb[24].mxu1 }
 0x922   : > { %v12852_v54 = vadd.f32 %v11967_v57, %v15784_v41  ;;  %v11969_v31 = vpop.f32.mrb[25].mxu1 }
 0x923   : > { %v12853_v63 = vadd.f32 %v11969_v31, %v15784_v41 }
 0x924   : > { %v12164_v3 = vmul.f32 -1.442695, %v12852_v54 }
 0x925   : > { %v12165_v39 = vmul.f32 -1.442695, %v12853_v63 }
 0x926   : > { %13218 = vpow2.f32 %v12164_v3 }
 0x927   : > { %13220 = vpow2.f32 %v12165_v39 }
 0x930   : > { %v13219_v48 = vpop.eup %13218 }
 0x931   : > { %v13221_v50 = vpop.eup %13220  ;;  %v12002_v56 = vadd.f32 1.0, %v13219_v48 }
 0x932   : > { %v12003_v8 = vadd.f32 1.0, %v13221_v50 }
 0x933   : > { %13222 = vrcp.f32 %v12002_v56 }
 0x934   : > { %13224 = vrcp.f32 %v12003_v8 }
 0x93d   : > { %v13223_v12 = vpop.eup %13222 }
 0x93e   : > { %v13225_v28 = vpop.eup %13224  ;;  %v12026_v32 = vmul.f32 %v13232_v6, %v13223_v12 }
 0x93f   : > { %v12027_v41 = vmul.f32 %v13233_v58, %v13225_v28 }
 0x940   : > { %12034 = vst [vmem:[%s15792_s12 + $0x30] sm:$0xff] %v12026_v32 }
 0x941   : > { %12035 = vst [vmem:[%s15792_s12 + $0x38] sm:$0xff] %v12027_v41 }
 0x942   : > { %13341 = shalt.err (!%p13338_p2)
}
 0x943   : > { %s13342_s23 = scalar_lea.hbm %s15817_s25, 1024  ;;  %s13346_s20 = scalar_lea.hbm %s15987_s13, 2048 }
 0x944   : > { %p13343_p13 = scmp.ne.s32.totalorder %s15817_s25, %s13342_s23  ;;  %p13347_p4 = scmp.lt.u32.totalorder %s15817_s25, %s15987_s13 }
 0x945   : > { %p13348_p7 = scmp.lt.u32.totalorder %s13346_s20, %s13342_s23  ;;  %p13350_p11 = scmp.lt.u32.totalorder %s13342_s23, %s15817_s25 }
 0x946   : > { %p13344_p6 = pnand %p13343_p13, %p15988_p0 }
 0x947   : > { %p13349_p8 = por %p13348_p7, %p13347_p4 }
 0x948   : > { %p13345_p10 = pneg %p13344_p6 }
 0x949   : > { %p13351_p1 = por %p13350_p11, %p13349_p8 }
 0x94b   : > { %p13352_p3 = pnand %p13351_p1, %p13345_p10 }
 0x94d   : > { %13355 = shalt.err (!%p13352_p3)
}
 0x94e   : > { %13116 = dma.vmem_to_hbm [thread:$0]  (%p15988_p0), %s15819_s14, 1024, %s15817_s25, %s12037_s29  }
 0x94f PF: > { %s15989_s22 = sld [smem:[#allocation14_spill]]  ;;  %s15990_s19 = sld [smem:[#allocation15_spill]] }
 0x950   : > { %p15992_p9 = scmp.ge.s32.totalorder %s13398_s28, 2 }
 0x955   : > { %s12063_s21 = sand.u32 1, %s15989_s22   ;;  %p15991_p5 = scmp.ne.s32.totalorder %s15990_s19, 0 }
 0x956   : > { %s12064_s17 = scalar_lea.sflag [#allocation6], %s12063_s21 }
 0x957   : > { %p13130_p12 = pnand %p15992_p9, %p15991_p5 }
 0x959   : > { %13381 = dma.done.wait (!%p13130_p12), %s12064_s17, 1024  }
 0x95a   : > { %13383 = vsyncadd (!%p13130_p12), %s12064_s17, 4294966272  ;;  %p27_p2 = scmp.ge.s32.totalorder %s13603_s15, 4   ;;  %s15993_s25 = smov %s13390_s26 }
 0x95b   : > { %s15994_s26 = smov %s13394_s27  ;;  %s15995_s27 = smov %s13612_s24 }
 0x95c   : > { %s15996_s28 = smov %s13603_s15  ;;  %29 = sbr.rel (!%p27_p2) target bundleno = 10 (0xa), region = 125 }
 0x963   :  { %12069 = vsyncpa [#allocation5], 1 }
 0x964   :  { %12071 = vsyncpa [#allocation5 + $0x1], 1 }
 0x965   :  { %12072 = vsyncpa [#allocation8], 1 }
 0x966   :  { %12073 = vsyncpa [#allocation6], 1 }
 0x967   :  { %12075 = vsyncpa [#allocation6 + $0x1], 1 }

</bundles_post_ra>
